<compile_context>
chip_gen: v6e
topology: v6e:2x2x1
jax: 0.10.0
libtpu: 0.0.40
codegen_flags: <defaults>
</compile_context>

<pallas_src>
import functools

import jax
import jax.numpy as jnp
from jax import lax
from jax.experimental import pallas as pl
from jax.experimental.pallas import tpu as pltpu

KERNEL_TAPS = 5      # conv kernel size along F
PAD = 2              # circular padding along F (dilation=1 case, for the ref)
LN_EPS = 1e-5        # nn.LayerNorm default eps


def _circ_shift(a, s):
    """b[..., f] = a[..., (f + s) % n] along the last (lane) axis; s is static."""
    if s == 0:
        return a
    return jnp.concatenate([a[..., s:], a[..., :s]], axis=-1)


def _conv_glu_kernel(x_ref, w_ref, bg_ref, gamma_ref, beta_ref, out_ref,
                     xs_ref, *, taps, dilation):
    # x_ref:      (T, Cin, F)            bf16 input block (F on lanes)
    # w_ref:      (2*Cout, 2*taps*Cin)   block-diagonal fused weights (bf16)
    # bg_ref:     (Cout, 1)              gate-conv bias (f32)
    # gamma/beta: (Cin, F)               LN affine params (f32)
    # out_ref:    (T, Cout, F)
    # xs_ref:     (T, 2*taps*Cin, F)     VMEM scratch: im2col-on-K RHS (bf16)
    T, Cin, F = x_ref.shape
    Cout = out_ref.shape[1]
    half = (taps - 1) // 2                      # circular pad = half * dilation
    inv_n = 1.0 / float(Cin * F)

    x_bf = x_ref[...]                           # (T, Cin, F) bf16
    x = x_bf.astype(jnp.float32)

    # ---- LayerNorm over (Cin, F) per frame, vectorized across T (2-pass) ----
    s1 = jnp.sum(jnp.sum(x, axis=2, keepdims=True), axis=1, keepdims=True)
    mean = s1 * inv_n                           # (T, 1, 1)
    xc = x - mean
    s2 = jnp.sum(jnp.sum(xc * xc, axis=2, keepdims=True), axis=1, keepdims=True)
    inv = lax.rsqrt(s2 * inv_n + LN_EPS)        # (T, 1, 1)
    ln_bf = ((xc * inv) * gamma_ref[...] + beta_ref[...]).astype(jnp.bfloat16)

    # ---- im2col-on-K: circular shifts stacked on the contraction axis ----
    # rows [k*Cin:(k+1)*Cin]            hold x[..., (f + (k-half)*dil) % F]
    # rows [(taps+k)*Cin:(taps+k+1)*Cin] hold the same shift of LN(x)
    for k in range(taps):
        s = ((k - half) * dilation) % F
        xs_ref[:, k * Cin:(k + 1) * Cin, :] = _circ_shift(x_bf, s)
        xs_ref[:, (taps + k) * Cin:(taps + k + 1) * Cin, :] = _circ_shift(ln_bf, s)

    # ---- one batched matmul for both branches (block-diagonal weight) ----
    # (T, 2*Cout, K) x (T, K, F) -> (T, 2*Cout, F), f32 accumulation on MXU.
    w = w_ref[...]
    wb = jnp.broadcast_to(w, (T,) + w.shape)    # hoisted, single broadcast
    r = jnp.einsum('tok,tkf->tof', wb, xs_ref[...],
                   preferred_element_type=jnp.float32)

    main = r[:, :Cout, :]                                    # (T, Cout, F)
    gate = jax.nn.sigmoid(r[:, Cout:, :] + bg_ref[...])      # bias broadcasts
    out_ref[...] = (main * gate).astype(out_ref.dtype)       # one dense store


def _fuse_weights(w_main, w_gate):
    """(Cout,Cin,K,1) x2 -> block-diagonal (2*Cout, 2*K*Cin) bf16; col = k*Cin+i."""
    Cout, Cin, K, _ = w_main.shape
    wm = jnp.transpose(w_main[..., 0], (0, 2, 1)).reshape(Cout, K * Cin)
    wg = jnp.transpose(w_gate[..., 0], (0, 2, 1)).reshape(Cout, K * Cin)
    z = jnp.zeros_like(wm)
    top = jnp.concatenate([wm, z], axis=1)       # main conv sees x-rolls only
    bot = jnp.concatenate([z, wg], axis=1)       # gate conv sees LN-rolls only
    return jnp.concatenate([top, bot], axis=0).astype(jnp.bfloat16)


def conv_glu_pallas(x_nchw, w_main, w_gate, b_gate, ln_gamma, ln_beta,
                    dilation=1):
    """x_nchw: (B, Cin, F, T); w_*: (Cout, Cin, K, 1); b_gate: (Cout,);
    ln_gamma/ln_beta: (Cin, F).  Returns (B, Cout, F, T) like the torch module."""
    B, Cin, F, T = x_nchw.shape
    Cout, _, K, _ = w_main.shape

    # Glue: layout change (F onto lanes) fused with the bf16 cast; no padding.
    x_t = jnp.transpose(x_nchw, (0, 3, 1, 2)).astype(jnp.bfloat16)  # (B,T,Cin,F)
    w_fused = _fuse_weights(w_main, w_gate)                         # (2Co, 2K*Ci)
    bg = b_gate.reshape(Cout, 1).astype(jnp.float32)
    gamma = ln_gamma.astype(jnp.float32)
    beta = ln_beta.astype(jnp.float32)

    kern = functools.partial(_conv_glu_kernel, taps=K, dilation=dilation)

    out = pl.pallas_call(
        kern,
        out_shape=jax.ShapeDtypeStruct((B, T, Cout, F), x_nchw.dtype),
        grid_spec=pltpu.PrefetchScalarGridSpec(
            num_scalar_prefetch=0,
            grid=(B,),
            in_specs=[
                pl.BlockSpec((None, T, Cin, F), lambda b: (b, 0, 0, 0)),
                pl.BlockSpec((2 * Cout, 2 * K * Cin), lambda b: (0, 0)),
                pl.BlockSpec((Cout, 1), lambda b: (0, 0)),
                pl.BlockSpec((Cin, F), lambda b: (0, 0)),
                pl.BlockSpec((Cin, F), lambda b: (0, 0)),
            ],
            out_specs=pl.BlockSpec((None, T, Cout, F),
                                   lambda b: (b, 0, 0, 0)),
            scratch_shapes=[pltpu.VMEM((T, 2 * K * Cin, F), jnp.bfloat16)],
        ),
        compiler_params=pltpu.CompilerParams(
            dimension_semantics=("parallel",)),
    )(x_t, w_fused, bg, gamma, beta)

    return jnp.transpose(out, (0, 2, 3, 1))                         # (B,Cout,F,T)


def conv_glu_reference(x, w_main, w_gate, b_gate, ln_gamma, ln_beta):
    """Pure-JAX reference mirroring the PyTorch forward (for validation)."""
    B, Cin, F, T = x.shape
    xp = jnp.transpose(x, (0, 3, 1, 2))                           # (B, T, C, F)
    mean = jnp.mean(xp, axis=(2, 3), keepdims=True)
    var = jnp.mean(jnp.square(xp - mean), axis=(2, 3), keepdims=True)
    ln = (xp - mean) / jnp.sqrt(var + LN_EPS) * ln_gamma + ln_beta
    ln = jnp.transpose(ln, (0, 2, 3, 1))                          # (B, C, F, T)

    def circ_conv(inp, w):
        padded = jnp.concatenate(
            [inp[:, :, F - PAD:], inp, inp[:, :, :PAD]], axis=2)
        out = jnp.zeros((B, w.shape[0], F, T), jnp.float32)
        for k in range(KERNEL_TAPS):
            out = out + jnp.einsum('oi,bift->boft', w[:, :, k, 0],
                                   padded[:, :, k:k + F],
                                   precision=lax.Precision.HIGHEST)
        return out

    main = circ_conv(x, w_main)
    gate = jax.nn.sigmoid(circ_conv(ln, w_gate) +
                          b_gate[None, :, None, None])
    return main * gate


if __name__ == "__main__":
    # F must be 257 because the module hardcodes LayerNorm(in_channels, f=257).
    B, Cin, Cout, F, T = 2, 4, 8, 257, 8
    key = jax.random.PRNGKey(0)
    k1, k2, k3, k4, k5, k6 = jax.random.split(key, 6)

    x = jax.random.normal(k1, (B, Cin, F, T), jnp.float32)
    w_main = 0.1 * jax.random.normal(k2, (Cout, Cin, KERNEL_TAPS, 1), jnp.float32)
    w_gate = 0.1 * jax.random.normal(k3, (Cout, Cin, KERNEL_TAPS, 1), jnp.float32)
    b_gate = 0.1 * jax.random.normal(k4, (Cout,), jnp.float32)
    ln_gamma = 1.0 + 0.1 * jax.random.normal(k5, (Cin, F), jnp.float32)
    ln_beta = 0.1 * jax.random.normal(k6, (Cin, F), jnp.float32)

    out = jax.jit(conv_glu_pallas)(x, w_main, w_gate, b_gate, ln_gamma, ln_beta)
    out = jax.block_until_ready(out)

    ref = conv_glu_reference(x, w_main, w_gate, b_gate, ln_gamma, ln_beta)
    assert out.shape == (B, Cout, F, T), out.shape
    max_err = float(jnp.max(jnp.abs(out - ref)))
    assert max_err < 2e-2, f"max abs err too large: {max_err}"
    print("KERNEL_OK")
</pallas_src>

<mosaic_0001>
module attributes {stable_mosaic.version = 11 : i64} {
  func.func @_conv_glu_kernel(%arg0: i32, %arg1: memref<1x8x4x257xbf16, #tpu.memory_space<vmem>>, %arg2: memref<16x40xbf16, #tpu.memory_space<vmem>>, %arg3: memref<8x1xf32, #tpu.memory_space<vmem>>, %arg4: memref<4x257xf32, #tpu.memory_space<vmem>>, %arg5: memref<4x257xf32, #tpu.memory_space<vmem>>, %arg6: memref<1x8x8x257xf32, #tpu.memory_space<vmem>>, %arg7: memref<8x40x257xbf16, #tpu.memory_space<vmem>>) attributes {dimension_semantics = [#tpu.dimension_semantics<parallel>], iteration_bounds = array<i64: 2>, scalar_prefetch = 0 : i64, scratch_operands = 1 : i64, tpu.core_type = #tpu.core_type<tc>, window_params = [{transform_indices = @transform_0, window_bounds = array<i64: 1, 8, 4, 257>}, {pipeline_mode = #tpu.pipeline_mode<synchronous>, transform_indices = @transform_1, window_bounds = array<i64: 16, 40>}, {pipeline_mode = #tpu.pipeline_mode<synchronous>, transform_indices = @transform_2, window_bounds = array<i64: 8, 1>}, {pipeline_mode = #tpu.pipeline_mode<synchronous>, transform_indices = @transform_3, window_bounds = array<i64: 4, 257>}, {pipeline_mode = #tpu.pipeline_mode<synchronous>, transform_indices = @transform_4, window_bounds = array<i64: 4, 257>}, {transform_indices = @transform_5, window_bounds = array<i64: 1, 8, 8, 257>}]} {
    %c0 = arith.constant 0 : index
    %c0_0 = arith.constant 0 : index
    %c0_1 = arith.constant 0 : index
    %c0_2 = arith.constant 0 : index
    %0 = vector.load %arg1[%c0, %c0_0, %c0_1, %c0_2] : memref<1x8x4x257xbf16, #tpu.memory_space<vmem>>, vector<1x8x4x257xbf16>
    %1 = vector.shape_cast %0 : vector<1x8x4x257xbf16> to vector<8x4x257xbf16>
    %2 = arith.extf %1 : vector<8x4x257xbf16> to vector<8x4x257xf32>
    %cst = arith.constant dense<0.000000e+00> : vector<8x4xf32>
    %3 = vector.multi_reduction <add>, %2, %cst [2] : vector<8x4x257xf32> to vector<8x4xf32>
    %4 = vector.shape_cast %3 : vector<8x4xf32> to vector<8x4x1xf32>
    %cst_3 = arith.constant dense<0.000000e+00> : vector<8x1xf32>
    %5 = vector.multi_reduction <add>, %4, %cst_3 [1] : vector<8x4x1xf32> to vector<8x1xf32>
    %6 = vector.shape_cast %5 : vector<8x1xf32> to vector<8x1x1xf32>
    %cst_4 = arith.constant 9.72762646E-4 : f32
    %7 = vector.broadcast %cst_4 : f32 to vector<8x1x1xf32>
    %8 = arith.mulf %6, %7 : vector<8x1x1xf32>
    %9 = vector.broadcast %8 : vector<8x1x1xf32> to vector<8x4x257xf32>
    %10 = arith.subf %2, %9 : vector<8x4x257xf32>
    %11 = arith.mulf %10, %10 : vector<8x4x257xf32>
    %cst_5 = arith.constant dense<0.000000e+00> : vector<8x4xf32>
    %12 = vector.multi_reduction <add>, %11, %cst_5 [2] : vector<8x4x257xf32> to vector<8x4xf32>
    %13 = vector.shape_cast %12 : vector<8x4xf32> to vector<8x4x1xf32>
    %cst_6 = arith.constant dense<0.000000e+00> : vector<8x1xf32>
    %14 = vector.multi_reduction <add>, %13, %cst_6 [1] : vector<8x4x1xf32> to vector<8x1xf32>
    %15 = vector.shape_cast %14 : vector<8x1xf32> to vector<8x1x1xf32>
    %cst_7 = arith.constant 9.72762646E-4 : f32
    %16 = vector.broadcast %cst_7 : f32 to vector<8x1x1xf32>
    %17 = arith.mulf %15, %16 : vector<8x1x1xf32>
    %cst_8 = arith.constant 9.99999974E-6 : f32
    %18 = vector.broadcast %cst_8 : f32 to vector<8x1x1xf32>
    %19 = arith.addf %17, %18 : vector<8x1x1xf32>
    %20 = math.rsqrt %19 : vector<8x1x1xf32>
    %21 = vector.broadcast %20 : vector<8x1x1xf32> to vector<8x4x257xf32>
    %22 = arith.mulf %10, %21 : vector<8x4x257xf32>
    %c0_9 = arith.constant 0 : index
    %c0_10 = arith.constant 0 : index
    %23 = vector.load %arg4[%c0_9, %c0_10] : memref<4x257xf32, #tpu.memory_space<vmem>>, vector<4x257xf32>
    %24 = vector.shape_cast %23 : vector<4x257xf32> to vector<1x4x257xf32>
    %25 = vector.broadcast %24 : vector<1x4x257xf32> to vector<8x4x257xf32>
    %26 = arith.mulf %22, %25 : vector<8x4x257xf32>
    %c0_11 = arith.constant 0 : index
    %c0_12 = arith.constant 0 : index
    %27 = vector.load %arg5[%c0_11, %c0_12] : memref<4x257xf32, #tpu.memory_space<vmem>>, vector<4x257xf32>
    %28 = vector.shape_cast %27 : vector<4x257xf32> to vector<1x4x257xf32>
    %29 = vector.broadcast %28 : vector<1x4x257xf32> to vector<8x4x257xf32>
    %30 = arith.addf %26, %29 : vector<8x4x257xf32>
    %31 = arith.truncf %30 : vector<8x4x257xf32> to vector<8x4x257xbf16>
    %32 = vector.extract_strided_slice %1 {offsets = [0, 0, 255], sizes = [8, 4, 2], strides = [1, 1, 1]} : vector<8x4x257xbf16> to vector<8x4x2xbf16>
    %33 = vector.extract_strided_slice %1 {offsets = [0, 0, 0], sizes = [8, 4, 255], strides = [1, 1, 1]} : vector<8x4x257xbf16> to vector<8x4x255xbf16>
    %34 = tpu.concatenate %32, %33 in 2 : vector<8x4x2xbf16>, vector<8x4x255xbf16> -> vector<8x4x257xbf16>
    %c0_13 = arith.constant 0 : index
    %c0_14 = arith.constant 0 : index
    %c0_15 = arith.constant 0 : index
    %35 = vector.load %arg7[%c0_13, %c0_14, %c0_15] : memref<8x40x257xbf16, #tpu.memory_space<vmem>>, vector<8x4x257xbf16>
    tpu.vector_store %arg7[%c0_13, %c0_14, %c0_15], %34 {strides = array<i32>} : memref<8x40x257xbf16, #tpu.memory_space<vmem>>, vector<8x4x257xbf16>,
    %36 = vector.extract_strided_slice %31 {offsets = [0, 0, 255], sizes = [8, 4, 2], strides = [1, 1, 1]} : vector<8x4x257xbf16> to vector<8x4x2xbf16>
    %37 = vector.extract_strided_slice %31 {offsets = [0, 0, 0], sizes = [8, 4, 255], strides = [1, 1, 1]} : vector<8x4x257xbf16> to vector<8x4x255xbf16>
    %38 = tpu.concatenate %36, %37 in 2 : vector<8x4x2xbf16>, vector<8x4x255xbf16> -> vector<8x4x257xbf16>
    %c0_16 = arith.constant 0 : index
    %c20 = arith.constant 20 : index
    %c0_17 = arith.constant 0 : index
    %39 = vector.load %arg7[%c0_16, %c20, %c0_17] : memref<8x40x257xbf16, #tpu.memory_space<vmem>>, vector<8x4x257xbf16>
    tpu.vector_store %arg7[%c0_16, %c20, %c0_17], %38 {strides = array<i32>} : memref<8x40x257xbf16, #tpu.memory_space<vmem>>, vector<8x4x257xbf16>,
    %40 = vector.extract_strided_slice %1 {offsets = [0, 0, 256], sizes = [8, 4, 1], strides = [1, 1, 1]} : vector<8x4x257xbf16> to vector<8x4x1xbf16>
    %41 = vector.extract_strided_slice %1 {offsets = [0, 0, 0], sizes = [8, 4, 256], strides = [1, 1, 1]} : vector<8x4x257xbf16> to vector<8x4x256xbf16>
    %42 = tpu.concatenate %40, %41 in 2 : vector<8x4x1xbf16>, vector<8x4x256xbf16> -> vector<8x4x257xbf16>
    %c0_18 = arith.constant 0 : index
    %c4 = arith.constant 4 : index
    %c0_19 = arith.constant 0 : index
    %43 = vector.load %arg7[%c0_18, %c4, %c0_19] : memref<8x40x257xbf16, #tpu.memory_space<vmem>>, vector<8x4x257xbf16>
    tpu.vector_store %arg7[%c0_18, %c4, %c0_19], %42 {strides = array<i32>} : memref<8x40x257xbf16, #tpu.memory_space<vmem>>, vector<8x4x257xbf16>,
    %44 = vector.extract_strided_slice %31 {offsets = [0, 0, 256], sizes = [8, 4, 1], strides = [1, 1, 1]} : vector<8x4x257xbf16> to vector<8x4x1xbf16>
    %45 = vector.extract_strided_slice %31 {offsets = [0, 0, 0], sizes = [8, 4, 256], strides = [1, 1, 1]} : vector<8x4x257xbf16> to vector<8x4x256xbf16>
    %46 = tpu.concatenate %44, %45 in 2 : vector<8x4x1xbf16>, vector<8x4x256xbf16> -> vector<8x4x257xbf16>
    %c0_20 = arith.constant 0 : index
    %c24 = arith.constant 24 : index
    %c0_21 = arith.constant 0 : index
    %47 = vector.load %arg7[%c0_20, %c24, %c0_21] : memref<8x40x257xbf16, #tpu.memory_space<vmem>>, vector<8x4x257xbf16>
    tpu.vector_store %arg7[%c0_20, %c24, %c0_21], %46 {strides = array<i32>} : memref<8x40x257xbf16, #tpu.memory_space<vmem>>, vector<8x4x257xbf16>,
    %c0_22 = arith.constant 0 : index
    %c8 = arith.constant 8 : index
    %c0_23 = arith.constant 0 : index
    %48 = vector.load %arg7[%c0_22, %c8, %c0_23] : memref<8x40x257xbf16, #tpu.memory_space<vmem>>, vector<8x4x257xbf16>
    tpu.vector_store %arg7[%c0_22, %c8, %c0_23], %1 {strides = array<i32>} : memref<8x40x257xbf16, #tpu.memory_space<vmem>>, vector<8x4x257xbf16>,
    %c0_24 = arith.constant 0 : index
    %c28 = arith.constant 28 : index
    %c0_25 = arith.constant 0 : index
    %49 = vector.load %arg7[%c0_24, %c28, %c0_25] : memref<8x40x257xbf16, #tpu.memory_space<vmem>>, vector<8x4x257xbf16>
    tpu.vector_store %arg7[%c0_24, %c28, %c0_25], %31 {strides = array<i32>} : memref<8x40x257xbf16, #tpu.memory_space<vmem>>, vector<8x4x257xbf16>,
    %50 = vector.extract_strided_slice %1 {offsets = [0, 0, 1], sizes = [8, 4, 256], strides = [1, 1, 1]} : vector<8x4x257xbf16> to vector<8x4x256xbf16>
    %51 = vector.extract_strided_slice %1 {offsets = [0, 0, 0], sizes = [8, 4, 1], strides = [1, 1, 1]} : vector<8x4x257xbf16> to vector<8x4x1xbf16>
    %52 = tpu.concatenate %50, %51 in 2 : vector<8x4x256xbf16>, vector<8x4x1xbf16> -> vector<8x4x257xbf16>
    %c0_26 = arith.constant 0 : index
    %c12 = arith.constant 12 : index
    %c0_27 = arith.constant 0 : index
    %53 = vector.load %arg7[%c0_26, %c12, %c0_27] : memref<8x40x257xbf16, #tpu.memory_space<vmem>>, vector<8x4x257xbf16>
    tpu.vector_store %arg7[%c0_26, %c12, %c0_27], %52 {strides = array<i32>} : memref<8x40x257xbf16, #tpu.memory_space<vmem>>, vector<8x4x257xbf16>,
    %54 = vector.extract_strided_slice %31 {offsets = [0, 0, 1], sizes = [8, 4, 256], strides = [1, 1, 1]} : vector<8x4x257xbf16> to vector<8x4x256xbf16>
    %55 = vector.extract_strided_slice %31 {offsets = [0, 0, 0], sizes = [8, 4, 1], strides = [1, 1, 1]} : vector<8x4x257xbf16> to vector<8x4x1xbf16>
    %56 = tpu.concatenate %54, %55 in 2 : vector<8x4x256xbf16>, vector<8x4x1xbf16> -> vector<8x4x257xbf16>
    %c0_28 = arith.constant 0 : index
    %c32 = arith.constant 32 : index
    %c0_29 = arith.constant 0 : index
    %57 = vector.load %arg7[%c0_28, %c32, %c0_29] : memref<8x40x257xbf16, #tpu.memory_space<vmem>>, vector<8x4x257xbf16>
    tpu.vector_store %arg7[%c0_28, %c32, %c0_29], %56 {strides = array<i32>} : memref<8x40x257xbf16, #tpu.memory_space<vmem>>, vector<8x4x257xbf16>,
    %58 = vector.extract_strided_slice %1 {offsets = [0, 0, 2], sizes = [8, 4, 255], strides = [1, 1, 1]} : vector<8x4x257xbf16> to vector<8x4x255xbf16>
    %59 = vector.extract_strided_slice %1 {offsets = [0, 0, 0], sizes = [8, 4, 2], strides = [1, 1, 1]} : vector<8x4x257xbf16> to vector<8x4x2xbf16>
    %60 = tpu.concatenate %58, %59 in 2 : vector<8x4x255xbf16>, vector<8x4x2xbf16> -> vector<8x4x257xbf16>
    %c0_30 = arith.constant 0 : index
    %c16 = arith.constant 16 : index
    %c0_31 = arith.constant 0 : index
    %61 = vector.load %arg7[%c0_30, %c16, %c0_31] : memref<8x40x257xbf16, #tpu.memory_space<vmem>>, vector<8x4x257xbf16>
    tpu.vector_store %arg7[%c0_30, %c16, %c0_31], %60 {strides = array<i32>} : memref<8x40x257xbf16, #tpu.memory_space<vmem>>, vector<8x4x257xbf16>,
    %62 = vector.extract_strided_slice %31 {offsets = [0, 0, 2], sizes = [8, 4, 255], strides = [1, 1, 1]} : vector<8x4x257xbf16> to vector<8x4x255xbf16>
    %63 = vector.extract_strided_slice %31 {offsets = [0, 0, 0], sizes = [8, 4, 2], strides = [1, 1, 1]} : vector<8x4x257xbf16> to vector<8x4x2xbf16>
    %64 = tpu.concatenate %62, %63 in 2 : vector<8x4x255xbf16>, vector<8x4x2xbf16> -> vector<8x4x257xbf16>
    %c0_32 = arith.constant 0 : index
    %c36 = arith.constant 36 : index
    %c0_33 = arith.constant 0 : index
    %65 = vector.load %arg7[%c0_32, %c36, %c0_33] : memref<8x40x257xbf16, #tpu.memory_space<vmem>>, vector<8x4x257xbf16>
    tpu.vector_store %arg7[%c0_32, %c36, %c0_33], %64 {strides = array<i32>} : memref<8x40x257xbf16, #tpu.memory_space<vmem>>, vector<8x4x257xbf16>,
    %c0_34 = arith.constant 0 : index
    %c0_35 = arith.constant 0 : index
    %66 = vector.load %arg2[%c0_34, %c0_35] : memref<16x40xbf16, #tpu.memory_space<vmem>>, vector<16x40xbf16>
    %67 = vector.shape_cast %66 : vector<16x40xbf16> to vector<1x16x40xbf16>
    %68 = vector.broadcast %67 : vector<1x16x40xbf16> to vector<8x16x40xbf16>
    %c0_36 = arith.constant 0 : index
    %c0_37 = arith.constant 0 : index
    %c0_38 = arith.constant 0 : index
    %69 = vector.load %arg7[%c0_36, %c0_37, %c0_38] : memref<8x40x257xbf16, #tpu.memory_space<vmem>>, vector<8x40x257xbf16>
    "tpu.trace_start"() <{level = 10 : i32, message = "tok,tkf->tof"}> : () -> ()
    %cst_39 = arith.constant dense<0.000000e+00> : vector<8x16x257xf32>
    %70 = tpu.matmul %68, %69, %cst_39 {dimension_numbers = #tpu.dot_dimension_numbers<[2], [1], [1], [2], [0, 0, 0, 1, 1, 2], [0], [0]>} : vector<8x16x40xbf16>, vector<8x40x257xbf16>, vector<8x16x257xf32> -> vector<8x16x257xf32>
    "tpu.trace_stop"() : () -> ()
    %71 = vector.extract_strided_slice %70 {offsets = [0, 0, 0], sizes = [8, 8, 257], strides = [1, 1, 1]} : vector<8x16x257xf32> to vector<8x8x257xf32>
    %72 = vector.extract_strided_slice %70 {offsets = [0, 8, 0], sizes = [8, 8, 257], strides = [1, 1, 1]} : vector<8x16x257xf32> to vector<8x8x257xf32>
    %c0_40 = arith.constant 0 : index
    %c0_41 = arith.constant 0 : index
    %73 = vector.load %arg3[%c0_40, %c0_41] : memref<8x1xf32, #tpu.memory_space<vmem>>, vector<8x1xf32>
    %74 = vector.shape_cast %73 : vector<8x1xf32> to vector<1x8x1xf32>
    %75 = vector.broadcast %74 : vector<1x8x1xf32> to vector<8x8x257xf32>
    %76 = arith.addf %72, %75 : vector<8x8x257xf32>
    %77 = arith.negf %76 : vector<8x8x257xf32>
    %78 = math.exp %77 : vector<8x8x257xf32>
    %cst_42 = arith.constant 1.000000e+00 : f32
    %79 = vector.broadcast %cst_42 : f32 to vector<8x8x257xf32>
    %80 = arith.addf %79, %78 : vector<8x8x257xf32>
    %81 = arith.divf %79, %80 : vector<8x8x257xf32>
    %82 = arith.mulf %71, %81 : vector<8x8x257xf32>
    %c0_43 = arith.constant 0 : index
    %c0_44 = arith.constant 0 : index
    %c0_45 = arith.constant 0 : index
    %c0_46 = arith.constant 0 : index
    %83 = vector.load %arg6[%c0_43, %c0_44, %c0_45, %c0_46] : memref<1x8x8x257xf32, #tpu.memory_space<vmem>>, vector<1x8x8x257xf32>
    %84 = vector.shape_cast %83 : vector<1x8x8x257xf32> to vector<8x8x257xf32>
    %85 = vector.shape_cast %82 : vector<8x8x257xf32> to vector<1x8x8x257xf32>
    tpu.vector_store %arg6[%c0_43, %c0_44, %c0_45, %c0_46], %85 {strides = array<i32>} : memref<1x8x8x257xf32, #tpu.memory_space<vmem>>, vector<1x8x8x257xf32>,
    return
  }
  func.func @transform_0(%arg0: i32) -> (i32, i32, i32, i32) {
    %c0_i32 = arith.constant 0 : i32
    %c0_i32_0 = arith.constant 0 : i32
    %c0_i32_1 = arith.constant 0 : i32
    %c0_i32_2 = arith.constant 0 : i32
    return %arg0, %c0_i32, %c0_i32_0, %c0_i32_1 : i32, i32, i32, i32
  }
  func.func @transform_1(%arg0: i32) -> (i32, i32) {
    %c0_i32 = arith.constant 0 : i32
    %c0_i32_0 = arith.constant 0 : i32
    %c0_i32_1 = arith.constant 0 : i32
    return %c0_i32, %c0_i32_0 : i32, i32
  }
  func.func @transform_2(%arg0: i32) -> (i32, i32) {
    %c0_i32 = arith.constant 0 : i32
    %c0_i32_0 = arith.constant 0 : i32
    %c0_i32_1 = arith.constant 0 : i32
    return %c0_i32, %c0_i32_0 : i32, i32
  }
  func.func @transform_3(%arg0: i32) -> (i32, i32) {
    %c0_i32 = arith.constant 0 : i32
    %c0_i32_0 = arith.constant 0 : i32
    %c0_i32_1 = arith.constant 0 : i32
    return %c0_i32, %c0_i32_0 : i32, i32
  }
  func.func @transform_4(%arg0: i32) -> (i32, i32) {
    %c0_i32 = arith.constant 0 : i32
    %c0_i32_0 = arith.constant 0 : i32
    %c0_i32_1 = arith.constant 0 : i32
    return %c0_i32, %c0_i32_0 : i32, i32
  }
  func.func @transform_5(%arg0: i32) -> (i32, i32, i32, i32) {
    %c0_i32 = arith.constant 0 : i32
    %c0_i32_0 = arith.constant 0 : i32
    %c0_i32_1 = arith.constant 0 : i32
    %c0_i32_2 = arith.constant 0 : i32
    return %arg0, %c0_i32, %c0_i32_0, %c0_i32_1 : i32, i32, i32, i32
  }
}

</mosaic_0001>

<bundles_post_ra>
// kernel: conv_glu_pallas.1
= control target key start
LH: loop header
LB: loop body
LE: loop exit
PB: predicated region body
PF: predicated region fallthrough
CT: control target
= control target key end

     0   :  { %s4376_s18 = smov 0   ;;  %s5907_s0 = inlined_call_operand.vmem [shape: bf16[2,8,4,257], index: 0, kind: input, shape index: {}]   ;;  %s5908_s1 = inlined_call_operand.vmem [shape: bf16[16,40], index: 1, kind: input, shape index: {}]   ;;  %s5909_s2 = inlined_call_operand.vmem [shape: f32[8,1], index: 2, kind: input, shape index: {}]   ;;  %s5910_s3 = inlined_call_operand.vmem [shape: f32[4,257], index: 3, kind: input, shape index: {}]   ;;  %s5911_s4 = inlined_call_operand.vmem [shape: f32[4,257], index: 4, kind: input, shape index: {}]   ;;  %s5912_s5 = inlined_call_operand.vmem [shape: f32[2,8,8,257], index: 5, kind: output, shape index: {}]  }
   0x1 LB: > { %s3697_s19 = sadd.s32 4294967295, %s4336_s18   ;;  %p3701_p0 = scmp.ge.s32.totalorder %s4336_s18, 1  ;;  %s4336_s18 = sphi %s4376_s18, %s15_s18  }
   0x2   : > { %p187_p1 = scmp.lt.s32.totalorder %s4336_s18, 3 }
   0x4   : > { %p188_p2 = pnand %p3701_p0, %p187_p1 }
   0x6   : > { %191 = sbr.rel (%p188_p2) target bundleno = 1014 (0x3f6), region = 40 }
   0xb   : > { %p215_p3 = scmp.lt.s32.totalorder %s3697_s19, 1  ;;  %v700_v0 = vlaneseq  ;;  %v4338_v1 = vmov 1983009808   ;;  %vm996_vm0 = vcmask 1024   ;;  %vm1221_vm1 = vcmask 3074   ;;  %s4339_s24 = smov 126  }
   0xc   : > { %v698_v2 = vunpack.c.l.s4 %v4338_v1  ;;  %vm274_vm2 = vcmask 1043456   ;;  %vm278_vm3 = vcmask 3072   ;;  %s4340_s25 = smov 127   ;;  %s4341_s26 = smov 1   ;;  %vm1959_vm4 = vcmask 1031168  }
   0xd   : > { %s5926_s19 = smov (!%p215_p3, %s3697_s19), 1  ;;  %v701_v3 = vshrl.u32 %v700_v0, 7  ;;  %s4342_s27 = smov 2   ;;  %vm1678_vm5 = vcmask 1039360   ;;  %vm856_vm6 = vcmask 7168   ;;  %vm897_vm7 = vcmask 15360  }
   0xe   : > { %v699_v4 = vunpack.c.0.s8 %v698_v2  ;;  %s4115_s20 = smul.u32 48, %s5926_s19  ;;  %vm4344_vm8 = vmmov 0   ;;  %vm2392_vm9 = vcmask 326656  }
   0xf   : > { %s4116_s15 = smul.u32 192, %s5926_s19 }
  0x10   : > { %v4387_v5 = vsub.s32 %v699_v4, %v701_v3  ;;  %s219_s23 = scalar_lea.vmem %s5907_s0, %s4115_s20 }
  0x11   : > { %v4392_v6 = vld [vmem:[%s219_s23] sm:$0x3f]  ;;  %v4394_v7 = vld [vmem:[%s219_s23 + $0x6] sm:$0x3f]  ;;  %v4396_v8 = vld [vmem:[%s219_s23 + $0xc] sm:$0x3f]  ;;  %s5809_s20 = scalar_lea.vmem %s5912_s5, %s4116_s15 }
  0x12   : > { %v4400_v9 = vrot.slane %v4392_v6, %v4387_v5  ;;  %v3793_v10 = vcombine.low %v4392_v6, %v4392_v6  ;;  %3768 = vst.sshfl [vmem:[#allocation2 + $0xc] sm:$0xf pattern:$0x76325410] %v4392_v6  ;;  %v696_v11 = vcombine.high %v4392_v6, %v4392_v6  ;;  %v4409_v12 = vld [vmem:[%s219_s23 + $0x18] sm:$0x3f]  ;;  %v3795_v15 = vcombine.low %v4394_v7, %v4394_v7 }
  0x13   : > { %3769 = vst.sshfl [vmem:[#allocation2 + $0x48] sm:$0xf pattern:$0x76325410] %v4394_v7  ;;  %v4411_v13 = vld [vmem:[%s219_s23 + $0x12] sm:$0x3f]  ;;  %v3797_v22 = vcombine.low %v4396_v8, %v4396_v8  ;;  %v3801_v24 = vcombine.low %v4409_v12, %v4409_v12  ;;  %v4455_v30 = vunpack.c.l.bf16 %v4392_v6  ;;  %v4459_v33 = vunpack.c.l.bf16 %v4394_v7 }
  0x14   : > { %3770 = vst.sshfl [vmem:[#allocation2 + $0x84] sm:$0xf pattern:$0x76325410] %v4396_v8  ;;  %v4413_v14 = vld [vmem:[%s219_s23 + $0x24] sm:$0x3f]  ;;  %v4426_v18 = vcombine.high %v4400_v9, %v4400_v9  ;;  %v4429_v20 = vrot.slane %v696_v11, %v4387_v5  ;;  %v3799_v25 = vcombine.low %v4411_v13, %v4411_v13  ;;  %v4467_v36 = vunpack.c.l.bf16 %v4396_v8 }
  0x15   : > { %3772 = vst.sshfl [vmem:[#allocation2 + $0xfc] sm:$0xf pattern:$0x76325410] %v4409_v12  ;;  %v4420_v16 = vld [vmem:[%s219_s23 + $0x1e] sm:$0x3f]  ;;  %v3805_v28 = vcombine.low %v4413_v14, %v4413_v14  ;;  %v258_v35 = vcombine.high %v4455_v30, %v4455_v30  ;;  %v712_v37 = vcombine.high %v4394_v7, %v4394_v7  ;;  %v728_v38 = vcombine.high %v4396_v8, %v4396_v8 }
  0x16   : > { %3771 = vst.sshfl [vmem:[#allocation2 + $0xc0] sm:$0xf pattern:$0x76325410] %v4411_v13  ;;  %v4422_v17 = vld [vmem:[%s219_s23 + $0x2a] sm:$0x3f]  ;;  %1913 = vrot.lane.b32.xlu0 %v4426_v18, %s4339_s24  ;;  %1915 = vrot.lane.b32.xlu1 %v4429_v20, %s4339_s24  ;;  %v3803_v29 = vcombine.low %v4420_v16, %v4420_v16  ;;  %v235_v40 = vunpack.c.h.bf16 %v4392_v6  ;;  %v259_v43 = vcombine.high %v4459_v33, %v4459_v33  ;;  %v4491_v48 = vunpack.c.l.bf16 %v4409_v12 }
  0x17   : > { %3774 = vst.sshfl [vmem:[#allocation2 + $0x174] sm:$0xf pattern:$0x76325410] %v4413_v14  ;;  %v1736_v19 = vrot.slane %v3793_v10, 6  ;;  %v1738_v21 = vrot.slane %v3795_v15, 6  ;;  %v3807_v34 = vcombine.low %v4422_v17, %v4422_v17  ;;  %v4475_v41 = vrot.slane %v712_v37, %v4387_v5 }
  0x18   : > { %3773 = vst.sshfl [vmem:[#allocation2 + $0x138] sm:$0xf pattern:$0x76325410] %v4420_v16  ;;  %1527 = vst.msk [vmem:[#allocation2 + $0x14] sm:$0x3] %vm996_vm0, %v4429_v20  ;;  %v4478_v42 = vrot.slane %v728_v38, %v4387_v5  ;;  %v744_v44 = vcombine.high %v4411_v13, %v4411_v13  ;;  %v260_v47 = vcombine.high %v4467_v36, %v4467_v36  ;;  %v4498_v49 = vunpack.c.l.bf16 %v4411_v13 }
  0x19   : > { %3775 = vst.sshfl [vmem:[#allocation2 + $0x1b0] sm:$0xf pattern:$0x76325410] %v4422_v17  ;;  %1768 = vst.msk [vmem:[#allocation2 + $0x14] sm:$0xc] %vm1221_vm1, %v1736_v19  ;;  %v760_v51 = vcombine.high %v4409_v12, %v4409_v12  ;;  %v237_v53 = vunpack.c.h.bf16 %v4394_v7  ;;  %v239_v57 = vunpack.c.h.bf16 %v4396_v8  ;;  %v262_v61 = vcombine.high %v4491_v48, %v4491_v48 }
  0x1a   : > { %1770 = vst.msk [vmem:[#allocation2 + $0x50] sm:$0xc] %vm1221_vm1, %v1738_v21  ;;  %v1740_v23 = vrot.slane %v3797_v22, 6  ;;  %v1744_v26 = vrot.slane %v3801_v24, 6  ;;  %v1742_v27 = vrot.slane %v3799_v25, 6  ;;  %v1748_v31 = vrot.slane %v3805_v28, 6 }
  0x1b   : > { %v1746_v32 = vrot.slane %v3803_v29, 6  ;;  %v1750_v39 = vrot.slane %v3807_v34, 6  ;;  %v275_v45 = vsel %vm274_vm2, %v4455_v30, 0.0  ;;  %v276_v46 = vsel %vm274_vm2, %v258_v35, 0.0  ;;  %1529 = vst.msk [vmem:[#allocation2 + $0x50] sm:$0x3] %vm996_vm0, %v4475_v41 }
  0x1c   : > { %1772 = vst.msk [vmem:[#allocation2 + $0x8c] sm:$0xc] %vm1221_vm1, %v1740_v23  ;;  %1776 = vst.msk [vmem:[#allocation2 + $0x104] sm:$0xc] %vm1221_vm1, %v1744_v26  ;;  %v4501_v50 = vrot.slane %v744_v44, %v4387_v5  ;;  %v279_v52 = vsel %vm278_vm3, %v235_v40, 0.0  ;;  %v283_v54 = vsel %vm274_vm2, %v4459_v33, 0.0  ;;  %v277_v55 = vadd.f32 %v276_v46, %v275_v45 }
  0x1d   : > { %1774 = vst.msk [vmem:[#allocation2 + $0xc8] sm:$0xc] %vm1221_vm1, %v1742_v27  ;;  %1780 = vst.msk [vmem:[#allocation2 + $0x17c] sm:$0xc] %vm1221_vm1, %v1748_v31  ;;  %v284_v56 = vsel %vm274_vm2, %v259_v43, 0.0  ;;  %v4516_v58 = vrot.slane %v760_v51, %v4387_v5  ;;  %v290_v59 = vsel %vm274_vm2, %v4467_v36, 0.0  ;;  %v4524_v62 = vunpack.c.l.bf16 %v4413_v14 }
  0x1e   : > { %1778 = vst.msk [vmem:[#allocation2 + $0x140] sm:$0xc] %vm1221_vm1, %v1746_v32  ;;  %1782 = vst.msk [vmem:[#allocation2 + $0x1b8] sm:$0xc] %vm1221_vm1, %v1750_v39  ;;  %v291_v60 = vsel %vm274_vm2, %v260_v47, 0.0  ;;  %v261_v63 = vcombine.high %v4498_v49, %v4498_v49  ;;  %v4529_v0 = vunpack.c.l.bf16 %v4420_v16  ;;  %v285_v1 = vadd.f32 %v284_v56, %v283_v54 }
  0x1f   : > { %1531 = vst.msk [vmem:[#allocation2 + $0x8c] sm:$0x3] %vm996_vm0, %v4478_v42  ;;  %1533 = vst.msk [vmem:[#allocation2 + $0xc8] sm:$0x3] %vm996_vm0, %v4501_v50  ;;  %v286_v2 = vsel %vm278_vm3, %v237_v53, 0.0  ;;  %v280_v3 = vadd.f32 %v279_v52, %v277_v55  ;;  %v292_v4 = vadd.f32 %v291_v60, %v290_v59  ;;  %v243_v10 = vunpack.c.h.bf16 %v4409_v12 }
  0x20   : > { %1535 = vst.msk [vmem:[#allocation2 + $0x104] sm:$0x3] %vm996_vm0, %v4516_v58  ;;  %v241_v11 = vunpack.c.h.bf16 %v4411_v13  ;;  %v293_v15 = vsel %vm278_vm3, %v239_v57, 0.0  ;;  %v304_v19 = vsel %vm274_vm2, %v4491_v48, 0.0  ;;  %v305_v21 = vsel %vm274_vm2, %v262_v61, 0.0 }
  0x21   : > { %v264_v22 = vcombine.high %v4524_v62, %v4524_v62  ;;  %v297_v23 = vsel %vm274_vm2, %v4498_v49, 0.0  ;;  %v298_v24 = vsel %vm274_vm2, %v261_v63, 0.0  ;;  %v263_v25 = vcombine.high %v4529_v0, %v4529_v0 }
  0x22   : > { %v4552_v26 = vunpack.c.l.bf16 %v4422_v17  ;;  %v287_v27 = vadd.f32 %v286_v2, %v285_v1  ;;  %v294_v28 = vadd.f32 %v293_v15, %v292_v4  ;;  %v306_v29 = vadd.f32 %v305_v21, %v304_v19 }
  0x23   : > { %v307_v31 = vsel %vm278_vm3, %v243_v10, 0.0  ;;  %v300_v32 = vsel %vm278_vm3, %v241_v11, 0.0  ;;  %v299_v34 = vadd.f32 %v298_v24, %v297_v23  ;;  %v247_v35 = vunpack.c.h.bf16 %v4413_v14 }
  0x24   : > { %v318_v37 = vsel %vm274_vm2, %v4524_v62, 0.0  ;;  %v319_v38 = vsel %vm274_vm2, %v264_v22, 0.0  ;;  %v245_v39 = vunpack.c.h.bf16 %v4420_v16  ;;  %v311_v43 = vsel %vm274_vm2, %v4529_v0, 0.0 }
  0x25   : > { %v312_v44 = vsel %vm274_vm2, %v263_v25, 0.0  ;;  %v265_v45 = vcombine.high %v4552_v26, %v4552_v26  ;;  %v308_v46 = vadd.f32 %v307_v31, %v306_v29  ;;  %v320_v47 = vadd.f32 %v319_v38, %v318_v37 }
  0x26   : > { %v301_v51 = vadd.f32 %v300_v32, %v299_v34  ;;  %v321_v52 = vsel %vm278_vm3, %v247_v35, 0.0  ;;  %v313_v54 = vadd.f32 %v312_v44, %v311_v43  ;;  %v314_v55 = vsel %vm278_vm3, %v245_v39, 0.0 }
  0x27   : > { %v249_v56 = vunpack.c.h.bf16 %v4422_v17  ;;  %v325_v59 = vsel %vm274_vm2, %v4552_v26, 0.0  ;;  %v326_v60 = vsel %vm274_vm2, %v265_v45, 0.0  ;;  %v322_v61 = vadd.f32 %v321_v52, %v320_v47 }
  0x28   : > { %v315_v63 = vadd.f32 %v314_v55, %v313_v54  ;;  %v327_v1 = vadd.f32 %v326_v60, %v325_v59  ;;  %v719_v19 = vrot.slane %v4394_v7, %v4387_v5  ;;  %v751_v22 = vrot.slane %v4411_v13, %v4387_v5 }
  0x29   : > { %v328_v2 = vsel %vm278_vm3, %v249_v56, 0.0  ;;  %v767_v24 = vrot.slane %v4409_v12, %v4387_v5  ;;  %v4686_v45 = vrot.slane %v4413_v14, %v4387_v5 }
  0x2a   : > { %v329_v15 = vadd.f32 %v328_v2, %v327_v1  ;;  %v727_v21 = vcombine.high %v719_v19, %v719_v19  ;;  %v759_v23 = vcombine.high %v751_v22, %v751_v22 }
  0x2b   : > { %v775_v25 = vcombine.high %v767_v24, %v767_v24 }
  0x35   : > { %281 = vadd.xlane.f32.xlu0 %v280_v3  ;;  %v776_v3 = vcombine.high %v4420_v16, %v4420_v16 }
  0x37   : > { %v4586_v4 = vrot.slane %v776_v3, %v4387_v5 }
  0x39   : > { %288 = vadd.xlane.f32.xlu0 %v287_v27  ;;  %1537 = vst.msk [vmem:[#allocation2 + $0x140] sm:$0x3] %vm996_vm0, %v4586_v4  ;;  %v783_v27 = vrot.slane %v4420_v16, %v4387_v5 }
  0x3a   : > { %295 = vadd.xlane.f32.xlu1 %v294_v28 }
  0x3b   : > { %v4668_v28 = vcombine.high %v783_v27, %v783_v27 }
  0x3d   : > { %309 = vadd.xlane.f32.xlu0 %v308_v46 }
  0x3e   : > { %302 = vadd.xlane.f32.xlu1 %v301_v51 }
  0x41   : > { %323 = vadd.xlane.f32.xlu0 %v322_v61  ;;  %v4694_v61 = vcombine.high %v4686_v45, %v4686_v45 }
  0x42   : > { %316 = vadd.xlane.f32.xlu1 %v315_v63 }
  0x46   : > { %330 = vadd.xlane.f32.xlu1 %v329_v15 }
  0x57   : > { %1630 = vrot.lane.b32.xlu1 %v4400_v9, %s4340_s25  ;;  %1911 = vrot.lane.b32.xlu0 %v4400_v9, %s4339_s24 }
  0x5b   : > { %824 = vrot.lane.b32.xlu1 %v4426_v18, %s4341_s26  ;;  %1237 = vrot.lane.b32.xlu0 %v4400_v9, %s4341_s26 }
  0x5f   : > { %1632 = vrot.lane.b32.xlu1 %v4426_v18, %s4340_s25  ;;  %1634 = vrot.lane.b32.xlu0 %v4429_v20, %s4340_s25 }
  0x63   : > { %826 = vrot.lane.b32.xlu1 %v4429_v20, %s4341_s26  ;;  %865 = vrot.lane.b32.xlu0 %v4400_v9, %s4342_s27  ;;  %v735_v9 = vrot.slane %v4396_v8, %v4387_v5 }
  0x67   : > { %867 = vrot.lane.b32.xlu1 %v4426_v18, %s4342_s27  ;;  %1919 = vrot.lane.b32.xlu0 %v727_v21, %s4339_s24  ;;  %v743_v18 = vcombine.high %v735_v9, %v735_v9 }
  0x6b   : > { %1921 = vrot.lane.b32.xlu1 %v4475_v41, %s4339_s24  ;;  %1917 = vrot.lane.b32.xlu0 %v719_v19, %s4339_s24 }
  0x6f   : > { %1636 = vrot.lane.b32.xlu1 %v719_v19, %s4340_s25  ;;  %1239 = vrot.lane.b32.xlu0 %v719_v19, %s4341_s26 }
  0x73   : > { %828 = vrot.lane.b32.xlu1 %v727_v21, %s4341_s26  ;;  %1640 = vrot.lane.b32.xlu0 %v4475_v41, %s4340_s25 }
  0x77   : > { %1638 = vrot.lane.b32.xlu1 %v727_v21, %s4340_s25  ;;  %869 = vrot.lane.b32.xlu0 %v719_v19, %s4342_s27 }
  0x7b   : > { %830 = vrot.lane.b32.xlu1 %v4475_v41, %s4341_s26  ;;  %1925 = vrot.lane.b32.xlu0 %v743_v18, %s4339_s24 }
  0x7f   : > { %871 = vrot.lane.b32.xlu1 %v727_v21, %s4342_s27  ;;  %1923 = vrot.lane.b32.xlu0 %v735_v9, %s4339_s24 }
  0x83   : > { %1927 = vrot.lane.b32.xlu1 %v4478_v42, %s4339_s24  ;;  %1241 = vrot.lane.b32.xlu0 %v735_v9, %s4341_s26 }
  0x87   : > { %1642 = vrot.lane.b32.xlu1 %v735_v9, %s4340_s25  ;;  %1646 = vrot.lane.b32.xlu0 %v4478_v42, %s4340_s25 }
  0x88   : > { %v4673_v29 = vpop.permute.xlu0 %1913  ;;  %v1916_v32 = vpop.permute.xlu1 %1915 }
  0x8b   : > { %832 = vrot.lane.b32.xlu1 %v743_v18, %s4341_s26  ;;  %873 = vrot.lane.b32.xlu0 %v735_v9, %s4342_s27 }
  0x8f   : > { %1644 = vrot.lane.b32.xlu1 %v743_v18, %s4340_s25  ;;  %1931 = vrot.lane.b32.xlu0 %v759_v23, %s4339_s24 }
  0x93   : > { %834 = vrot.lane.b32.xlu1 %v4478_v42, %s4341_s26  ;;  %1929 = vrot.lane.b32.xlu0 %v751_v22, %s4339_s24 }
  0x97   : > { %875 = vrot.lane.b32.xlu1 %v743_v18, %s4342_s27  ;;  %1243 = vrot.lane.b32.xlu0 %v751_v22, %s4341_s26 }
  0x9b   : > { %1933 = vrot.lane.b32.xlu1 %v4501_v50, %s4339_s24  ;;  %1652 = vrot.lane.b32.xlu0 %v4501_v50, %s4340_s25 }
  0x9f   : > { %1648 = vrot.lane.b32.xlu1 %v751_v22, %s4340_s25  ;;  %877 = vrot.lane.b32.xlu0 %v751_v22, %s4342_s27 }
  0xa3   : > { %836 = vrot.lane.b32.xlu1 %v759_v23, %s4341_s26  ;;  %1937 = vrot.lane.b32.xlu0 %v775_v25, %s4339_s24 }
  0xa7   : > { %1650 = vrot.lane.b32.xlu1 %v759_v23, %s4340_s25  ;;  %1935 = vrot.lane.b32.xlu0 %v767_v24, %s4339_s24 }
  0xab   : > { %838 = vrot.lane.b32.xlu1 %v4501_v50, %s4341_s26  ;;  %1245 = vrot.lane.b32.xlu0 %v767_v24, %s4341_s26 }
  0xaf   : > { %879 = vrot.lane.b32.xlu1 %v759_v23, %s4342_s27  ;;  %1658 = vrot.lane.b32.xlu0 %v4516_v58, %s4340_s25 }
  0xb3   : > { %1939 = vrot.lane.b32.xlu1 %v4516_v58, %s4339_s24  ;;  %881 = vrot.lane.b32.xlu0 %v767_v24, %s4342_s27 }
  0xb7   : > { %1654 = vrot.lane.b32.xlu1 %v767_v24, %s4340_s25  ;;  %1943 = vrot.lane.b32.xlu0 %v4668_v28, %s4339_s24 }
  0xbb   : > { %840 = vrot.lane.b32.xlu1 %v775_v25, %s4341_s26  ;;  %1941 = vrot.lane.b32.xlu0 %v783_v27, %s4339_s24 }
  0xbe   : > { %v282_v31 = vpop.xlane.xlu0 %281 }
  0xbf   : > { %v332_v34 = vsel %vm274_vm2, %v282_v31, 0.0  ;;  %1656 = vrot.lane.b32.xlu1 %v775_v25, %s4340_s25  ;;  %1247 = vrot.lane.b32.xlu0 %v783_v27, %s4341_s26 }
  0xc0   : > { %v333_v37 = vrot.slane %v332_v34, 4 }
  0xc2   : > { %v334_v38 = vadd.f32 %v333_v37, %v332_v34  ;;  %v289_v43 = vpop.xlane.xlu0 %288 }
  0xc3   : > { %842 = vrot.lane.b32.xlu1 %v4516_v58, %s4341_s26  ;;  %v296_v44 = vpop.xlane.xlu1 %295  ;;  %1664 = vrot.lane.b32.xlu0 %v4586_v4, %s4340_s25  ;;  %v339_v21 = vsel %vm274_vm2, %v289_v43, 0.0 }
  0xc4   : > { %v335_v46 = vrot.slane %v334_v38, 2  ;;  %v346_v47 = vsel %vm274_vm2, %v296_v44, 0.0  ;;  %v340_v31 = vrot.slane %v339_v21, 4 }
  0xc5   : > { %v347_v51 = vrot.slane %v346_v47, 4 }
  0xc6   : > { %v336_v52 = vadd.f32 %v335_v46, %v334_v38  ;;  %v310_v54 = vpop.xlane.xlu0 %309 }
  0xc7   : > { %v348_v55 = vadd.f32 %v347_v51, %v346_v47  ;;  %v360_v59 = vsel %vm274_vm2, %v310_v54, 0.0  ;;  %883 = vrot.lane.b32.xlu1 %v775_v25, %s4342_s27  ;;  %v303_v60 = vpop.xlane.xlu1 %302  ;;  %885 = vrot.lane.b32.xlu0 %v783_v27, %s4342_s27 }
  0xc8   : > { %v337_v63 = vrot.slane %v336_v52, 1  ;;  %v361_v1 = vrot.slane %v360_v59, 4 }
  0xc9   : > { %v349_v2 = vrot.slane %v348_v55, 2 }
  0xca   : > { %v362_v3 = vadd.f32 %v361_v1, %v360_v59  ;;  %v324_v15 = vpop.xlane.xlu0 %323  ;;  %v338_v19 = vadd.f32 %v337_v63, %v336_v52  ;;  %v341_v52 = vadd.f32 %v340_v31, %v339_v21  ;;  %v353_v59 = vsel %vm274_vm2, %v303_v60, 0.0 }
  0xcb   : > { %v350_v9 = vadd.f32 %v349_v2, %v348_v55  ;;  %v374_v18 = vsel %vm274_vm2, %v324_v15, 0.0  ;;  %1945 = vrot.lane.b32.xlu1 %v4586_v4, %s4339_s24  ;;  %v317_v22 = vpop.xlane.xlu1 %316  ;;  %1949 = vrot.lane.b32.xlu0 %v4694_v61, %s4339_s24 }
  0xcc   : > { %v363_v23 = vrot.slane %v362_v3, 2  ;;  %v375_v24 = vrot.slane %v374_v18, 4  ;;  %v388_v44 = vmul.f32 0.00097276265, %v338_v19 }
  0xcd   : > { %v351_v25 = vrot.slane %v350_v9, 1 }
  0xce   : > { %v364_v34 = vadd.f32 %v363_v23, %v362_v3  ;;  %v376_v37 = vadd.f32 %v375_v24, %v374_v18  ;;  %v1912_v38 = vpop.permute.xlu0 %1911  ;;  %v4707_v1 = vsub.f32 %v4455_v30, %v388_v44  ;;  %v367_v3 = vsel %vm274_vm2, %v317_v22, 0.0 }
  0xcf   : > { %1660 = vrot.lane.b32.xlu1 %v783_v27, %s4340_s25  ;;  %v331_v43 = vpop.xlane.xlu1 %330  ;;  %v352_v46 = vadd.f32 %v351_v25, %v350_v9  ;;  %v1961_v27 = vsel %vm1959_vm4, %v4673_v29, %v1916_v32  ;;  %v1960_v15 = vsel %vm1959_vm4, %v1912_v38, %v4673_v29  ;;  %v342_v18 = vrot.slane %v341_v52, 2 }
  0xd0   : > { %v377_v47 = vrot.slane %v376_v37, 2  ;;  %v365_v51 = vrot.slane %v364_v34, 1  ;;  %v354_v23 = vrot.slane %v353_v59, 4  ;;  %v368_v25 = vrot.slane %v367_v3, 4 }
  0xd1   : > { %v4711_v2 = vmul.f32 0.00097276265, %v352_v46  ;;  %v412_v29 = vmul.f32 %v4707_v1, %v4707_v1 }
  0xd2   : > { %v378_v54 = vadd.f32 %v377_v47, %v376_v37  ;;  %v1238_v55 = vpop.permute.xlu0 %1237  ;;  %v366_v19 = vadd.f32 %v365_v51, %v364_v34  ;;  %v343_v47 = vadd.f32 %v342_v18, %v341_v52  ;;  %v355_v51 = vadd.f32 %v354_v23, %v353_v59 }
  0xd3   : > { %844 = vrot.lane.b32.xlu1 %v4668_v28, %s4341_s26  ;;  %v1631_v63 = vpop.permute.xlu1 %1630  ;;  %v1264_v22 = vsel %vm856_vm6, %v4429_v20, %v1238_v55  ;;  %v4726_v34 = vsub.f32 %v4467_v36, %v4711_v2  ;;  %v381_v20 = vsel %vm274_vm2, %v331_v43, 0.0  ;;  %v4734_v36 = vsub.f32 %v235_v40, %v388_v44 }
  0xd4   : > { %v379_v60 = vrot.slane %v378_v54, 1  ;;  %v1979_v21 = vsel %vm1678_vm5, %v1961_v27, %v1631_v63  ;;  %v3825_v9 = vcombine.low %v1631_v63, %v1631_v63  ;;  %v392_v37 = vmul.f32 0.00097276265, %v366_v19 }
  0xd5   : > { %v3824_v24 = vcombine.low %v1960_v15, %v1979_v21  ;;  %v436_v19 = vcombine.high %v412_v29, %v412_v29  ;;  %v416_v59 = vmul.f32 %v4726_v34, %v4726_v34  ;;  %v356_v18 = vrot.slane %v355_v51, 2 }
  0xd6   : > { %v1635_v30 = vpop.permute.xlu0 %1634  ;;  %2066 = vst.msk [vmem:[#allocation2 + $0x20] sm:$0x3] %vm996_vm0, %v3825_v9  ;;  %v380_v38 = vadd.f32 %v379_v60, %v378_v54  ;;  %v369_v9 = vadd.f32 %v368_v25, %v367_v3  ;;  %v4742_v60 = vsub.f32 %v4491_v48, %v392_v37  ;;  %v382_v6 = vrot.slane %v381_v20, 4 }
  0xd7   : > { %1662 = vrot.lane.b32.xlu1 %v4668_v28, %s4340_s25  ;;  %v825_v32 = vpop.permute.xlu1 %824  ;;  %2065 = vst [vmem:[#allocation2 + $0x18] sm:$0x33] %v3824_v24  ;;  %v344_v44 = vrot.slane %v343_v47, 1  ;;  %v438_v48 = vcombine.high %v416_v59, %v416_v59 }
  0xd8   : > { %v3737_v31 = vcombine.low %v825_v32, %v825_v32  ;;  %v1253_v46 = vsel %vm856_vm6, %v1238_v55, %v825_v32  ;;  %v394_v43 = vmul.f32 0.00097276265, %v380_v38  ;;  %v370_v23 = vrot.slane %v369_v9, 2 }
  0xd9   : > { %v3736_v15 = vcombine.low %v1264_v22, %v1253_v46  ;;  %v452_v22 = vsel %vm274_vm2, %v412_v29, 0.0  ;;  %v420_v46 = vmul.f32 %v4742_v60, %v4742_v60  ;;  %v4759_v29 = vsub.f32 %v239_v57, %v4711_v2 }
  0xda   : > { %v1335_v27 = vrot.slane %v3737_v31, 6  ;;  %v866_v21 = vpop.permute.xlu0 %865  ;;  %v453_v31 = vsel %vm274_vm2, %v436_v19, 0.0  ;;  %v345_v19 = vadd.f32 %v344_v44, %v343_v47 }
  0xdb   : > { %846 = vrot.lane.b32.xlu1 %v4586_v4, %s4341_s26  ;;  %v1633_v24 = vpop.permute.xlu1 %1632  ;;  %v1334_v54 = vrot.slane %v3736_v15, 6  ;;  %v383_v15 = vadd.f32 %v382_v6, %v381_v20  ;;  %v440_v8 = vcombine.high %v420_v46, %v420_v46 }
  0xdc   : > { %1367 = vst.msk [vmem:[#allocation2 + $0x8] sm:$0xc] %vm1221_vm1, %v1335_v27  ;;  %v1679_v52 = vsel %vm1678_vm5, %v1631_v63, %v1633_v24  ;;  %v1680_v55 = vsel %vm1678_vm5, %v1633_v24, %v1635_v30  ;;  %v413_v30 = vmul.f32 %v4734_v36, %v4734_v36  ;;  %v4754_v27 = vsub.f32 %v4524_v62, %v394_v43 }
  0xdd   : > { %v3792_v3 = vcombine.low %v1679_v52, %v1680_v55  ;;  %1366 = vst [vmem:[#allocation2] sm:$0xcc] %v1334_v54  ;;  %v371_v54 = vadd.f32 %v370_v23, %v369_v9  ;;  %v454_v55 = vadd.f32 %v453_v31, %v452_v22  ;;  %v384_v47 = vrot.slane %v383_v15, 2 }
  0xde   : > { %v1920_v40 = vpop.permute.xlu0 %1919  ;;  %v424_v57 = vmul.f32 %v4754_v27, %v4754_v27  ;;  %v417_v9 = vmul.f32 %v4759_v29, %v4759_v29  ;;  %v480_v22 = vsel %vm274_vm2, %v420_v46, 0.0  ;;  %v481_v31 = vsel %vm274_vm2, %v440_v8, 0.0 }
  0xdf   : > { %v1735_v25 = vrot.slane %v3792_v3, 6  ;;  %887 = vrot.lane.b32.xlu1 %v4668_v28, %s4342_s27  ;;  %v827_v63 = vpop.permute.xlu1 %826  ;;  %v357_v28 = vadd.f32 %v356_v18, %v355_v51  ;;  %v467_v51 = vsel %vm274_vm2, %v438_v48, 0.0  ;;  %v4767_v18 = vsub.f32 %v243_v10, %v392_v37 }
  0xe0   : > { %v857_v38 = vsel %vm856_vm6, %v825_v32, %v827_v63  ;;  %v455_v32 = vsel %vm278_vm3, %v413_v30, 0.0  ;;  %v372_v44 = vrot.slane %v371_v54, 1  ;;  %v389_v10 = vmul.f32 0.00097276265, %v345_v19 }
  0xe1   : > { %1767 = vst [vmem:[#allocation2 + $0xc] sm:$0xcc] %v1735_v25  ;;  %v909_v3 = vsel %vm897_vm7, %v857_v38, %v866_v21  ;;  %v358_v2 = vrot.slane %v357_v28, 1  ;;  %v456_v37 = vadd.f32 %v455_v32, %v454_v55  ;;  %v4777_v63 = vsub.f32 %v247_v35, %v394_v43 }
  0xe2   : > { %v1918_v24 = vpop.permute.xlu0 %1917  ;;  %v421_v30 = vmul.f32 %v4767_v18, %v4767_v18  ;;  %v442_v48 = vcombine.high %v424_v57, %v424_v57  ;;  %v385_v38 = vadd.f32 %v384_v47, %v383_v15  ;;  %v469_v19 = vsel %vm278_vm3, %v417_v9, 0.0 }
  0xe3   : > { %v868_v52 = vpop.permute.xlu1 %867  ;;  %v373_v32 = vadd.f32 %v372_v44, %v371_v54  ;;  %v482_v46 = vadd.f32 %v481_v31, %v480_v22  ;;  %v4796_v47 = vsub.f32 %v4459_v33, %v389_v10 }
  0xe4   : > { %v898_v25 = vsel %vm897_vm7, %v866_v21, %v868_v52  ;;  %v3705_v62 = vcombine.low %v868_v52, %v868_v52  ;;  %v466_v21 = vsel %vm274_vm2, %v416_v59, 0.0  ;;  %v359_v59 = vadd.f32 %v358_v2, %v357_v28 }
  0xe5   : > { %v3704_v20 = vcombine.low %v909_v3, %v898_v25  ;;  %v468_v12 = vadd.f32 %v467_v51, %v466_v21  ;;  %v1962_v52 = vsel %vm1959_vm4, %v1918_v24, %v1920_v40  ;;  %v425_v51 = vmul.f32 %v4777_v63, %v4777_v63 }
  0xe6   : > { %997 = vst.msk [vmem:[#allocation2 + $0x8] sm:$0x3] %vm996_vm0, %v3705_v62  ;;  %v1240_v6 = vpop.permute.xlu0 %1239  ;;  %v483_v15 = vsel %vm278_vm3, %v421_v30, 0.0  ;;  %v494_v24 = vsel %vm274_vm2, %v424_v57, 0.0  ;;  %v391_v8 = vmul.f32 0.00097276265, %v359_v59 }
  0xe7   : > { %995 = vst [vmem:[#allocation2] sm:$0x33] %v3704_v20  ;;  %v1922_v23 = vpop.permute.xlu1 %1921  ;;  %v470_v3 = vadd.f32 %v469_v19, %v468_v12  ;;  %v495_v20 = vsel %vm274_vm2, %v442_v48, 0.0  ;;  %v386_v54 = vrot.slane %v385_v38, 1  ;;  %v484_v57 = vadd.f32 %v483_v15, %v482_v46 }
  0xe8   : > { %v1963_v35 = vsel %vm1959_vm4, %v1920_v40, %v1922_v23  ;;  %v1267_v40 = vsel %vm856_vm6, %v4475_v41, %v1240_v6  ;;  %v496_v23 = vadd.f32 %v495_v20, %v494_v24  ;;  %v393_v12 = vmul.f32 0.00097276265, %v373_v32 }
  0xe9   : > { %v497_v30 = vsel %vm278_vm3, %v425_v51, 0.0  ;;  %v387_v22 = vadd.f32 %v386_v54, %v385_v38  ;;  %v414_v41 = vmul.f32 %v4796_v47, %v4796_v47  ;;  %v4803_v33 = vsub.f32 %v4498_v49, %v391_v8 }
  0xea   : > { %457 = vadd.xlane.f32.xlu0 %v456_v37  ;;  %v1641_v55 = vpop.permute.xlu0 %1640  ;;  %v498_v32 = vadd.f32 %v497_v30, %v496_v23  ;;  %v4815_v46 = vsub.f32 %v4529_v0, %v393_v12  ;;  %v4829_v54 = vsub.f32 %v241_v11, %v391_v8 }
  0xeb   : > { %v1637_v43 = vpop.permute.xlu1 %1636  ;;  %v437_v49 = vcombine.high %v414_v41, %v414_v41 }
  0xec   : > { %v1982_v25 = vsel %vm1678_vm5, %v1963_v35, %v1637_v43  ;;  %v3827_v62 = vcombine.low %v1637_v43, %v1637_v43  ;;  %v4810_v35 = vsub.f32 %v237_v53, %v389_v10  ;;  %v459_v53 = vsel %vm274_vm2, %v414_v41, 0.0 }
  0xed   : > { %v3826_v28 = vcombine.low %v1962_v52, %v1982_v25  ;;  %v422_v24 = vmul.f32 %v4815_v46, %v4815_v46  ;;  %v419_v8 = vmul.f32 %v4829_v54, %v4829_v54 }
  0xee   : > { %2068 = vst.msk [vmem:[#allocation2 + $0x5c] sm:$0x3] %vm996_vm0, %v3827_v62  ;;  %471 = vadd.xlane.f32.xlu0 %v470_v3  ;;  %v870_v2 = vpop.permute.xlu0 %869  ;;  %v395_v3 = vmul.f32 0.00097276265, %v387_v22  ;;  %v418_v62 = vmul.f32 %v4803_v33, %v4803_v33  ;;  %v415_v7 = vmul.f32 %v4810_v35, %v4810_v35 }
  0xef   : > { %2067 = vst [vmem:[#allocation2 + $0x54] sm:$0x33] %v3826_v28  ;;  %v829_v9 = vpop.permute.xlu1 %828  ;;  %v460_v28 = vsel %vm274_vm2, %v437_v49, 0.0  ;;  %v441_v30 = vcombine.high %v422_v24, %v422_v24 }
  0xf0   : > { %v1254_v21 = vsel %vm856_vm6, %v1240_v6, %v829_v9  ;;  %v3739_v44 = vcombine.low %v829_v9, %v829_v9  ;;  %v439_v15 = vcombine.high %v418_v62, %v418_v62  ;;  %v4825_v0 = vsub.f32 %v4552_v26, %v395_v3 }
  0xf1   : > { %v3738_v37 = vcombine.low %v1267_v40, %v1254_v21  ;;  %v462_v23 = vsel %vm278_vm3, %v415_v7, 0.0  ;;  %v473_v22 = vsel %vm274_vm2, %v418_v62, 0.0  ;;  %v4852_v16 = vsub.f32 %v249_v56, %v395_v3 }
  0xf2   : > { %v1337_v31 = vrot.slane %v3739_v44, 6  ;;  %485 = vadd.xlane.f32.xlu0 %v484_v57  ;;  %v1926_v48 = vpop.permute.xlu0 %1925  ;;  %v461_v57 = vadd.f32 %v460_v28, %v459_v53  ;;  %v474_v26 = vsel %vm274_vm2, %v439_v15, 0.0  ;;  %v426_v13 = vmul.f32 %v4825_v0, %v4825_v0 }
  0xf3   : > { %v1336_v59 = vrot.slane %v3738_v37, 6  ;;  %v1639_v52 = vpop.permute.xlu1 %1638  ;;  %v475_v41 = vadd.f32 %v474_v26, %v473_v22 }
  0xf4   : > { %1369 = vst.msk [vmem:[#allocation2 + $0x44] sm:$0xc] %vm1221_vm1, %v1337_v31  ;;  %v1681_v6 = vsel %vm1678_vm5, %v1637_v43, %v1639_v52  ;;  %v1682_v19 = vsel %vm1678_vm5, %v1639_v52, %v1641_v55  ;;  %v463_v31 = vadd.f32 %v462_v23, %v461_v57  ;;  %v488_v52 = vsel %vm274_vm2, %v441_v30, 0.0 }
  0xf5   : > { %1368 = vst [vmem:[#allocation2 + $0x3c] sm:$0xcc] %v1336_v59  ;;  %v3794_v38 = vcombine.low %v1681_v6, %v1682_v19  ;;  %v443_v6 = vcombine.high %v426_v13, %v426_v13 }
  0xf6   : > { %499 = vadd.xlane.f32.xlu0 %v498_v32  ;;  %v1924_v25 = vpop.permute.xlu0 %1923 }
  0xf7   : > { %v1737_v43 = vrot.slane %v3794_v38, 6  ;;  %v831_v51 = vpop.permute.xlu1 %830  ;;  %v476_v38 = vsel %vm278_vm3, %v419_v8, 0.0  ;;  %v502_v28 = vsel %vm274_vm2, %v443_v6, 0.0 }
  0xf8   : > { %v858_v55 = vsel %vm856_vm6, %v829_v9, %v831_v51 }
  0xf9   : > { %1769 = vst [vmem:[#allocation2 + $0x48] sm:$0xcc] %v1737_v43  ;;  %v912_v40 = vsel %vm897_vm7, %v858_v55, %v870_v2  ;;  %v487_v43 = vsel %vm274_vm2, %v422_v24, 0.0  ;;  %v477_v55 = vadd.f32 %v476_v38, %v475_v41 }
  0xfa   : > { %v1242_v10 = vpop.permute.xlu0 %1241  ;;  %v489_v7 = vadd.f32 %v488_v52, %v487_v43 }
  0xfb   : > { %v872_v20 = vpop.permute.xlu1 %871  ;;  %v1270_v53 = vsel %vm856_vm6, %v4478_v42, %v1242_v10 }
  0xfc   : > { %v899_v9 = vsel %vm897_vm7, %v870_v2, %v872_v20  ;;  %v3707_v21 = vcombine.low %v872_v20, %v872_v20  ;;  %v4842_v2 = vsub.f32 %v245_v39, %v393_v12  ;;  %v1964_v39 = vsel %vm1959_vm4, %v1924_v25, %v1926_v48 }
  0xfd   : > { %v3706_v44 = vcombine.low %v912_v40, %v899_v9  ;;  %v501_v20 = vsel %vm274_vm2, %v426_v13, 0.0 }
  0xfe   : > { %999 = vst.msk [vmem:[#allocation2 + $0x44] sm:$0x3] %vm996_vm0, %v3707_v21  ;;  %v1647_v37 = vpop.permute.xlu0 %1646  ;;  %v423_v49 = vmul.f32 %v4842_v2, %v4842_v2  ;;  %v503_v9 = vadd.f32 %v502_v28, %v501_v20 }
  0xff   : > { %998 = vst [vmem:[#allocation2 + $0x3c] sm:$0x33] %v3706_v44  ;;  %v1928_v11 = vpop.permute.xlu1 %1927 }
 0x100   : > { %v1965_v19 = vsel %vm1959_vm4, %v1926_v48, %v1928_v11  ;;  %v427_v48 = vmul.f32 %v4852_v16, %v4852_v16  ;;  %v490_v24 = vsel %vm278_vm3, %v423_v49, 0.0 }
 0x101   : > { %v491_v42 = vadd.f32 %v490_v24, %v489_v7 }
 0x102   : > { %v874_v59 = vpop.permute.xlu0 %873 }
 0x103   : > { %v1643_v32 = vpop.permute.xlu1 %1642  ;;  %464 = vadd.xlane.f32.xlu1 %v463_v31 }
 0x104   : > { %v1985_v12 = vsel %vm1678_vm5, %v1965_v19, %v1643_v32  ;;  %v3829_v62 = vcombine.low %v1643_v32, %v1643_v32 }
 0x105   : > { %v3828_v51 = vcombine.low %v1964_v39, %v1985_v12 }
 0x106   : > { %2070 = vst.msk [vmem:[#allocation2 + $0x98] sm:$0x3] %vm996_vm0, %v3829_v62  ;;  %v1932_v3 = vpop.permute.xlu0 %1931 }
 0x107   : > { %2069 = vst [vmem:[#allocation2 + $0x90] sm:$0x33] %v3828_v51  ;;  %v833_v56 = vpop.permute.xlu1 %832  ;;  %478 = vadd.xlane.f32.xlu1 %v477_v55 }
 0x108   : > { %v1255_v25 = vsel %vm856_vm6, %v1242_v10, %v833_v56  ;;  %v3741_v15 = vcombine.low %v833_v56, %v833_v56  ;;  %v504_v10 = vsel %vm278_vm3, %v427_v48, 0.0 }
 0x109   : > { %v3740_v40 = vcombine.low %v1270_v53, %v1255_v25  ;;  %v505_v11 = vadd.f32 %v504_v10, %v503_v9 }
 0x10a   : > { %v1339_v21 = vrot.slane %v3741_v15, 6  ;;  %v1930_v8 = vpop.permute.xlu0 %1929 }
 0x10b   : > { %v1338_v44 = vrot.slane %v3740_v40, 6  ;;  %v1645_v57 = vpop.permute.xlu1 %1644  ;;  %492 = vadd.xlane.f32.xlu1 %v491_v42  ;;  %v1966_v62 = vsel %vm1959_vm4, %v1930_v8, %v1932_v3 }
 0x10c   : > { %1371 = vst.msk [vmem:[#allocation2 + $0x80] sm:$0xc] %vm1221_vm1, %v1339_v21  ;;  %v1683_v23 = vsel %vm1678_vm5, %v1643_v32, %v1645_v57  ;;  %v1684_v26 = vsel %vm1678_vm5, %v1645_v57, %v1647_v37 }
 0x10d   : > { %1370 = vst [vmem:[#allocation2 + $0x78] sm:$0xcc] %v1338_v44  ;;  %v3796_v30 = vcombine.low %v1683_v23, %v1684_v26 }
 0x10e   : > { %v1244_v52 = vpop.permute.xlu0 %1243 }
 0x10f   : > { %v1739_v13 = vrot.slane %v3796_v30, 6  ;;  %v835_v22 = vpop.permute.xlu1 %834  ;;  %506 = vadd.xlane.f32.xlu1 %v505_v11  ;;  %v1273_v53 = vsel %vm856_vm6, %v4501_v50, %v1244_v52 }
 0x110   : > { %v859_v31 = vsel %vm856_vm6, %v833_v56, %v835_v22 }
 0x111   : > { %1771 = vst [vmem:[#allocation2 + $0x84] sm:$0xcc] %v1739_v13  ;;  %v915_v6 = vsel %vm897_vm7, %v859_v31, %v874_v59 }
 0x112   : > { %v1653_v49 = vpop.permute.xlu0 %1652 }
 0x113   : > { %v876_v41 = vpop.permute.xlu1 %875 }
 0x114   : > { %v900_v19 = vsel %vm897_vm7, %v874_v59, %v876_v41  ;;  %v3709_v32 = vcombine.low %v876_v41, %v876_v41 }
 0x115   : > { %v3708_v37 = vcombine.low %v915_v6, %v900_v19 }
 0x116   : > { %1001 = vst.msk [vmem:[#allocation2 + $0x80] sm:$0x3] %vm996_vm0, %v3709_v32  ;;  %v878_v59 = vpop.permute.xlu0 %877 }
 0x117   : > { %1000 = vst [vmem:[#allocation2 + $0x78] sm:$0x33] %v3708_v37  ;;  %v1934_v38 = vpop.permute.xlu1 %1933 }
 0x118   : > { %v1967_v39 = vsel %vm1959_vm4, %v1932_v3, %v1934_v38 }
 0x11a   : > { %v1938_v40 = vpop.permute.xlu0 %1937 }
 0x11b   : > { %v1649_v12 = vpop.permute.xlu1 %1648 }
 0x11c   : > { %v1988_v43 = vsel %vm1678_vm5, %v1967_v39, %v1649_v12  ;;  %v3831_v51 = vcombine.low %v1649_v12, %v1649_v12 }
 0x11d   : > { %v3830_v55 = vcombine.low %v1966_v62, %v1988_v43 }
 0x11e   : > { %2072 = vst.msk [vmem:[#allocation2 + $0xd4] sm:$0x3] %vm996_vm0, %v3831_v51  ;;  %v1936_v44 = vpop.permute.xlu0 %1935 }
 0x11f   : > { %2071 = vst [vmem:[#allocation2 + $0xcc] sm:$0x33] %v3830_v55  ;;  %v837_v7 = vpop.permute.xlu1 %836  ;;  %v1968_v31 = vsel %vm1959_vm4, %v1936_v44, %v1938_v40 }
 0x120   : > { %v1256_v28 = vsel %vm856_vm6, %v1244_v52, %v837_v7  ;;  %v3743_v56 = vcombine.low %v837_v7, %v837_v7 }
 0x121   : > { %v3742_v48 = vcombine.low %v1273_v53, %v1256_v28 }
 0x122   : > { %v1341_v25 = vrot.slane %v3743_v56, 6  ;;  %v1246_v8 = vpop.permute.xlu0 %1245 }
 0x123   : > { %v1340_v15 = vrot.slane %v3742_v48, 6  ;;  %v1651_v24 = vpop.permute.xlu1 %1650  ;;  %v1276_v37 = vsel %vm856_vm6, %v4516_v58, %v1246_v8 }
 0x124   : > { %1373 = vst.msk [vmem:[#allocation2 + $0xbc] sm:$0xc] %vm1221_vm1, %v1341_v25  ;;  %v1685_v3 = vsel %vm1678_vm5, %v1649_v12, %v1651_v24  ;;  %v1686_v20 = vsel %vm1678_vm5, %v1651_v24, %v1653_v49 }
 0x125   : > { %1372 = vst [vmem:[#allocation2 + $0xb4] sm:$0xcc] %v1340_v15  ;;  %v3798_v42 = vcombine.low %v1685_v3, %v1686_v20 }
 0x126   : > { %v1659_v19 = vpop.permute.xlu0 %1658 }
 0x127   : > { %v1741_v9 = vrot.slane %v3798_v42, 6  ;;  %v839_v21 = vpop.permute.xlu1 %838 }
 0x128   : > { %v860_v50 = vsel %vm856_vm6, %v837_v7, %v839_v21 }
 0x129   : > { %1773 = vst [vmem:[#allocation2 + $0xc0] sm:$0xcc] %v1741_v9  ;;  %v918_v23 = vsel %vm897_vm7, %v860_v50, %v878_v59 }
 0x12b   : > { %v880_v57 = vpop.permute.xlu1 %879 }
 0x12c   : > { %v901_v26 = vsel %vm897_vm7, %v878_v59, %v880_v57  ;;  %v3711_v10 = vcombine.low %v880_v57, %v880_v57  ;;  %v882_v59 = vpop.permute.xlu0 %881 }
 0x12d   : > { %v3710_v30 = vcombine.low %v918_v23, %v901_v26 }
 0x12e   : > { %1003 = vst.msk [vmem:[#allocation2 + $0xbc] sm:$0x3] %vm996_vm0, %v3711_v10 }
 0x12f   : > { %1002 = vst [vmem:[#allocation2 + $0xb4] sm:$0x33] %v3710_v30  ;;  %v1940_v11 = vpop.permute.xlu1 %1939 }
 0x130   : > { %v1969_v13 = vsel %vm1959_vm4, %v1938_v40, %v1940_v11  ;;  %v1944_v56 = vpop.permute.xlu0 %1943 }
 0x133   : > { %v1655_v22 = vpop.permute.xlu1 %1654 }
 0x134   : > { %v1991_v41 = vsel %vm1678_vm5, %v1969_v13, %v1655_v22  ;;  %v3833_v52 = vcombine.low %v1655_v22, %v1655_v22  ;;  %v1942_v40 = vpop.permute.xlu0 %1941 }
 0x135   : > { %v3832_v6 = vcombine.low %v1968_v31, %v1991_v41  ;;  %v1970_v21 = vsel %vm1959_vm4, %v1942_v40, %v1944_v56 }
 0x136   : > { %2074 = vst.msk [vmem:[#allocation2 + $0x110] sm:$0x3] %vm996_vm0, %v3833_v52 }
 0x137   : > { %2073 = vst [vmem:[#allocation2 + $0x108] sm:$0x33] %v3832_v6  ;;  %v841_v32 = vpop.permute.xlu1 %840 }
 0x138   : > { %v1257_v38 = vsel %vm856_vm6, %v1246_v8, %v841_v32  ;;  %v3745_v49 = vcombine.low %v841_v32, %v841_v32  ;;  %v1248_v57 = vpop.permute.xlu0 %1247 }
 0x139   : > { %v3744_v39 = vcombine.low %v1276_v37, %v1257_v38  ;;  %v1279_v10 = vsel %vm856_vm6, %v4586_v4, %v1248_v57 }
 0x13a   : > { %v1343_v12 = vrot.slane %v3745_v49, 6 }
 0x13b   : > { %v1342_v62 = vrot.slane %v3744_v39, 6  ;;  %v1657_v43 = vpop.permute.xlu1 %1656 }
 0x13c   : > { %1375 = vst.msk [vmem:[#allocation2 + $0xf8] sm:$0xc] %vm1221_vm1, %v1343_v12  ;;  %v1687_v51 = vsel %vm1678_vm5, %v1655_v22, %v1657_v43  ;;  %v1688_v55 = vsel %vm1678_vm5, %v1657_v43, %v1659_v19  ;;  %v1665_v22 = vpop.permute.xlu0 %1664 }
 0x13d   : > { %1374 = vst [vmem:[#allocation2 + $0xf0] sm:$0xcc] %v1342_v62  ;;  %v3800_v7 = vcombine.low %v1687_v51, %v1688_v55 }
 0x13f   : > { %v1743_v53 = vrot.slane %v3800_v7, 6  ;;  %v843_v28 = vpop.permute.xlu1 %842 }
 0x140   : > { %v861_v58 = vsel %vm856_vm6, %v841_v32, %v843_v28  ;;  %v886_v38 = vpop.permute.xlu0 %885 }
 0x141   : > { %1775 = vst [vmem:[#allocation2 + $0xfc] sm:$0xcc] %v1743_v53  ;;  %v921_v25 = vsel %vm897_vm7, %v861_v58, %v882_v59 }
 0x143   : > { %v884_v48 = vpop.permute.xlu1 %883 }
 0x144   : > { %v902_v15 = vsel %vm897_vm7, %v882_v59, %v884_v48  ;;  %v3713_v24 = vcombine.low %v884_v48, %v884_v48  ;;  %v4916_v51 = vpop.permute.xlu0 %1949 }
 0x145   : > { %v3712_v3 = vcombine.low %v921_v25, %v902_v15 }
 0x146   : > { %1005 = vst.msk [vmem:[#allocation2 + $0xf8] sm:$0x3] %vm996_vm0, %v3713_v24 }
 0x147   : > { %1004 = vst [vmem:[#allocation2 + $0xf0] sm:$0x33] %v3712_v3  ;;  %v1946_v20 = vpop.permute.xlu1 %1945 }
 0x148   : > { %v1971_v42 = vsel %vm1959_vm4, %v1944_v56, %v1946_v20 }
 0x14b   : > { %v1661_v9 = vpop.permute.xlu1 %1660 }
 0x14c   : > { %v1994_v50 = vsel %vm1678_vm5, %v1971_v42, %v1661_v9  ;;  %v3835_v44 = vcombine.low %v1661_v9, %v1661_v9 }
 0x14d   : > { %v3834_v23 = vcombine.low %v1970_v21, %v1994_v50 }
 0x14e   : > { %2076 = vst.msk [vmem:[#allocation2 + $0x14c] sm:$0x3] %vm996_vm0, %v3835_v44 }
 0x14f   : > { %2075 = vst [vmem:[#allocation2 + $0x144] sm:$0x33] %v3834_v23  ;;  %v845_v26 = vpop.permute.xlu1 %844 }
 0x150   : > { %v1258_v30 = vsel %vm856_vm6, %v1248_v57, %v845_v26  ;;  %v3747_v11 = vcombine.low %v845_v26, %v845_v26 }
 0x151   : > { %v3746_v8 = vcombine.low %v1279_v10, %v1258_v30 }
 0x152   : > { %v1345_v13 = vrot.slane %v3747_v11, 6 }
 0x153   : > { %v1344_v31 = vrot.slane %v3746_v8, 6  ;;  %v1663_v41 = vpop.permute.xlu1 %1662 }
 0x154   : > { %1377 = vst.msk [vmem:[#allocation2 + $0x134] sm:$0xc] %vm1221_vm1, %v1345_v13  ;;  %v1689_v52 = vsel %vm1678_vm5, %v1661_v9, %v1663_v41  ;;  %v1690_v6 = vsel %vm1678_vm5, %v1663_v41, %v1665_v22 }
 0x155   : > { %1376 = vst [vmem:[#allocation2 + $0x12c] sm:$0xcc] %v1344_v31  ;;  %v3802_v19 = vcombine.low %v1689_v52, %v1690_v6 }
 0x157   : > { %v1745_v32 = vrot.slane %v3802_v19, 6  ;;  %v847_v37 = vpop.permute.xlu1 %846 }
 0x158   : > { %v862_v4 = vsel %vm856_vm6, %v845_v26, %v847_v37 }
 0x159   : > { %1777 = vst [vmem:[#allocation2 + $0x138] sm:$0xcc] %v1745_v32  ;;  %v924_v39 = vsel %vm897_vm7, %v862_v4, %v886_v38 }
 0x15b   : > { %v888_v49 = vpop.permute.xlu1 %887 }
 0x15c   : > { %v903_v12 = vsel %vm897_vm7, %v886_v38, %v888_v49  ;;  %v3715_v62 = vcombine.low %v888_v49, %v888_v49 }
 0x15d   : > { %v3714_v43 = vcombine.low %v924_v39, %v903_v12 }
 0x15e   : > { %1007 = vst.msk [vmem:[#allocation2 + $0x134] sm:$0x3] %vm996_vm0, %v3715_v62 }
 0x15f   : > { %1006 = vst [vmem:[#allocation2 + $0x12c] sm:$0x33] %v3714_v43 }
 0x173   : > { %v458_v55 = vpop.xlane.xlu0 %457 }
 0x174   : > { %v508_v59 = vsel %vm274_vm2, %v458_v55, 0.0 }
 0x175   : > { %v509_v7 = vrot.slane %v508_v59, 4 }
 0x177   : > { %v510_v53 = vadd.f32 %v509_v7, %v508_v59  ;;  %v472_v28 = vpop.xlane.xlu0 %471 }
 0x178   : > { %v522_v58 = vsel %vm274_vm2, %v472_v28, 0.0 }
 0x179   : > { %v511_v56 = vrot.slane %v510_v53, 2  ;;  %v523_v48 = vrot.slane %v522_v58, 4 }
 0x17b   : > { %v512_v25 = vadd.f32 %v511_v56, %v510_v53  ;;  %v524_v15 = vadd.f32 %v523_v48, %v522_v58  ;;  %v486_v24 = vpop.xlane.xlu0 %485  ;;  %v4927_v48 = vld [vmem:[%s5910_s3 + $0x8] sm:$0xf] }
 0x17c   : > { %v536_v3 = vsel %vm274_vm2, %v486_v24, 0.0 }
 0x17d   : > { %v513_v20 = vrot.slane %v512_v25, 1  ;;  %v525_v40 = vrot.slane %v524_v15, 2  ;;  %v537_v42 = vrot.slane %v536_v3, 4 }
 0x17f   : > { %v514_v9 = vadd.f32 %v513_v20, %v512_v25  ;;  %v526_v21 = vadd.f32 %v525_v40, %v524_v15  ;;  %v538_v50 = vadd.f32 %v537_v42, %v536_v3  ;;  %v500_v44 = vpop.xlane.xlu0 %499  ;;  %v4932_v25 = vld [vmem:[%s5910_s3] sm:$0xff]  ;;  %v4939_v42 = vld [vmem:[%s5911_s4 + $0x8] sm:$0xf] }
 0x180   : > { %v550_v57 = vsel %vm274_vm2, %v500_v44, 0.0 }
 0x181   : > { %v564_v23 = vmul.f32 0.00097276265, %v514_v9  ;;  %v527_v26 = vrot.slane %v526_v21, 1  ;;  %v539_v10 = vrot.slane %v538_v50, 2  ;;  %v551_v30 = vrot.slane %v550_v57, 4  ;;  %v4944_v9 = vld [vmem:[%s5911_s4] sm:$0xff] }
 0x183   : > { %v572_v11 = vadd.f32 1e-05, %v564_v23  ;;  %v528_v8 = vadd.f32 %v527_v26, %v526_v21  ;;  %v540_v13 = vadd.f32 %v539_v10, %v538_v50  ;;  %v552_v22 = vadd.f32 %v551_v30, %v550_v57 }
 0x184   : > { %v792_v26 = vcombine.high %v4413_v14, %v4413_v14 }
 0x185   : > { %4218 = vrsqrt.f32 %v572_v11  ;;  %v566_v31 = vmul.f32 0.00097276265, %v528_v8  ;;  %v541_v41 = vrot.slane %v540_v13, 1  ;;  %v553_v52 = vrot.slane %v552_v22, 2 }
 0x187   : > { %v574_v6 = vadd.f32 1e-05, %v566_v31  ;;  %v542_v19 = vadd.f32 %v541_v41, %v540_v13  ;;  %v554_v32 = vadd.f32 %v553_v52, %v552_v22  ;;  %v4958_v52 = vrot.slane %v792_v26, %v4387_v5 }
 0x189   : > { %4220 = vrsqrt.f32 %v574_v6  ;;  %v568_v37 = vmul.f32 0.00097276265, %v542_v19  ;;  %v555_v4 = vrot.slane %v554_v32, 1  ;;  %1539 = vst.msk [vmem:[#allocation2 + $0x17c] sm:$0x3] %vm996_vm0, %v4958_v52 }
 0x18b   : > { %v576_v38 = vadd.f32 1e-05, %v568_v37  ;;  %v556_v49 = vadd.f32 %v555_v4, %v554_v32 }
 0x18c   : > { %v465_v39 = vpop.xlane.xlu1 %464 }
 0x18d   : > { %4222 = vrsqrt.f32 %v576_v38  ;;  %v570_v12 = vmul.f32 0.00097276265, %v556_v49  ;;  %v515_v62 = vsel %vm274_vm2, %v465_v39, 0.0 }
 0x18e   : > { %v516_v43 = vrot.slane %v515_v62, 4 }
 0x18f   : > { %v578_v55 = vadd.f32 1e-05, %v570_v12 }
 0x190   : > { %v517_v59 = vadd.f32 %v516_v43, %v515_v62  ;;  %v479_v7 = vpop.xlane.xlu1 %478 }
 0x191   : > { %4224 = vrsqrt.f32 %v578_v55  ;;  %v529_v53 = vsel %vm274_vm2, %v479_v7, 0.0 }
 0x192   : > { %v4219_v28 = vpop.eup %4218  ;;  %v518_v58 = vrot.slane %v517_v59, 2  ;;  %v530_v56 = vrot.slane %v529_v53, 4 }
 0x193   : > { %v589_v15 = vmul.f32 %v4219_v28, %v4734_v36  ;;  %v588_v24 = vmul.f32 %v4219_v28, %v4707_v1 }
 0x194   : > { %v519_v3 = vadd.f32 %v518_v58, %v517_v59  ;;  %v531_v20 = vadd.f32 %v530_v56, %v529_v53  ;;  %v493_v40 = vpop.xlane.xlu1 %492 }
 0x195   : > { %v543_v21 = vsel %vm274_vm2, %v493_v40, 0.0  ;;  %v607_v50 = vmul.f32 %v4927_v48, %v589_v15  ;;  %v606_v36 = vmul.f32 %v4932_v25, %v588_v24 }
 0x196   : > { %v4221_v1 = vpop.eup %4220  ;;  %v520_v44 = vrot.slane %v519_v3, 1  ;;  %v532_v57 = vrot.slane %v531_v20, 2  ;;  %v544_v23 = vrot.slane %v543_v21, 4 }
 0x197   : > { %v625_v10 = vadd.f32 %v4939_v42, %v607_v50  ;;  %v4953_v30 = vadd.f32 %v4944_v9, %v606_v36  ;;  %v592_v11 = vmul.f32 %v4221_v1, %v4726_v34  ;;  %v593_v8 = vmul.f32 %v4221_v1, %v4759_v29 }
 0x198   : > { %v521_v13 = vadd.f32 %v520_v44, %v519_v3  ;;  %v533_v22 = vadd.f32 %v532_v57, %v531_v20  ;;  %v545_v31 = vadd.f32 %v544_v23, %v543_v21  ;;  %v507_v41 = vpop.xlane.xlu1 %506  ;;  %v5915_v44 = vmov 0.0  }
 0x199   : > { %v557_v6 = vsel %vm274_vm2, %v507_v41, 0.0  ;;  %v4961_v19 = vpack.c.bf16 %v625_v10, %v625_v10  ;;  %v664_v14 = vpack.c.bf16 %v4953_v30, %v4953_v30  ;;  %v610_v32 = vmul.f32 %v4932_v25, %v592_v11  ;;  %4035 = vmatprep.subr.bf16.mxu1 %v5915_v44  ;;  %4041 = vmatprep.mubr.msk.bf16.mxu1 %vm4344_vm8, %v5915_v44 }
 0x19a   : > { %v4223_v37 = vpop.eup %4222  ;;  %v565_v34 = vmul.f32 0.00097276265, %v521_v13  ;;  %v534_v4 = vrot.slane %v533_v22, 1  ;;  %v546_v29 = vrot.slane %v545_v31, 2  ;;  %v558_v38 = vrot.slane %v557_v6, 4 }
 0x19b   : > { %2085 = vrot.lane.b32.xlu1 %v4961_v19, %s4339_s24  ;;  %v1583_v49 = vrot.slane %v4961_v19, 6  ;;  %1076 = vrot.lane.b32.xlu0 %v664_v14, %s4342_s27  ;;  %1896 = vst.msk [vmem:[#allocation2 + $0x38] sm:$0x3] %vm996_vm0, %v664_v14  ;;  %v4974_v39 = vadd.f32 %v4944_v9, %v610_v32  ;;  %v611_v12 = vmul.f32 %v4927_v48, %v593_v8 }
 0x19c   : > { %v596_v62 = vmul.f32 %v4223_v37, %v4742_v60  ;;  %v573_v43 = vadd.f32 1e-05, %v565_v34  ;;  %v535_v55 = vadd.f32 %v534_v4, %v533_v22  ;;  %v547_v59 = vadd.f32 %v546_v29, %v545_v31 }
 0x19d   : > { %v559_v7 = vadd.f32 %v558_v38, %v557_v6  ;;  %1615 = vst.msk [vmem:[#allocation2 + $0x2c] sm:$0xc] %vm1221_vm1, %v1583_v49  ;;  %v4981_v53 = vpack.c.bf16 %v4974_v39, %v4974_v39  ;;  %v629_v28 = vadd.f32 %v4939_v42, %v611_v12  ;;  %v597_v56 = vmul.f32 %v4223_v37, %v4767_v18 }
 0x19e   : > { %v614_v58 = vmul.f32 %v4932_v25, %v596_v62  ;;  %v4225_v15 = vpop.eup %4224  ;;  %4226 = vrsqrt.f32 %v573_v43  ;;  %v567_v24 = vmul.f32 0.00097276265, %v535_v55  ;;  %v548_v60 = vrot.slane %v547_v59, 1 }
 0x19f   : > { %v560_v3 = vrot.slane %v559_v7, 2  ;;  %1382 = vrot.lane.b32.xlu0 %v664_v14, %s4341_s26  ;;  %1783 = vrot.lane.b32.xlu1 %v664_v14, %s4340_s25  ;;  %1900 = vst.msk [vmem:[#allocation2 + $0xb0] sm:$0x3] %vm996_vm0, %v4981_v53  ;;  %v4990_v20 = vpack.c.bf16 %v629_v28, %v629_v28  ;;  %v615_v21 = vmul.f32 %v4927_v48, %v597_v56 }
 0x1a0   : > { %v632_v40 = vadd.f32 %v4944_v9, %v614_v58  ;;  %v575_v50 = vadd.f32 1e-05, %v567_v24  ;;  %v549_v18 = vadd.f32 %v548_v60, %v547_v59  ;;  %v600_v1 = vmul.f32 %v4225_v15, %v4754_v27 }
 0x1a1   : > { %v561_v36 = vadd.f32 %v560_v3, %v559_v7  ;;  %v1587_v57 = vrot.slane %v4990_v20, 6  ;;  %v633_v26 = vadd.f32 %v4939_v42, %v615_v21  ;;  %v5002_v10 = vcombine.high %v4953_v30, %v4953_v30 }
 0x1a2   : > { %v4997_v23 = vpack.c.bf16 %v632_v40, %v632_v40  ;;  %4228 = vrsqrt.f32 %v575_v50  ;;  %v569_v11 = vmul.f32 0.00097276265, %v549_v18  ;;  %v618_v13 = vmul.f32 %v4932_v25, %v600_v1 }
 0x1a3   : > { %v562_v8 = vrot.slane %v561_v36, 1  ;;  %2081 = vrot.lane.b32.xlu1 %v664_v14, %s4339_s24  ;;  %1619 = vst.msk [vmem:[#allocation2 + $0xa4] sm:$0xc] %vm1221_vm1, %v1587_v57  ;;  %v5009_v27 = vpack.c.bf16 %v633_v26, %v633_v26  ;;  %v3979_v22 = vpack.c.bf16 %v5002_v10, %v4953_v30  ;;  %v601_v31 = vmul.f32 %v4225_v15, %v4777_v63 }
 0x1a4   : > { %1904 = vst.msk [vmem:[#allocation2 + $0x128] sm:$0x3] %vm996_vm0, %v4997_v23  ;;  %v577_v41 = vadd.f32 1e-05, %v569_v11  ;;  %v636_v32 = vadd.f32 %v4944_v9, %v618_v13  ;;  %v5017_v37 = vcombine.high %v4974_v39, %v4974_v39  ;;  %v5021_v29 = vcombine.high %v632_v40, %v632_v40 }
 0x1a5   : > { %v563_v6 = vadd.f32 %v562_v8, %v561_v36  ;;  %v1591_v14 = vrot.slane %v5009_v27, 6  ;;  %v1582_v34 = vrot.slane %v3979_v22, 6  ;;  %v619_v4 = vmul.f32 %v4927_v48, %v601_v31 }
 0x1a6   : > { %4230 = vrsqrt.f32 %v577_v41  ;;  %v5023_v30 = vpack.c.bf16 %v636_v32, %v636_v32  ;;  %v3983_v49 = vpack.c.bf16 %v5017_v37, %v4974_v39  ;;  %v3987_v12 = vpack.c.bf16 %v5021_v29, %v632_v40 }
 0x1a7   : > { %v571_v38 = vmul.f32 0.00097276265, %v563_v6  ;;  %1787 = vrot.lane.b32.xlu1 %v4961_v19, %s4340_s25  ;;  %1623 = vst.msk [vmem:[#allocation2 + $0x11c] sm:$0xc] %vm1221_vm1, %v1591_v14  ;;  %1614 = vst [vmem:[#allocation2 + $0x24] sm:$0xcc] %v1582_v34  ;;  %v637_v63 = vadd.f32 %v4939_v42, %v619_v4  ;;  %v5034_v43 = vcombine.high %v636_v32, %v636_v32 }
 0x1a8   : > { %1908 = vst.msk [vmem:[#allocation2 + $0x1a0] sm:$0x3] %vm996_vm0, %v5023_v30  ;;  %v1586_v59 = vrot.slane %v3983_v49, 6  ;;  %v1590_v7 = vrot.slane %v3987_v12, 6 }
 0x1a9   : > { %v579_v62 = vadd.f32 1e-05, %v571_v38  ;;  %v5036_v55 = vpack.c.bf16 %v637_v63, %v637_v63  ;;  %v3991_v28 = vpack.c.bf16 %v5034_v43, %v636_v32 }
 0x1aa   : > { %1618 = vst [vmem:[#allocation2 + $0x9c] sm:$0xcc] %v1586_v59  ;;  %1622 = vst [vmem:[#allocation2 + $0x114] sm:$0xcc] %v1590_v7 }
 0x1ab   : > { %4232 = vrsqrt.f32 %v579_v62  ;;  %v4227_v58 = vpop.eup %4226  ;;  %1030 = vrot.lane.b32.xlu1 %v4961_v19, %s4341_s26  ;;  %v1595_v39 = vrot.slane %v5036_v55, 6  ;;  %v1594_v24 = vrot.slane %v3991_v28, 6 }
 0x1ac   : > { %v590_v56 = vmul.f32 %v4227_v58, %v4796_v47  ;;  %v591_v15 = vmul.f32 %v4227_v58, %v4810_v35 }
 0x1ad   : > { %1627 = vst.msk [vmem:[#allocation2 + $0x194] sm:$0xc] %vm1221_vm1, %v1595_v39  ;;  %1626 = vst [vmem:[#allocation2 + $0x18c] sm:$0xcc] %v1594_v24 }
 0x1ae   : > { %v608_v60 = vmul.f32 %v4932_v25, %v590_v56  ;;  %v609_v3 = vmul.f32 %v4927_v48, %v591_v15 }
 0x1af   : > { %v4229_v40 = vpop.eup %4228 }
 0x1b0   : > { %v626_v21 = vadd.f32 %v4944_v9, %v608_v60  ;;  %v627_v50 = vadd.f32 %v4939_v42, %v609_v3  ;;  %v594_v18 = vmul.f32 %v4229_v40, %v4803_v33  ;;  %v595_v36 = vmul.f32 %v4229_v40, %v4829_v54 }
 0x1b2   : > { %v667_v47 = vpack.c.bf16 %v626_v21, %v626_v21  ;;  %v5051_v1 = vpack.c.bf16 %v627_v50, %v627_v50  ;;  %v612_v35 = vmul.f32 %v4932_v25, %v594_v18  ;;  %v613_v57 = vmul.f32 %v4927_v48, %v595_v36 }
 0x1b3   : > { %v4231_v26 = vpop.eup %4230  ;;  %v5055_v11 = vcombine.high %v626_v21, %v626_v21 }
 0x1b4   : > { %1898 = vst.msk [vmem:[#allocation2 + $0x74] sm:$0x3] %vm996_vm0, %v667_v47  ;;  %1789 = vrot.lane.b32.xlu0 %v667_v47, %s4340_s25  ;;  %v1585_v8 = vrot.slane %v5051_v1, 6  ;;  %2091 = vrot.lane.b32.xlu1 %v5051_v1, %s4339_s24  ;;  %v630_v33 = vadd.f32 %v4944_v9, %v612_v35  ;;  %v631_v54 = vadd.f32 %v4939_v42, %v613_v57  ;;  %v4135_v35 = vld [vmem:[#allocation2 + $0x38] ss:$0 sps:$4 sm:$0xff]  }
 0x1b5   : > { %v598_v13 = vmul.f32 %v4231_v26, %v4815_v46  ;;  %v599_v22 = vmul.f32 %v4231_v26, %v4842_v2  ;;  %v3981_v31 = vpack.c.bf16 %v5055_v11, %v626_v21  ;;  %v671_v57 = vpack.c.bf16 %v5017_v37, %v5017_v37 }
 0x1b6   : > { %1617 = vst.msk [vmem:[#allocation2 + $0x68] sm:$0xc] %vm1221_vm1, %v1585_v8  ;;  %v673_v41 = vpack.c.bf16 %v630_v33, %v630_v33  ;;  %v5068_v6 = vpack.c.bf16 %v631_v54, %v631_v54  ;;  %v5071_v14 = vcombine.high %v630_v33, %v630_v33  ;;  %v2403_v26 = vsel %vm274_vm2, %v4135_v35, 0 }
 0x1b7   : > { %v616_v32 = vmul.f32 %v4932_v25, %v598_v13  ;;  %v617_v4 = vmul.f32 %v4927_v48, %v599_v22  ;;  %v1584_v38 = vrot.slane %v3981_v31, 6  ;;  %4036 = vmatpush3.bf16.msra.mxu1 %v2403_v26 }
 0x1b8   : > { %v4233_v34 = vpop.eup %4232  ;;  %1080 = vrot.lane.b32.xlu0 %v667_v47, %s4342_s27  ;;  %2087 = vrot.lane.b32.xlu1 %v667_v47, %s4339_s24  ;;  %1902 = vst.msk [vmem:[#allocation2 + $0xec] sm:$0x3] %vm996_vm0, %v673_v41  ;;  %v1589_v46 = vrot.slane %v5068_v6, 6  ;;  %v3985_v63 = vpack.c.bf16 %v5071_v14, %v630_v33  ;;  %v5913_v33 = vmov 0  }
 0x1b9   : > { %v634_v2 = vadd.f32 %v4944_v9, %v616_v32  ;;  %v635_v49 = vadd.f32 %v4939_v42, %v617_v4  ;;  %1616 = vst [vmem:[#allocation2 + $0x60] sm:$0xcc] %v1584_v38  ;;  %v603_v12 = vmul.f32 %v4233_v34, %v4852_v16  ;;  %v602_v62 = vmul.f32 %v4233_v34, %v4825_v0 }
 0x1ba   : > { %1621 = vst.msk [vmem:[#allocation2 + $0xe0] sm:$0xc] %vm1221_vm1, %v1589_v46  ;;  %v1588_v7 = vrot.slane %v3985_v63, 6  ;;  %4037 = vmatprep.subr.bf16.mxu1 %v5915_v44  ;;  %2437 = vmatprep.mubr.bf16.mxu0 %v5913_v33  ;;  %v674_v32 = vpack.c.bf16 %v5071_v14, %v5071_v14  ;;  %v677_v63 = vpack.c.bf16 %v5021_v29, %v5021_v29 }
 0x1bb   : > { %v679_v59 = vpack.c.bf16 %v634_v2, %v634_v2  ;;  %v5084_v28 = vcombine.high %v634_v2, %v634_v2  ;;  %v5086_v58 = vpack.c.bf16 %v635_v49, %v635_v49  ;;  %v621_v39 = vmul.f32 %v4927_v48, %v603_v12  ;;  %4133 = vset.pattern.permute.xlu0 %v5913_v33 }
 0x1bc   : > { %v620_v56 = vmul.f32 %v4932_v25, %v602_v62  ;;  %1384 = vrot.lane.b32.xlu0 %v667_v47, %s4341_s26  ;;  %1793 = vrot.lane.b32.xlu1 %v5051_v1, %s4340_s25  ;;  %1620 = vst [vmem:[#allocation2 + $0xd8] sm:$0xcc] %v1588_v7  ;;  %v683_v29 = vpack.c.bf16 %v5034_v43, %v5034_v43 }
 0x1bd   : > { %1906 = vst.msk [vmem:[#allocation2 + $0x164] sm:$0x3] %vm996_vm0, %v679_v59  ;;  %v3989_v0 = vpack.c.bf16 %v5084_v28, %v634_v2  ;;  %v1593_v16 = vrot.slane %v5086_v58, 6  ;;  %v639_v15 = vadd.f32 %v4939_v42, %v621_v39  ;;  %v680_v62 = vpack.c.bf16 %v5084_v28, %v5084_v28 }
 0x1be   : > { %v638_v24 = vadd.f32 %v4944_v9, %v620_v56 }
 0x1bf   : > { %v1592_v60 = vrot.slane %v3989_v0, 6  ;;  %1625 = vst.msk [vmem:[#allocation2 + $0x158] sm:$0xc] %vm1221_vm1, %v1593_v16  ;;  %v5099_v48 = vpack.c.bf16 %v639_v15, %v639_v15 }
 0x1c0   : > { %v5101_v25 = vpack.c.bf16 %v638_v24, %v638_v24  ;;  %v5103_v3 = vcombine.high %v638_v24, %v638_v24  ;;  %1034 = vrot.lane.b32.xlu1 %v5051_v1, %s4341_s26  ;;  %1795 = vrot.lane.b32.xlu0 %v4981_v53, %s4340_s25 }
 0x1c1   : > { %5919 = vst [vmem:[#allocation3_spill] sm:$0xff] %v5099_v48  ;;  %1624 = vst [vmem:[#allocation2 + $0x150] sm:$0xcc] %v1592_v60  ;;  %v1597_v42 = vrot.slane %v5099_v48, 6 }
 0x1c2   : > { %1910 = vst.msk [vmem:[#allocation2 + $0x1dc] sm:$0x3] %vm996_vm0, %v5101_v25  ;;  %v3993_v9 = vpack.c.bf16 %v5103_v3, %v638_v24  ;;  %v686_v60 = vpack.c.bf16 %v5103_v3, %v5103_v3 }
 0x1c3   : > { %1629 = vst.msk [vmem:[#allocation2 + $0x1d0] sm:$0xc] %vm1221_vm1, %v1597_v42 }
 0x1c4   : > { %v1596_v40 = vrot.slane %v3993_v9, 6  ;;  %2097 = vrot.lane.b32.xlu1 %v4990_v20, %s4339_s24  ;;  %1084 = vrot.lane.b32.xlu0 %v4981_v53, %s4342_s27 }
 0x1c6   : > { %1628 = vst [vmem:[#allocation2 + $0x1c8] sm:$0xcc] %v1596_v40  ;;  %v5335_v40 = vrot.slane %v4422_v17, %v4387_v5 }
 0x1c8   : > { %2093 = vrot.lane.b32.xlu1 %v4981_v53, %s4339_s24  ;;  %1386 = vrot.lane.b32.xlu0 %v4981_v53, %s4341_s26  ;;  %v808_v53 = vcombine.high %v4422_v17, %v4422_v17 }
 0x1ca   : > { %v5141_v21 = vrot.slane %v808_v53, %v4387_v5 }
 0x1cc   : > { %1799 = vrot.lane.b32.xlu1 %v4990_v20, %s4340_s25  ;;  %1801 = vrot.lane.b32.xlu0 %v673_v41, %s4340_s25  ;;  %1541 = vst.msk [vmem:[#allocation2 + $0x1b8] sm:$0x3] %vm996_vm0, %v5141_v21 }
 0x1d0   : > { %1038 = vrot.lane.b32.xlu1 %v4990_v20, %s4341_s26  ;;  %1088 = vrot.lane.b32.xlu0 %v673_v41, %s4342_s27 }
 0x1d4   : > { %2103 = vrot.lane.b32.xlu1 %v5068_v6, %s4339_s24  ;;  %1388 = vrot.lane.b32.xlu0 %v673_v41, %s4341_s26 }
 0x1d8   : > { %2099 = vrot.lane.b32.xlu1 %v673_v41, %s4339_s24  ;;  %1807 = vrot.lane.b32.xlu0 %v4997_v23, %s4340_s25 }
 0x1dc   : > { %1805 = vrot.lane.b32.xlu1 %v5068_v6, %s4340_s25  ;;  %1092 = vrot.lane.b32.xlu0 %v4997_v23, %s4342_s27 }
 0x1e0   : > { %1042 = vrot.lane.b32.xlu1 %v5068_v6, %s4341_s26  ;;  %1390 = vrot.lane.b32.xlu0 %v4997_v23, %s4341_s26 }
 0x1e4   : > { %2109 = vrot.lane.b32.xlu1 %v5009_v27, %s4339_s24  ;;  %1813 = vrot.lane.b32.xlu0 %v679_v59, %s4340_s25 }
 0x1e8   : > { %2105 = vrot.lane.b32.xlu1 %v4997_v23, %s4339_s24  ;;  %1096 = vrot.lane.b32.xlu0 %v679_v59, %s4342_s27  ;;  %v665_v23 = vpack.c.bf16 %v5002_v10, %v5002_v10  ;;  %v668_v10 = vpack.c.bf16 %v5055_v11, %v5055_v11 }
 0x1ec   : > { %1811 = vrot.lane.b32.xlu1 %v5009_v27, %s4340_s25  ;;  %1392 = vrot.lane.b32.xlu0 %v679_v59, %s4341_s26 }
 0x1f0   : > { %1046 = vrot.lane.b32.xlu1 %v5009_v27, %s4341_s26  ;;  %1819 = vrot.lane.b32.xlu0 %v5023_v30, %s4340_s25 }
 0x1f4   : > { %2115 = vrot.lane.b32.xlu1 %v5086_v58, %s4339_s24  ;;  %1100 = vrot.lane.b32.xlu0 %v5023_v30, %s4342_s27 }
 0x1f8   : > { %2111 = vrot.lane.b32.xlu1 %v679_v59, %s4339_s24  ;;  %2083 = vrot.lane.b32.xlu0 %v665_v23, %s4339_s24 }
 0x1fc   : > { %1817 = vrot.lane.b32.xlu1 %v5086_v58, %s4340_s25  ;;  %1785 = vrot.lane.b32.xlu0 %v665_v23, %s4340_s25 }
 0x200   : > { %1050 = vrot.lane.b32.xlu1 %v5086_v58, %s4341_s26  ;;  %1028 = vrot.lane.b32.xlu0 %v665_v23, %s4341_s26 }
 0x204   : > { %2121 = vrot.lane.b32.xlu1 %v5036_v55, %s4339_s24  ;;  %1394 = vrot.lane.b32.xlu0 %v5023_v30, %s4341_s26 }
 0x208   : > { %2117 = vrot.lane.b32.xlu1 %v5023_v30, %s4339_s24  ;;  %1947 = vrot.lane.b32.xlu0 %v4686_v45, %s4339_s24 }
 0x20c   : > { %1823 = vrot.lane.b32.xlu1 %v5036_v55, %s4340_s25  ;;  %2089 = vrot.lane.b32.xlu0 %v668_v10, %s4339_s24 }
 0x20d   : > { %v5189_v50 = vpop.permute.xlu1 %2085  ;;  %v5204_v36 = vpop.permute.xlu0 %1076 }
 0x210   : > { %1054 = vrot.lane.b32.xlu1 %v5036_v55, %s4341_s26  ;;  %1791 = vrot.lane.b32.xlu0 %v668_v10, %s4340_s25 }
 0x211   : > { %v5194_v18 = vpop.permute.xlu1 %1783  ;;  %v5219_v11 = vpop.permute.xlu0 %1382 }
 0x214   : > { %1078 = vrot.lane.b32.xlu1 %v665_v23, %s4342_s27  ;;  %1032 = vrot.lane.b32.xlu0 %v668_v10, %s4341_s26  ;;  %v823_v23 = vcombine.high %v5335_v40, %v5335_v40 }
 0x215   : > { %v5198_v30 = vpop.permute.xlu1 %2081 }
 0x218   : > { %1951 = vrot.lane.b32.xlu1 %v4958_v52, %s4339_s24  ;;  %1249 = vrot.lane.b32.xlu0 %v4686_v45, %s4341_s26 }
 0x219   : > { %v5206_v47 = vpop.permute.xlu1 %1787 }
 0x21c   : > { %1666 = vrot.lane.b32.xlu1 %v4686_v45, %s4340_s25  ;;  %1670 = vrot.lane.b32.xlu0 %v4958_v52, %s4340_s25 }
 0x21d   : > { %v5221_v8 = vpop.permute.xlu1 %1030 }
 0x220   : > { %1082 = vrot.lane.b32.xlu1 %v668_v10, %s4342_s27  ;;  %2095 = vrot.lane.b32.xlu0 %v671_v57, %s4339_s24 }
 0x224   : > { %848 = vrot.lane.b32.xlu1 %v4694_v61, %s4341_s26  ;;  %1797 = vrot.lane.b32.xlu0 %v671_v57, %s4340_s25 }
 0x226   : > { %v5229_v37 = vpop.permute.xlu1 %2091  ;;  %v5231_v54 = vpop.permute.xlu0 %1789 }
 0x228   : > { %1668 = vrot.lane.b32.xlu1 %v4694_v61, %s4340_s25  ;;  %1036 = vrot.lane.b32.xlu0 %v671_v57, %s4341_s26 }
 0x22a   : > { %v5236_v13 = vpop.permute.xlu1 %2087  ;;  %v5238_v22 = vpop.permute.xlu0 %1080 }
 0x22c   : > { %1086 = vrot.lane.b32.xlu1 %v671_v57, %s4342_s27  ;;  %889 = vrot.lane.b32.xlu0 %v4686_v45, %s4342_s27 }
 0x22e   : > { %v5243_v31 = vpop.permute.xlu1 %1793  ;;  %v5245_v41 = vpop.permute.xlu0 %1384 }
 0x230   : > { %850 = vrot.lane.b32.xlu1 %v4958_v52, %s4341_s26  ;;  %2101 = vrot.lane.b32.xlu0 %v674_v32, %s4339_s24 }
 0x232   : > { %v5252_v34 = vpop.permute.xlu1 %1034  ;;  %v5254_v4 = vpop.permute.xlu0 %1795 }
 0x234   : > { %891 = vrot.lane.b32.xlu1 %v4694_v61, %s4342_s27  ;;  %1803 = vrot.lane.b32.xlu0 %v674_v32, %s4340_s25 }
 0x236   : > { %v5259_v45 = vpop.permute.xlu1 %2097  ;;  %v5261_v38 = vpop.permute.xlu0 %1084 }
 0x238   : > { %1090 = vrot.lane.b32.xlu1 %v674_v32, %s4342_s27  ;;  %1040 = vrot.lane.b32.xlu0 %v674_v32, %s4341_s26 }
 0x23a   : > { %v5265_v14 = vpop.permute.xlu1 %2093  ;;  %v5267_v46 = vpop.permute.xlu0 %1386 }
 0x23c   : > { %2127 = vrot.lane.b32.xlu1 %v5099_v48, %s4339_s24  ;;  %1825 = vrot.lane.b32.xlu0 %v5101_v25, %s4340_s25 }
 0x23e   : > { %v5273_v61 = vpop.permute.xlu1 %1799  ;;  %v5275_v2 = vpop.permute.xlu0 %1801 }
 0x240   : > { %1094 = vrot.lane.b32.xlu1 %v677_v63, %s4342_s27  ;;  %2107 = vrot.lane.b32.xlu0 %v677_v63, %s4339_s24 }
 0x242   : > { %v5281_v49 = vpop.permute.xlu1 %1038  ;;  %v5283_v12 = vpop.permute.xlu0 %1088 }
 0x244   : > { %1098 = vrot.lane.b32.xlu1 %v680_v62, %s4342_s27  ;;  %1809 = vrot.lane.b32.xlu0 %v677_v63, %s4340_s25 }
 0x246   : > { %v5289_v59 = vpop.permute.xlu1 %2103  ;;  %v5291_v7 = vpop.permute.xlu0 %1388 }
 0x248   : > { %1044 = vrot.lane.b32.xlu0 %v677_v63, %s4341_s26  ;;  %1102 = vrot.lane.b32.xlu1 %v683_v29, %s4342_s27 }
 0x24a   : > { %v5297_v39 = vpop.permute.xlu1 %2099  ;;  %v5299_v56 = vpop.permute.xlu0 %1807 }
 0x24c   : > { %2113 = vrot.lane.b32.xlu0 %v680_v62, %s4339_s24  ;;  %2123 = vrot.lane.b32.xlu1 %v5101_v25, %s4339_s24 }
 0x24e   : > { %v5304_v28 = vpop.permute.xlu1 %1805  ;;  %v5306_v0 = vpop.permute.xlu0 %1092 }
 0x250   : > { %1815 = vrot.lane.b32.xlu0 %v680_v62, %s4340_s25  ;;  %1829 = vrot.lane.b32.xlu1 %v5099_v48, %s4340_s25 }
 0x252   : > { %v5311_v43 = vpop.permute.xlu1 %1042  ;;  %v5313_v16 = vpop.permute.xlu0 %1390 }
 0x254   : > { %1048 = vrot.lane.b32.xlu0 %v680_v62, %s4341_s26  ;;  %1058 = vrot.lane.b32.xlu1 %v5099_v48, %s4341_s26 }
 0x256   : > { %v5318_v15 = vpop.permute.xlu1 %2109  ;;  %v5320_v24 = vpop.permute.xlu0 %1813 }
 0x258   : > { %1106 = vrot.lane.b32.xlu1 %v686_v60, %s4342_s27  ;;  %2119 = vrot.lane.b32.xlu0 %v683_v29, %s4339_s24 }
 0x25a   : > { %v5326_v42 = vpop.permute.xlu1 %2105  ;;  %v5328_v9 = vpop.permute.xlu0 %1096 }
 0x25c   : > { %1957 = vrot.lane.b32.xlu1 %v5141_v21, %s4339_s24  ;;  %1821 = vrot.lane.b32.xlu0 %v683_v29, %s4340_s25 }
 0x25e   : > { %v5337_v53 = vpop.permute.xlu1 %1811  ;;  %v5339_v3 = vpop.permute.xlu0 %1392 }
 0x260   : > { %1672 = vrot.lane.b32.xlu1 %v5335_v40, %s4340_s25  ;;  %1052 = vrot.lane.b32.xlu0 %v683_v29, %s4341_s26 }
 0x262   : > { %v5346_v10 = vpop.permute.xlu1 %1046  ;;  %v5348_v35 = vpop.permute.xlu0 %1819 }
 0x264   : > { %852 = vrot.lane.b32.xlu1 %v823_v23, %s4341_s26  ;;  %2125 = vrot.lane.b32.xlu0 %v686_v60, %s4339_s24 }
 0x266   : > { %v5352_v5 = vpop.permute.xlu1 %2115  ;;  %v5354_v17 = vpop.permute.xlu0 %1100 }
 0x267   : > { %5920 = vst [vmem:[#allocation4_spill] sm:$0xff] %v5354_v17 }
 0x268   : > { %1674 = vrot.lane.b32.xlu1 %v823_v23, %s4340_s25  ;;  %1827 = vrot.lane.b32.xlu0 %v686_v60, %s4340_s25 }
 0x26a   : > { %v5358_v57 = vpop.permute.xlu1 %2111  ;;  %v2084_v26 = vpop.permute.xlu0 %2083 }
 0x26b   : > { %v2129_v32 = vsel %vm1959_vm4, %v5198_v30, %v2084_v26  ;;  %v2130_v63 = vsel %vm1959_vm4, %v2084_v26, %v5189_v50 }
 0x26c   : > { %v2147_v62 = vsel %vm1678_vm5, %v2130_v63, %v5194_v18  ;;  %854 = vrot.lane.b32.xlu1 %v5141_v21, %s4341_s26  ;;  %1056 = vrot.lane.b32.xlu0 %v686_v60, %s4341_s26 }
 0x26d   : > { %v3840_v29 = vcombine.low %v2129_v32, %v2147_v62  ;;  %v1408_v32 = vsel %vm856_vm6, %v4961_v19, %v5219_v11 }
 0x26e   : > { %v5369_v33 = vpop.permute.xlu1 %1817  ;;  %v1786_v44 = vpop.permute.xlu0 %1785 }
 0x26f   : > { %v2217_v48 = vrot.slane %v3840_v29, 6  ;;  %v1831_v17 = vsel %vm1678_vm5, %v5194_v18, %v1786_v44  ;;  %v1832_v30 = vsel %vm1678_vm5, %v1786_v44, %v5206_v47 }
 0x270   : > { %v3808_v50 = vcombine.low %v1831_v17, %v1832_v30  ;;  %895 = vrot.lane.b32.xlu1 %v823_v23, %s4342_s27  ;;  %1104 = vrot.lane.b32.xlu0 %v5101_v25, %s4342_s27 }
 0x271   : > { %2249 = vst [vmem:[#allocation2 + $0x30] sm:$0xcc] %v2217_v48 }
 0x272   : > { %1895 = vst [vmem:[#allocation2 + $0x30] sm:$0x33] %v3808_v50  ;;  %v5378_v60 = vpop.permute.xlu1 %1050  ;;  %v1029_v26 = vpop.permute.xlu0 %1028 }
 0x273   : > { %v1398_v18 = vsel %vm856_vm6, %v5219_v11, %v1029_v26  ;;  %v3753_v63 = vcombine.low %v1029_v26, %v1029_v26 }
 0x274   : > { %v3752_v44 = vcombine.low %v1408_v32, %v1398_v18  ;;  %1955 = vrot.lane.b32.xlu0 %v823_v23, %s4339_s24 }
 0x275   : > { %1495 = vst.msk [vmem:[#allocation2 + $0x2c] sm:$0x3] %vm996_vm0, %v3753_v63 }
 0x276   : > { %1494 = vst [vmem:[#allocation2 + $0x24] sm:$0x33] %v3752_v44  ;;  %v5387_v47 = vpop.permute.xlu1 %2121  ;;  %v5389_v48 = vpop.permute.xlu0 %1394 }
 0x278   : > { %1396 = vrot.lane.b32.xlu0 %v5101_v25, %s4341_s26 }
 0x279   : > { %v2275_v17 = vld [vmem:[#allocation2 + $0x30] sm:$0xff] }
 0x27a   : > { %v5393_v62 = vpop.permute.xlu1 %2117  ;;  %v1948_v19 = vpop.permute.xlu0 %1947  ;;  %v3864_v29 = vcombine.high %v2275_v17, %v2275_v17  ;;  %v3863_v11 = vcombine.low %v2275_v17, %v2275_v17 }
 0x27c   : > { %1953 = vrot.lane.b32.xlu0 %v5335_v40, %s4339_s24  ;;  %3866 = vmatprep.subr.msk.bf16.mxu0 %vm274_vm2, %v3864_v29  ;;  %v2397_v23 = vsel %vm274_vm2, %v3863_v11, 0 }
 0x27d   : > { %2416 = vmatpush1.bf16.msra.mxu0 %v2397_v23 }
 0x27e   : > { %v5399_v30 = vpop.permute.xlu1 %1823  ;;  %v2090_v50 = vpop.permute.xlu0 %2089 }
 0x27f   : > { %v2131_v25 = vsel %vm1959_vm4, %v5236_v13, %v2090_v50  ;;  %v2132_v32 = vsel %vm1959_vm4, %v2090_v50, %v5229_v37  ;;  %v1060_v37 = vsel %vm856_vm6, %v1029_v26, %v5221_v8  ;;  %v1411_v50 = vsel %vm856_vm6, %v5051_v1, %v5245_v41 }
 0x280   : > { %v2150_v18 = vsel %vm1678_vm5, %v2132_v32, %v5231_v54  ;;  %1251 = vrot.lane.b32.xlu0 %v5335_v40, %s4341_s26 }
 0x281   : > { %v3842_v63 = vcombine.low %v2131_v25, %v2150_v18 }
 0x282   : > { %v5409_v44 = vpop.permute.xlu1 %1054  ;;  %v1792_v17 = vpop.permute.xlu0 %1791 }
 0x283   : > { %v2219_v29 = vrot.slane %v3842_v63, 6  ;;  %v1833_v11 = vsel %vm1678_vm5, %v5231_v54, %v1792_v17  ;;  %v1834_v13 = vsel %vm1678_vm5, %v1792_v17, %v5243_v31  ;;  %v1118_v31 = vsel %vm897_vm7, %v1060_v37, %v5204_v36 }
 0x284   : > { %v3810_v23 = vcombine.low %v1833_v11, %v1834_v13  ;;  %1676 = vrot.lane.b32.xlu0 %v5141_v21, %s4340_s25 }
 0x285   : > { %2251 = vst [vmem:[#allocation2 + $0x6c] sm:$0xcc] %v2219_v29  ;;  %v3420_v29 = vld [vmem:[%s5909_s2] sm:$0xff] }
 0x286   : > { %1897 = vst [vmem:[#allocation2 + $0x6c] sm:$0x33] %v3810_v23  ;;  %v1079_v25 = vpop.permute.xlu1 %1078  ;;  %v1033_v32 = vpop.permute.xlu0 %1032  ;;  %v1972_v23 = vsel %vm1959_vm4, %v1948_v19, %v4916_v51 }
 0x287   : > { %v1108_v54 = vsel %vm897_vm7, %v5204_v36, %v1079_v25  ;;  %v3721_v18 = vcombine.low %v1079_v25, %v1079_v25  ;;  %v1399_v8 = vsel %vm856_vm6, %v5245_v41, %v1033_v32  ;;  %v3755_v17 = vcombine.low %v1033_v32, %v1033_v32 }
 0x288   : > { %v3720_v26 = vcombine.low %v1118_v31, %v1108_v54  ;;  %v3754_v63 = vcombine.low %v1411_v50, %v1399_v8  ;;  %893 = vrot.lane.b32.xlu0 %v5335_v40, %s4342_s27  ;;  %v1061_v50 = vsel %vm856_vm6, %v1033_v32, %v5252_v34 }
 0x289   : > { %v1189_v1 = vrot.slane %v3721_v18, 6  ;;  %1497 = vst.msk [vmem:[#allocation2 + $0x68] sm:$0x3] %vm996_vm0, %v3755_v17  ;;  %v1121_v8 = vsel %vm897_vm7, %v1061_v50, %v5238_v22  ;;  %v4142_v50 = vld [vmem:[#allocation2 + $0x4] ss:$12 sps:$4 sm:$0xff]  }
 0x28a   : > { %v1188_v11 = vrot.slane %v3720_v26, 6  ;;  %1496 = vst [vmem:[#allocation2 + $0x60] sm:$0x33] %v3754_v63  ;;  %v1952_v36 = vpop.permute.xlu1 %1951  ;;  %v1250_v13 = vpop.permute.xlu0 %1249 }
 0x28b   : > { %1222 = vst.msk [vmem:[#allocation2 + $0x20] sm:$0xc] %vm1221_vm1, %v1189_v1  ;;  %v1973_v41 = vsel %vm1959_vm4, %v4916_v51, %v1952_v36 }
 0x28c   : > { %1220 = vst [vmem:[#allocation2 + $0x18] sm:$0xcc] %v1188_v11  ;;  %3423 = vperm.xlu0 %4133, %v3420_v29  }
 0x28e   : > { %v5437_v37 = vpop.permute.xlu1 %1666  ;;  %v5439_v40 = vpop.permute.xlu0 %1670 }
 0x28f   : > { %v1997_v25 = vsel %vm1678_vm5, %v1973_v41, %v5437_v37  ;;  %v3837_v54 = vcombine.low %v5437_v37, %v5437_v37 }
 0x290   : > { %v3836_v31 = vcombine.low %v1972_v23, %v1997_v25  ;;  %v2267_v23 = vld [vmem:[#allocation2] sm:$0xff] }
 0x291   : > { %2078 = vst.msk [vmem:[#allocation2 + $0x188] sm:$0x3] %vm996_vm0, %v3837_v54 }
 0x292   : > { %2077 = vst [vmem:[#allocation2 + $0x180] sm:$0x33] %v3836_v31  ;;  %v1083_v18 = vpop.permute.xlu1 %1082  ;;  %v2096_v26 = vpop.permute.xlu0 %2095  ;;  %v4138_v63 = vld [vmem:[#allocation2 + $0x20] ss:$12 sps:$4 sm:$0xff]   ;;  %v4144_v31 = vld [vmem:[#allocation2 + $0x8] ss:$12 sps:$4 sm:$0xff]  }
 0x293   : > { %v1109_v51 = vsel %vm897_vm7, %v5238_v22, %v1083_v18  ;;  %v3723_v34 = vcombine.low %v1083_v18, %v1083_v18  ;;  %v2133_v19 = vsel %vm1959_vm4, %v5265_v14, %v2096_v26  ;;  %v2134_v32 = vsel %vm1959_vm4, %v2096_v26, %v5259_v45  ;;  %v4139_v17 = vld [vmem:[#allocation2 + $0x1c] ss:$12 sps:$4 sm:$0xff]   ;;  %v4141_v1 = vld [vmem:[#allocation2 + $0x18] ss:$12 sps:$4 sm:$0xff]   ;;  %4038 = vmatpush3.bf16.msra.mxu1 %v4138_v63  ;;  %v2285_v18 = vld [vmem:[#allocation2 + $0x6c] sm:$0xff] }
 0x294   : > { %v3722_v29 = vcombine.low %v1121_v8, %v1109_v51  ;;  %v2153_v11 = vsel %vm1678_vm5, %v2134_v32, %v5254_v4  ;;  %2417 = vmatprep.subr.bf16.mxu0 %v4139_v17  ;;  %v5921_v22 = vmov 0.0   ;;  %v1282_v14 = vsel %vm856_vm6, %v4958_v52, %v1250_v13  ;;  %v4147_v8 = vld [vmem:[#allocation2 + $0x74] ss:$0 sps:$4 sm:$0xff]  }
 0x295   : > { %v1191_v36 = vrot.slane %v3723_v34, 6  ;;  %v3844_v41 = vcombine.low %v2133_v19, %v2153_v11  ;;  %4039 = vmatprep.subr.bf16.mxu1 %v5921_v22  ;;  %2418 = vmatpush1.bf16.msra.mxu0 %v4141_v1  ;;  %v2269_v34 = vld [vmem:[#allocation2 + $0xc] sm:$0xff]  ;;  %v5475_v19 = vld [vmem:[%s5908_s1] sm:$0xff]   ;;  %v1414_v11 = vsel %vm856_vm6, %v4990_v20, %v5267_v46 }
 0x296   : > { %v1190_v25 = vrot.slane %v3722_v29, 6  ;;  %v5463_v54 = vpop.permute.xlu1 %848  ;;  %v1798_v45 = vpop.permute.xlu0 %1797  ;;  %2419 = vmatprep.subr.bf16.mxu0 %v4142_v50 }
 0x297   : > { %1224 = vst.msk [vmem:[#allocation2 + $0x5c] sm:$0xc] %vm1221_vm1, %v1191_v36  ;;  %v2221_v26 = vrot.slane %v3844_v41, 6  ;;  %v1259_v63 = vsel %vm856_vm6, %v1250_v13, %v5463_v54  ;;  %v3749_v51 = vcombine.low %v5463_v54, %v5463_v54  ;;  %v1835_v52 = vsel %vm1678_vm5, %v5254_v4, %v1798_v45  ;;  %4040 = vmatpush3.bf16.msra.mxu1 %v4144_v31 }
 0x298   : > { %1223 = vst [vmem:[#allocation2 + $0x54] sm:$0xcc] %v1190_v25  ;;  %v3748_v32 = vcombine.low %v1282_v14, %v1259_v63  ;;  %v1836_v17 = vsel %vm1678_vm5, %v1798_v45, %v5273_v61  ;;  %v3857_v13 = vcombine.low %v2267_v23, %v2269_v34  ;;  %4045 = vmatprep.subr.bf16.mxu1 %v5921_v22  ;;  %v2536_v61 = vsel %vm274_vm2, %v4147_v8, 0 }
 0x299   : > { %2253 = vst [vmem:[#allocation2 + $0xa8] sm:$0xcc] %v2221_v26  ;;  %v1347_v1 = vrot.slane %v3749_v51, 6  ;;  %v3812_v29 = vcombine.low %v1835_v52, %v1836_v17  ;;  %v3875_v4 = vcombine.low %v2285_v18, %v2285_v18  ;;  %v3876_v14 = vcombine.high %v2285_v18, %v2285_v18 }
 0x29a   : > { %v1346_v36 = vrot.slane %v3748_v32, 6  ;;  %v1669_v41 = vpop.permute.xlu1 %1668  ;;  %v1037_v50 = vpop.permute.xlu0 %1036  ;;  %2420 = vmatpush1.bf16.msra.mxu0 %v3857_v13  ;;  %4042 = vmatmul.mubr.msk.bf16.vlgmr.msra.gmra.mxu1 %vm2392_vm9, %v5475_v19  ;;  %v5922_v17 = vmov 0  }
 0x29b   : > { %1379 = vst.msk [vmem:[#allocation2 + $0x170] sm:$0xc] %vm1221_vm1, %v1347_v1  ;;  %1899 = vst [vmem:[#allocation2 + $0xa8] sm:$0x33] %v3812_v29  ;;  %v1691_v23 = vsel %vm1678_vm5, %v5437_v37, %v1669_v41  ;;  %v1692_v25 = vsel %vm1678_vm5, %v1669_v41, %v5439_v40  ;;  %v1062_v45 = vsel %vm856_vm6, %v1037_v50, %v5281_v49  ;;  %3878 = vmatprep.subr.msk.bf16.mxu0 %vm274_vm2, %v3876_v14  ;;  %v4154_v29 = vld [vmem:[#allocation2 + $0x40] ss:$12 sps:$4 sm:$0xff]  }
 0x29c   : > { %v1400_v20 = vsel %vm856_vm6, %v5267_v46, %v1037_v50  ;;  %1378 = vst [vmem:[#allocation2 + $0x168] sm:$0xcc] %v1346_v36  ;;  %v3804_v31 = vcombine.low %v1691_v23, %v1692_v25  ;;  %v3757_v8 = vcombine.low %v1037_v50, %v1037_v50  ;;  %4046 = vmatpush3.bf16.msra.mxu1 %v2536_v61  ;;  %v2530_v37 = vsel %vm274_vm2, %v3875_v4, 0  ;;  %v4155_v41 = vld [vmem:[#allocation2 + $0x44] ss:$12 sps:$4 sm:$0xff]  }
 0x29d   : > { %v3756_v18 = vcombine.low %v1414_v11, %v1400_v20  ;;  %3867 = vmatmul.mubr.msk.bf16.vlgmr.msra.gmra.mxu0 %vm2392_vm9, %v5475_v19  ;;  %4047 = vmatprep.subr.bf16.mxu1 %v5921_v22  ;;  %v1124_v51 = vsel %vm897_vm7, %v1062_v45, %v5261_v38  ;;  %v4152_v45 = vld [vmem:[#allocation2 + $0x3c] ss:$12 sps:$4 sm:$0xff]  }
 0x29e   : > { %v1747_v49 = vrot.slane %v3804_v31, 6  ;;  %1499 = vst.msk [vmem:[#allocation2 + $0xa4] sm:$0x3] %vm996_vm0, %v3757_v8  ;;  %v1087_v46 = vpop.permute.xlu1 %1086  ;;  %v890_v40 = vpop.permute.xlu0 %889  ;;  %2549 = vmatpush1.bf16.msra.mxu0 %v2530_v37  ;;  %v4148_v26 = vld [vmem:[#allocation2 + $0x5c] ss:$12 sps:$4 sm:$0xff]   ;;  %4051 = vmatprep.mubr.msk.bf16.mxu1 %vm4344_vm8, %v5921_v22 }
 0x29f   : > { %1498 = vst [vmem:[#allocation2 + $0x9c] sm:$0x33] %v3756_v18  ;;  %v1110_v63 = vsel %vm897_vm7, %v5261_v38, %v1087_v46  ;;  %v3725_v52 = vcombine.low %v1087_v46, %v1087_v46  ;;  %v4149_v34 = vld [vmem:[#allocation2 + $0x54] ss:$12 sps:$4 sm:$0xff]   ;;  %v4151_v32 = vld [vmem:[#allocation2 + $0x58] ss:$12 sps:$4 sm:$0xff]   ;;  %2570 = vmatprep.mubr.bf16.mxu0 %v5922_v17 }
 0x2a0   : > { %1779 = vst [vmem:[#allocation2 + $0x174] sm:$0xcc] %v1747_v49  ;;  %v3724_v13 = vcombine.low %v1124_v51, %v1110_v63  ;;  %4048 = vmatpush3.bf16.msra.mxu1 %v4148_v26  ;;  %2550 = vmatprep.subr.bf16.mxu0 %v4151_v32  ;;  %v4157_v38 = vld [vmem:[#allocation2 + $0xb0] ss:$0 sps:$4 sm:$0xff]  }
 0x2a1   : > { %v1193_v1 = vrot.slane %v3725_v52, 6  ;;  %4049 = vmatprep.subr.bf16.mxu1 %v5921_v22  ;;  %v1417_v52 = vsel %vm856_vm6, %v5068_v6, %v5291_v7 }
 0x2a2   : > { %v1192_v4 = vrot.slane %v3724_v13, 6  ;;  %v851_v11 = vpop.permute.xlu1 %850  ;;  %v2102_v36 = vpop.permute.xlu0 %2101  ;;  %2551 = vmatpush1.bf16.msra.mxu0 %v4149_v34  ;;  %v2295_v50 = vld [vmem:[#allocation2 + $0xa8] sm:$0xff] }
 0x2a3   : > { %1226 = vst.msk [vmem:[#allocation2 + $0x98] sm:$0xc] %vm1221_vm1, %v1193_v1  ;;  %v863_v14 = vsel %vm856_vm6, %v5463_v54, %v851_v11  ;;  %v2135_v61 = vsel %vm1959_vm4, %v5297_v39, %v2102_v36  ;;  %v2136_v23 = vsel %vm1959_vm4, %v2102_v36, %v5289_v59  ;;  %2552 = vmatprep.subr.bf16.mxu0 %v4154_v29  ;;  %v2669_v39 = vsel %vm274_vm2, %v4157_v38, 0 }
 0x2a4   : > { %1225 = vst [vmem:[#allocation2 + $0x90] sm:$0xcc] %v1192_v4  ;;  %v2156_v25 = vsel %vm1678_vm5, %v2136_v23, %v5275_v2  ;;  %4050 = vmatpush3.bf16.msra.mxu1 %v4155_v41  ;;  %v3888_v31 = vcombine.high %v2295_v50, %v2295_v50  ;;  %v3887_v18 = vcombine.low %v2295_v50, %v2295_v50  ;;  %v4165_v23 = vld [vmem:[#allocation2 + $0x80] ss:$12 sps:$4 sm:$0xff]  }
 0x2a5   : > { %v3846_v20 = vcombine.low %v2135_v61, %v2156_v25  ;;  %4055 = vmatprep.subr.bf16.mxu1 %v5921_v22  ;;  %v927_v54 = vsel %vm897_vm7, %v863_v14, %v890_v40  ;;  %v4164_v61 = vld [vmem:[#allocation2 + $0x7c] ss:$12 sps:$4 sm:$0xff]   ;;  %v4167_v25 = vld [vmem:[#allocation2 + $0xec] ss:$0 sps:$4 sm:$0xff]  }
 0x2a6   : > { %v892_v8 = vpop.permute.xlu1 %891  ;;  %v1804_v37 = vpop.permute.xlu0 %1803  ;;  %2553 = vmatpush1.bf16.msra.mxu0 %v4152_v45  ;;  %v4162_v45 = vld [vmem:[#allocation2 + $0x78] ss:$12 sps:$4 sm:$0xff]  }
 0x2a7   : > { %v2223_v59 = vrot.slane %v3846_v20, 6  ;;  %v904_v49 = vsel %vm897_vm7, %v890_v40, %v892_v8  ;;  %v3717_v46 = vcombine.low %v892_v8, %v892_v8  ;;  %v1837_v26 = vsel %vm1678_vm5, %v5275_v2, %v1804_v37  ;;  %4052 = vmatmul.mubr.msk.bf16.vlgmr.msra.gmra.mxu1 %vm2392_vm9, %v5475_v19  ;;  %3890 = vmatprep.subr.msk.bf16.mxu0 %vm274_vm2, %v3888_v31 }
 0x2a8   : > { %v3716_v63 = vcombine.low %v927_v54, %v904_v49  ;;  %v1838_v51 = vsel %vm1678_vm5, %v1804_v37, %v5304_v28  ;;  %4056 = vmatpush3.bf16.msra.mxu1 %v2669_v39  ;;  %4061 = vmatprep.mubr.msk.bf16.mxu1 %vm4344_vm8, %v5921_v22  ;;  %v2663_v2 = vsel %vm274_vm2, %v3887_v18, 0  ;;  %v2802_v39 = vsel %vm274_vm2, %v4167_v25, 0 }
 0x2a9   : > { %2255 = vst [vmem:[#allocation2 + $0xe4] sm:$0xcc] %v2223_v59  ;;  %1009 = vst.msk [vmem:[#allocation2 + $0x170] sm:$0x3] %vm996_vm0, %v3717_v46  ;;  %v3814_v40 = vcombine.low %v1837_v26, %v1838_v51  ;;  %3879 = vmatmul.mubr.msk.bf16.vlgmr.msra.gmra.mxu0 %vm2392_vm9, %v5475_v19  ;;  %4057 = vmatprep.subr.bf16.mxu1 %v5921_v22 }
 0x2aa   : > { %1008 = vst [vmem:[#allocation2 + $0x168] sm:$0x33] %v3716_v63  ;;  %v1091_v28 = vpop.permute.xlu1 %1090  ;;  %v1041_v34 = vpop.permute.xlu0 %1040  ;;  %2682 = vmatpush1.bf16.msra.mxu0 %v2663_v2  ;;  %v4158_v32 = vld [vmem:[#allocation2 + $0x98] ss:$12 sps:$4 sm:$0xff]   ;;  %2703 = vmatprep.mubr.bf16.mxu0 %v5922_v17 }
 0x2ab   : > { %1901 = vst [vmem:[#allocation2 + $0xe4] sm:$0x33] %v3814_v40  ;;  %v1111_v13 = vsel %vm897_vm7, %v5283_v12, %v1091_v28  ;;  %v3727_v1 = vcombine.low %v1091_v28, %v1091_v28  ;;  %v1063_v29 = vsel %vm856_vm6, %v1041_v34, %v5311_v43  ;;  %v1401_v4 = vsel %vm856_vm6, %v5291_v7, %v1041_v34  ;;  %v4159_v11 = vld [vmem:[#allocation2 + $0x90] ss:$12 sps:$4 sm:$0xff]   ;;  %v4161_v6 = vld [vmem:[#allocation2 + $0x94] ss:$12 sps:$4 sm:$0xff]  }
 0x2ac   : > { %v1127_v36 = vsel %vm897_vm7, %v1063_v29, %v5283_v12  ;;  %v3758_v41 = vcombine.low %v1417_v52, %v1401_v4  ;;  %v3759_v50 = vcombine.low %v1041_v34, %v1041_v34  ;;  %4058 = vmatpush3.bf16.msra.mxu1 %v4158_v32  ;;  %2683 = vmatprep.subr.bf16.mxu0 %v4161_v6 }
 0x2ad   : > { %v1195_v38 = vrot.slane %v3727_v1, 6  ;;  %v3726_v14 = vcombine.low %v1127_v36, %v1111_v13  ;;  %4059 = vmatprep.subr.bf16.mxu1 %v5921_v22  ;;  %v1420_v4 = vsel %vm856_vm6, %v5009_v27, %v5313_v16  ;;  %v4175_v36 = vld [vmem:[#allocation2 + $0xbc] ss:$12 sps:$4 sm:$0xff]  }
 0x2ae   : > { %1500 = vst [vmem:[#allocation2 + $0xd8] sm:$0x33] %v3758_v41  ;;  %1501 = vst.msk [vmem:[#allocation2 + $0xe0] sm:$0x3] %vm996_vm0, %v3759_v50  ;;  %v5550_v43 = vpop.permute.xlu1 %2127  ;;  %v5552_v7 = vpop.permute.xlu0 %1825  ;;  %2684 = vmatpush1.bf16.msra.mxu0 %v4159_v11 }
 0x2af   : > { %1228 = vst.msk [vmem:[#allocation2 + $0xd4] sm:$0xc] %vm1221_vm1, %v1195_v38  ;;  %v1194_v12 = vrot.slane %v3726_v14, 6  ;;  %2685 = vmatprep.subr.bf16.mxu0 %v4164_v61  ;;  %v4176_v38 = vld [vmem:[#allocation2 + $0x128] ss:$0 sps:$4 sm:$0xff]  }
 0x2b0   : > { %4060 = vmatpush3.bf16.msra.mxu1 %v4165_v23 }
 0x2b1   : > { %1227 = vst [vmem:[#allocation2 + $0xcc] sm:$0xcc] %v1194_v12  ;;  %4065 = vmatprep.subr.bf16.mxu1 %v5921_v22 }
 0x2b2   : > { %v1095_v20 = vpop.permute.xlu1 %1094  ;;  %v2108_v31 = vpop.permute.xlu0 %2107  ;;  %2686 = vmatpush1.bf16.msra.mxu0 %v4162_v45  ;;  %v2305_v18 = vld [vmem:[#allocation2 + $0xe4] sm:$0xff]  ;;  %v4172_v45 = vld [vmem:[#allocation2 + $0xb4] ss:$12 sps:$4 sm:$0xff]  }
 0x2b3   : > { %v3729_v8 = vcombine.low %v1095_v20, %v1095_v20  ;;  %v2137_v54 = vsel %vm1959_vm4, %v5326_v42, %v2108_v31  ;;  %v2138_v37 = vsel %vm1959_vm4, %v2108_v31, %v5318_v15  ;;  %4062 = vmatmul.mubr.msk.bf16.vlgmr.msra.gmra.mxu1 %vm2392_vm9, %v5475_v19  ;;  %v3900_v49 = vcombine.high %v2305_v18, %v2305_v18 }
 0x2b4   : > { %v2159_v59 = vsel %vm1678_vm5, %v2138_v37, %v5299_v56  ;;  %4066 = vmatpush3.bf16.msra.mxu1 %v2802_v39  ;;  %v3899_v46 = vcombine.low %v2305_v18, %v2305_v18  ;;  %4071 = vmatprep.mubr.msk.bf16.mxu1 %vm4344_vm8, %v5921_v22  ;;  %v2935_v18 = vsel %vm274_vm2, %v4176_v38, 0  ;;  %v4184_v38 = vld [vmem:[#allocation2 + $0xf0] ss:$12 sps:$4 sm:$0xff]  }
 0x2b5   : > { %v1197_v26 = vrot.slane %v3729_v8, 6  ;;  %v3848_v63 = vcombine.low %v2137_v54, %v2159_v59  ;;  %3891 = vmatmul.mubr.msk.bf16.vlgmr.msra.gmra.mxu0 %vm2392_vm9, %v5475_v19  ;;  %4067 = vmatprep.subr.bf16.mxu1 %v5921_v22 }
 0x2b6   : > { %3902 = vmatprep.subr.msk.bf16.mxu0 %vm274_vm2, %v3900_v49  ;;  %v5571_v15 = vpop.permute.xlu1 %1098  ;;  %v1810_v42 = vpop.permute.xlu0 %1809  ;;  %v2796_v51 = vsel %vm274_vm2, %v3899_v46, 0  ;;  %v4168_v40 = vld [vmem:[#allocation2 + $0xd4] ss:$12 sps:$4 sm:$0xff]   ;;  %2836 = vmatprep.mubr.bf16.mxu0 %v5922_v17 }
 0x2b7   : > { %1230 = vst.msk [vmem:[#allocation2 + $0x110] sm:$0xc] %vm1221_vm1, %v1197_v26  ;;  %v2225_v2 = vrot.slane %v3848_v63, 6  ;;  %v3731_v52 = vcombine.low %v5571_v15, %v5571_v15  ;;  %v1839_v28 = vsel %vm1678_vm5, %v5299_v56, %v1810_v42  ;;  %2815 = vmatpush1.bf16.msra.mxu0 %v2796_v51  ;;  %v1840_v34 = vsel %vm1678_vm5, %v1810_v42, %v5337_v53  ;;  %v4174_v56 = vld [vmem:[#allocation2 + $0xb8] ss:$12 sps:$4 sm:$0xff]  }
 0x2b8   : > { %4068 = vmatpush3.bf16.msra.mxu1 %v4168_v40  ;;  %v4169_v32 = vld [vmem:[#allocation2 + $0xcc] ss:$12 sps:$4 sm:$0xff]   ;;  %v4171_v13 = vld [vmem:[#allocation2 + $0xd0] ss:$12 sps:$4 sm:$0xff]   ;;  %v3816_v29 = vcombine.low %v1839_v28, %v1840_v34  ;;  %v1112_v53 = vsel %vm897_vm7, %v5306_v0, %v1095_v20  ;;  %v1423_v51 = vsel %vm856_vm6, %v5086_v58, %v5339_v3  ;;  %v1113_v34 = vsel %vm897_vm7, %v5328_v9, %v5571_v15 }
 0x2b9   : > { %2257 = vst [vmem:[#allocation2 + $0x120] sm:$0xcc] %v2225_v2  ;;  %v1199_v1 = vrot.slane %v3731_v52, 6  ;;  %4069 = vmatprep.subr.bf16.mxu1 %v5921_v22  ;;  %2816 = vmatprep.subr.bf16.mxu0 %v4171_v13 }
 0x2ba   : > { %v5586_v11 = vpop.permute.xlu1 %1102  ;;  %v1045_v6 = vpop.permute.xlu0 %1044  ;;  %1903 = vst [vmem:[#allocation2 + $0x120] sm:$0x33] %v3816_v29 }
 0x2bb   : > { %1232 = vst.msk [vmem:[#allocation2 + $0x14c] sm:$0xc] %vm1221_vm1, %v1199_v1  ;;  %v3733_v41 = vcombine.low %v5586_v11, %v5586_v11  ;;  %v1064_v50 = vsel %vm856_vm6, %v1045_v6, %v5346_v10  ;;  %v1402_v27 = vsel %vm856_vm6, %v5313_v16, %v1045_v6  ;;  %2817 = vmatpush1.bf16.msra.mxu0 %v4169_v32 }
 0x2bc   : > { %v1130_v14 = vsel %vm897_vm7, %v1064_v50, %v5306_v0  ;;  %v3760_v61 = vcombine.low %v1420_v4, %v1402_v27  ;;  %v3761_v23 = vcombine.low %v1045_v6, %v1045_v6  ;;  %2818 = vmatprep.subr.bf16.mxu0 %v4174_v56  ;;  %4070 = vmatpush3.bf16.msra.mxu1 %v4175_v36  ;;  %v4186_v6 = vld [vmem:[#allocation2 + $0xf4] ss:$12 sps:$4 sm:$0xff]   ;;  %v4187_v56 = vld [vmem:[#allocation2 + $0x164] ss:$0 sps:$4 sm:$0xff]  }
 0x2bd   : > { %v1201_v12 = vrot.slane %v3733_v41, 6  ;;  %v3728_v25 = vcombine.low %v1130_v14, %v1112_v53  ;;  %4075 = vmatprep.subr.bf16.mxu1 %v5921_v22 }
 0x2be   : > { %1502 = vst [vmem:[#allocation2 + $0x114] sm:$0x33] %v3760_v61  ;;  %1503 = vst.msk [vmem:[#allocation2 + $0x11c] sm:$0x3] %vm996_vm0, %v3761_v23  ;;  %v5601_v10 = vpop.permute.xlu1 %2123  ;;  %v2114_v16 = vpop.permute.xlu0 %2113 }
 0x2bf   : > { %1234 = vst.msk [vmem:[#allocation2 + $0x188] sm:$0xc] %vm1221_vm1, %v1201_v12  ;;  %v1196_v20 = vrot.slane %v3728_v25, 6  ;;  %v2139_v0 = vsel %vm1959_vm4, %v5358_v57, %v2114_v16  ;;  %v2140_v31 = vsel %vm1959_vm4, %v2114_v16, %v5352_v5  ;;  %2819 = vmatpush1.bf16.msra.mxu0 %v4172_v45  ;;  %4072 = vmatmul.mubr.msk.bf16.vlgmr.msra.gmra.mxu1 %vm2392_vm9, %v5475_v19 }
 0x2c0   : > { %v2162_v8 = vsel %vm1678_vm5, %v2140_v31, %v5320_v24  ;;  %4076 = vmatpush3.bf16.msra.mxu1 %v2935_v18  ;;  %4081 = vmatprep.mubr.msk.bf16.mxu1 %vm4344_vm8, %v5921_v22  ;;  %v1426_v31 = vsel %vm856_vm6, %v5036_v55, %v5389_v48  ;;  %v5923_v55 = vld [vmem:[#allocation4_spill] sm:$0xff] }
 0x2c1   : > { %1229 = vst [vmem:[#allocation2 + $0x108] sm:$0xcc] %v1196_v20  ;;  %v3850_v54 = vcombine.low %v2139_v0, %v2162_v8  ;;  %4077 = vmatprep.subr.bf16.mxu1 %v5921_v22  ;;  %v2315_v37 = vld [vmem:[#allocation2 + $0x120] sm:$0xff] }
 0x2c2   : > { %v5616_v57 = vpop.permute.xlu1 %1829  ;;  %v1816_v5 = vpop.permute.xlu0 %1815  ;;  %3903 = vmatmul.mubr.msk.bf16.vlgmr.msra.gmra.mxu0 %vm2392_vm9, %v5475_v19  ;;  %v3912_v46 = vcombine.high %v2315_v37, %v2315_v37  ;;  %v3911_v63 = vcombine.low %v2315_v37, %v2315_v37 }
 0x2c3   : > { %v2227_v39 = vrot.slane %v3850_v54, 6  ;;  %v1841_v59 = vsel %vm1678_vm5, %v5320_v24, %v1816_v5  ;;  %v1842_v49 = vsel %vm1678_vm5, %v1816_v5, %v5369_v33  ;;  %2969 = vmatprep.mubr.bf16.mxu0 %v5922_v17 }
 0x2c4   : > { %v3818_v26 = vcombine.low %v1841_v59, %v1842_v49  ;;  %3914 = vmatprep.subr.msk.bf16.mxu0 %vm274_vm2, %v3912_v46  ;;  %v2929_v40 = vsel %vm274_vm2, %v3911_v63, 0 }
 0x2c5   : > { %2259 = vst [vmem:[#allocation2 + $0x15c] sm:$0xcc] %v2227_v39  ;;  %v4179_v42 = vld [vmem:[#allocation2 + $0x110] ss:$12 sps:$4 sm:$0xff]   ;;  %2948 = vmatpush1.bf16.msra.mxu0 %v2929_v40  ;;  %v1114_v39 = vsel %vm897_vm7, %v5923_v55, %v5586_v11 }
 0x2c6   : > { %1905 = vst [vmem:[#allocation2 + $0x15c] sm:$0x33] %v3818_v26  ;;  %v5630_v24 = vpop.permute.xlu1 %1058  ;;  %v1049_v2 = vpop.permute.xlu0 %1048  ;;  %4078 = vmatpush3.bf16.msra.mxu1 %v4179_v42  ;;  %v4197_v42 = vld [vmem:[#allocation2 + $0x1a0] ss:$0 sps:$4 sm:$0xff]  }
 0x2c7   : > { %v1065_v33 = vsel %vm856_vm6, %v1049_v2, %v5378_v60  ;;  %v1403_v52 = vsel %vm856_vm6, %v5339_v3, %v1049_v2  ;;  %v3763_v28 = vcombine.low %v1049_v2, %v1049_v2  ;;  %4079 = vmatprep.subr.bf16.mxu1 %v5921_v22  ;;  %v4183_v60 = vld [vmem:[#allocation2 + $0xf8] ss:$12 sps:$4 sm:$0xff]  }
 0x2c8   : > { %v1133_v58 = vsel %vm897_vm7, %v1065_v33, %v5328_v9  ;;  %v3762_v32 = vcombine.low %v1423_v51, %v1403_v52  ;;  %v4180_v13 = vld [vmem:[#allocation2 + $0x108] ss:$12 sps:$4 sm:$0xff]   ;;  %v4182_v1 = vld [vmem:[#allocation2 + $0x10c] ss:$12 sps:$4 sm:$0xff]   ;;  %v4196_v52 = vld [vmem:[#allocation2 + $0x130] ss:$12 sps:$4 sm:$0xff]  }
 0x2c9   : > { %v3730_v29 = vcombine.low %v1133_v58, %v1113_v34  ;;  %1505 = vst.msk [vmem:[#allocation2 + $0x158] sm:$0x3] %vm996_vm0, %v3763_v28  ;;  %2949 = vmatprep.subr.bf16.mxu0 %v4182_v1 }
 0x2ca   : > { %1504 = vst [vmem:[#allocation2 + $0x150] sm:$0x33] %v3762_v32  ;;  %v5643_v3 = vpop.permute.xlu1 %1106  ;;  %v2120_v4 = vpop.permute.xlu0 %2119  ;;  %4080 = vmatpush3.bf16.msra.mxu1 %v4183_v60  ;;  %2950 = vmatpush1.bf16.msra.mxu0 %v4180_v13  ;;  %v4194_v13 = vld [vmem:[#allocation2 + $0x12c] ss:$12 sps:$4 sm:$0xff]  }
 0x2cb   : > { %v1198_v15 = vrot.slane %v3730_v29, 6  ;;  %v3735_v9 = vcombine.low %v5643_v3, %v5643_v3  ;;  %v2141_v36 = vsel %vm1959_vm4, %v5393_v62, %v2120_v4  ;;  %v2142_v53 = vsel %vm1959_vm4, %v2120_v4, %v5387_v47  ;;  %2951 = vmatprep.subr.bf16.mxu0 %v4186_v6  ;;  %4085 = vmatprep.subr.bf16.mxu1 %v5921_v22 }
 0x2cc   : > { %v2165_v41 = vsel %vm1678_vm5, %v2142_v53, %v5348_v35  ;;  %v3068_v47 = vsel %vm274_vm2, %v4187_v56, 0 }
 0x2cd   : > { %1231 = vst [vmem:[#allocation2 + $0x144] sm:$0xcc] %v1198_v15  ;;  %v1203_v50 = vrot.slane %v3735_v9, 6  ;;  %v3852_v27 = vcombine.low %v2141_v36, %v2165_v41  ;;  %v2325_v14 = vld [vmem:[#allocation2 + $0x15c] sm:$0xff]  ;;  %4082 = vmatmul.mubr.msk.bf16.vlgmr.msra.gmra.mxu1 %vm2392_vm9, %v5475_v19 }
 0x2ce   : > { %v5654_v61 = vpop.permute.xlu1 %1957  ;;  %v1822_v62 = vpop.permute.xlu0 %1821  ;;  %v3924_v23 = vcombine.high %v2325_v14, %v2325_v14  ;;  %v3923_v12 = vcombine.low %v2325_v14, %v2325_v14  ;;  %4086 = vmatpush3.bf16.msra.mxu1 %v3068_v47  ;;  %2952 = vmatpush1.bf16.msra.mxu0 %v4184_v38  ;;  %v4207_v47 = vld [vmem:[#allocation2 + $0x1dc] ss:$0 sps:$4 sm:$0xff]  }
 0x2cf   : > { %1236 = vst.msk [vmem:[#allocation2 + $0x1c4] sm:$0xc] %vm1221_vm1, %v1203_v50  ;;  %v2229_v25 = vrot.slane %v3852_v27, 6  ;;  %v1843_v45 = vsel %vm1678_vm5, %v5348_v35, %v1822_v62  ;;  %v1844_v16 = vsel %vm1678_vm5, %v1822_v62, %v5399_v30  ;;  %4087 = vmatprep.subr.bf16.mxu1 %v5921_v22  ;;  %4091 = vmatprep.mubr.msk.bf16.mxu1 %vm4344_vm8, %v5921_v22  ;;  %v4203_v27 = vld [vmem:[#allocation2 + $0x170] ss:$12 sps:$4 sm:$0xff]  }
 0x2d0   : > { %v3820_v20 = vcombine.low %v1843_v45, %v1844_v16  ;;  %3926 = vmatprep.subr.msk.bf16.mxu0 %vm274_vm2, %v3924_v23  ;;  %v4189_v0 = vld [vmem:[#allocation2 + $0x14c] ss:$12 sps:$4 sm:$0xff]   ;;  %v3062_v18 = vsel %vm274_vm2, %v3923_v12, 0 }
 0x2d1   : > { %2261 = vst [vmem:[#allocation2 + $0x198] sm:$0xcc] %v2229_v25  ;;  %3915 = vmatmul.mubr.msk.bf16.vlgmr.msra.gmra.mxu0 %vm2392_vm9, %v5475_v19  ;;  %v4206_v45 = vld [vmem:[#allocation2 + $0x16c] ss:$12 sps:$4 sm:$0xff]  }
 0x2d2   : > { %1907 = vst [vmem:[#allocation2 + $0x198] sm:$0x33] %v3820_v20  ;;  %v5671_v35 = vpop.permute.xlu1 %1672  ;;  %v1053_v30 = vpop.permute.xlu0 %1052  ;;  %4088 = vmatpush3.bf16.msra.mxu1 %v4189_v0  ;;  %3081 = vmatpush1.bf16.msra.mxu0 %v3062_v18  ;;  %v4204_v0 = vld [vmem:[#allocation2 + $0x168] ss:$12 sps:$4 sm:$0xff]  }
 0x2d3   : > { %v3839_v8 = vcombine.low %v5671_v35, %v5671_v35  ;;  %v1066_v54 = vsel %vm856_vm6, %v1053_v30, %v5409_v44  ;;  %v1404_v5 = vsel %vm856_vm6, %v5389_v48, %v1053_v30  ;;  %v3765_v37 = vcombine.low %v1053_v30, %v1053_v30  ;;  %4089 = vmatprep.subr.bf16.mxu1 %v5921_v22  ;;  %v4193_v48 = vld [vmem:[#allocation2 + $0x134] ss:$12 sps:$4 sm:$0xff]  }
 0x2d4   : > { %v1136_v59 = vsel %vm897_vm7, %v1066_v54, %v5923_v55  ;;  %v3764_v49 = vcombine.low %v1426_v31, %v1404_v5  ;;  %v4190_v46 = vld [vmem:[#allocation2 + $0x144] ss:$12 sps:$4 sm:$0xff]   ;;  %v4192_v26 = vld [vmem:[#allocation2 + $0x148] ss:$12 sps:$4 sm:$0xff]   ;;  %3102 = vmatprep.mubr.bf16.mxu0 %v5922_v17 }
 0x2d5   : > { %2080 = vst.msk [vmem:[#allocation2 + $0x1c4] sm:$0x3] %vm996_vm0, %v3839_v8  ;;  %v3732_v44 = vcombine.low %v1136_v59, %v1114_v39  ;;  %1507 = vst.msk [vmem:[#allocation2 + $0x194] sm:$0x3] %vm996_vm0, %v3765_v37  ;;  %3082 = vmatprep.subr.bf16.mxu0 %v4192_v26  ;;  %v5924_v37 = vld [vmem:[#allocation3_spill] sm:$0xff] }
 0x2d6   : > { %1506 = vst [vmem:[#allocation2 + $0x18c] sm:$0x33] %v3764_v49  ;;  %v5691_v63 = vpop.permute.xlu1 %852  ;;  %v2126_v11 = vpop.permute.xlu0 %2125  ;;  %4090 = vmatpush3.bf16.msra.mxu1 %v4193_v48  ;;  %3083 = vmatpush1.bf16.msra.mxu0 %v4190_v46 }
 0x2d7   : > { %v1200_v51 = vrot.slane %v3732_v44, 6  ;;  %v3751_v40 = vcombine.low %v5691_v63, %v5691_v63  ;;  %v2143_v2 = vsel %vm1959_vm4, %v5601_v10, %v2126_v11  ;;  %v2144_v33 = vsel %vm1959_vm4, %v2126_v11, %v5550_v43  ;;  %4095 = vmatprep.subr.bf16.mxu1 %v5921_v22  ;;  %3084 = vmatprep.subr.bf16.mxu0 %v4196_v52 }
 0x2d8   : > { %v2168_v28 = vsel %vm1678_vm5, %v2144_v33, %v5552_v7  ;;  %v3201_v10 = vsel %vm274_vm2, %v4197_v42, 0 }
 0x2d9   : > { %1233 = vst [vmem:[#allocation2 + $0x180] sm:$0xcc] %v1200_v51  ;;  %v1349_v34 = vrot.slane %v3751_v40, 6  ;;  %v3854_v58 = vcombine.low %v2143_v2, %v2168_v28  ;;  %v2335_v32 = vld [vmem:[#allocation2 + $0x198] sm:$0xff]  ;;  %4092 = vmatmul.mubr.msk.bf16.vlgmr.msra.gmra.mxu1 %vm2392_vm9, %v5475_v19 }
 0x2da   : > { %v5702_v1 = vpop.permute.xlu1 %1674  ;;  %v1828_v43 = vpop.permute.xlu0 %1827  ;;  %v3936_v29 = vcombine.high %v2335_v32, %v2335_v32  ;;  %4096 = vmatpush3.bf16.msra.mxu1 %v3201_v10  ;;  %v3935_v56 = vcombine.low %v2335_v32, %v2335_v32  ;;  %4101 = vmatprep.mubr.msk.bf16.mxu1 %vm4344_vm8, %v5921_v22 }
 0x2db   : > { %1381 = vst.msk [vmem:[#allocation2 + $0x1ac] sm:$0xc] %vm1221_vm1, %v1349_v34  ;;  %v2231_v60 = vrot.slane %v3854_v58, 6  ;;  %v1845_v4 = vsel %vm1678_vm5, %v5552_v7, %v1828_v43  ;;  %v1846_v6 = vsel %vm1678_vm5, %v1828_v43, %v5616_v57  ;;  %3085 = vmatpush1.bf16.msra.mxu0 %v4194_v13  ;;  %4097 = vmatprep.subr.bf16.mxu1 %v5921_v22 }
 0x2dc   : > { %v3822_v15 = vcombine.low %v1845_v4, %v1846_v6  ;;  %v4199_v9 = vld [vmem:[#allocation2 + $0x188] ss:$12 sps:$4 sm:$0xff]   ;;  %3938 = vmatprep.subr.msk.bf16.mxu0 %vm274_vm2, %v3936_v29  ;;  %v3195_v57 = vsel %vm274_vm2, %v3935_v56, 0  ;;  %v1693_v2 = vsel %vm1678_vm5, %v5671_v35, %v5702_v1 }
 0x2dd   : > { %2263 = vst [vmem:[#allocation2 + $0x1d4] sm:$0xcc] %v2231_v60 }
 0x2de   : > { %1909 = vst [vmem:[#allocation2 + $0x1d4] sm:$0x33] %v3822_v15  ;;  %v5716_v36 = vpop.permute.xlu1 %854  ;;  %v1057_v7 = vpop.permute.xlu0 %1056  ;;  %3927 = vmatmul.mubr.msk.bf16.vlgmr.msra.gmra.mxu0 %vm2392_vm9, %v5475_v19  ;;  %4098 = vmatpush3.bf16.msra.mxu1 %v4199_v9 }
 0x2df   : > { %v3767_v53 = vcombine.low %v1057_v7, %v1057_v7  ;;  %3214 = vmatpush1.bf16.msra.mxu0 %v3195_v57  ;;  %4099 = vmatprep.subr.bf16.mxu1 %v5921_v22  ;;  %v1067_v38 = vsel %vm856_vm6, %v1057_v7, %v5630_v24  ;;  %v864_v58 = vsel %vm856_vm6, %v5691_v63, %v5716_v36 }
 0x2e0   : > { %v4200_v41 = vld [vmem:[#allocation2 + $0x180] ss:$12 sps:$4 sm:$0xff]   ;;  %v4202_v50 = vld [vmem:[#allocation2 + $0x184] ss:$12 sps:$4 sm:$0xff]   ;;  %3235 = vmatprep.mubr.bf16.mxu0 %v5922_v17 }
 0x2e1   : > { %1509 = vst.msk [vmem:[#allocation2 + $0x1d0] sm:$0x3] %vm996_vm0, %v3767_v53  ;;  %3215 = vmatprep.subr.bf16.mxu0 %v4202_v50 }
 0x2e2   : > { %v5726_v14 = vpop.permute.xlu1 %895  ;;  %v1105_v62 = vpop.permute.xlu0 %1104  ;;  %4100 = vmatpush3.bf16.msra.mxu1 %v4203_v27 }
 0x2e3   : > { %v3719_v23 = vcombine.low %v5726_v14, %v5726_v14  ;;  %v1115_v12 = vsel %vm897_vm7, %v1105_v62, %v5643_v3  ;;  %v1139_v25 = vsel %vm897_vm7, %v1067_v38, %v1105_v62  ;;  %3216 = vmatpush1.bf16.msra.mxu0 %v4200_v41  ;;  %4105 = vmatprep.subr.bf16.mxu1 %v5921_v22  ;;  %v3334_v3 = vsel %vm274_vm2, %v4207_v47, 0 }
 0x2e4   : > { %v3734_v16 = vcombine.low %v1139_v25, %v1115_v12  ;;  %3217 = vmatprep.subr.bf16.mxu0 %v4206_v45 }
 0x2e5   : > { %1011 = vst.msk [vmem:[#allocation2 + $0x1ac] sm:$0x3] %vm996_vm0, %v3719_v23  ;;  %v2345_v24 = vld [vmem:[#allocation2 + $0x1d4] sm:$0xff]  ;;  %4102 = vmatmul.mubr.msk.bf16.vlgmr.msra.gmra.mxu1 %vm2392_vm9, %v5475_v19 }
 0x2e6   : > { %v1202_v20 = vrot.slane %v3734_v16, 6  ;;  %v1956_v31 = vpop.permute.xlu0 %1955  ;;  %v3948_v30 = vcombine.high %v2345_v24, %v2345_v24  ;;  %4106 = vmatpush3.bf16.msra.mxu1 %v3334_v3  ;;  %v3947_v18 = vcombine.low %v2345_v24, %v2345_v24  ;;  %4111 = vmatprep.mubr.msk.bf16.mxu1 %vm4344_vm8, %v5921_v22 }
 0x2e7   : > { %3218 = vmatpush1.bf16.msra.mxu0 %v4204_v0  ;;  %4107 = vmatprep.subr.bf16.mxu1 %v5921_v22  ;;  %v1975_v59 = vsel %vm1959_vm4, %v1956_v31, %v5654_v61 }
 0x2e8   : > { %1235 = vst [vmem:[#allocation2 + $0x1bc] sm:$0xcc] %v1202_v20  ;;  %v4209_v8 = vld [vmem:[#allocation2 + $0x1c4] ss:$12 sps:$4 sm:$0xff]   ;;  %3950 = vmatprep.subr.msk.bf16.mxu0 %vm274_vm2, %v3948_v30  ;;  %v3328_v39 = vsel %vm274_vm2, %v3947_v18, 0  ;;  %v2000_v44 = vsel %vm1678_vm5, %v1975_v59, %v5671_v35 }
 0x2ea   : > { %v1397_v54 = vpop.permute.xlu0 %1396  ;;  %3939 = vmatmul.mubr.msk.bf16.vlgmr.msra.gmra.mxu0 %vm2392_vm9, %v5475_v19  ;;  %4108 = vmatpush3.bf16.msra.mxu1 %v4209_v8 }
 0x2eb   : > { %v1405_v5 = vsel %vm856_vm6, %v1397_v54, %v1057_v7  ;;  %v1429_v55 = vsel %vm856_vm6, %v5924_v37, %v1397_v54  ;;  %3347 = vmatpush1.bf16.msra.mxu0 %v3328_v39  ;;  %4109 = vmatprep.subr.bf16.mxu1 %v5921_v22 }
 0x2ec   : > { %v3766_v49 = vcombine.low %v1429_v55, %v1405_v5  ;;  %v4211_v46 = vld [vmem:[#allocation2 + $0x1ac] ss:$12 sps:$4 sm:$0xff]   ;;  %3368 = vmatprep.mubr.bf16.mxu0 %v5922_v17 }
 0x2ee   : > { %1508 = vst [vmem:[#allocation2 + $0x1c8] sm:$0x33] %v3766_v49  ;;  %v1954_v26 = vpop.permute.xlu0 %1953  ;;  %4110 = vmatpush3.bf16.msra.mxu1 %v4211_v46 }
 0x2ef   : > { %v1974_v48 = vsel %vm1959_vm4, %v1954_v26, %v1956_v31 }
 0x2f0   : > { %v3838_v11 = vcombine.low %v1974_v48, %v2000_v44 }
 0x2f1   : > { %4112 = vmatmul.mubr.msk.bf16.vlgmr.msra.gmra.mxu1 %vm2392_vm9, %v5475_v19 }
 0x2f2   : > { %2079 = vst [vmem:[#allocation2 + $0x1bc] sm:$0x33] %v3838_v11  ;;  %v1252_v61 = vpop.permute.xlu0 %1251 }
 0x2f3   : > { %v1260_v22 = vsel %vm856_vm6, %v1252_v61, %v5691_v63  ;;  %v1285_v17 = vsel %vm856_vm6, %v5141_v21, %v1252_v61 }
 0x2f4   : > { %v3750_v42 = vcombine.low %v1285_v17, %v1260_v22 }
 0x2f6   : > { %v1348_v51 = vrot.slane %v3750_v42, 6  ;;  %v1677_v40 = vpop.permute.xlu0 %1676 }
 0x2f7   : > { %v1694_v33 = vsel %vm1678_vm5, %v5702_v1, %v1677_v40 }
 0x2f8   : > { %1380 = vst [vmem:[#allocation2 + $0x1a4] sm:$0xcc] %v1348_v51  ;;  %v3806_v52 = vcombine.low %v1693_v2, %v1694_v33 }
 0x2f9   : > { %v4212_v28 = vld [vmem:[#allocation2 + $0x1bc] ss:$12 sps:$4 sm:$0xff]   ;;  %v4214_v34 = vld [vmem:[#allocation2 + $0x1c0] ss:$12 sps:$4 sm:$0xff]  }
 0x2fa   : > { %v1749_v32 = vrot.slane %v3806_v52, 6  ;;  %v894_v21 = vpop.permute.xlu0 %893  ;;  %3348 = vmatprep.subr.bf16.mxu0 %v4214_v34 }
 0x2fb   : > { %v905_v13 = vsel %vm897_vm7, %v894_v21, %v5726_v14  ;;  %v930_v43 = vsel %vm897_vm7, %v864_v58, %v894_v21  ;;  %3349 = vmatpush1.bf16.msra.mxu0 %v4212_v28 }
 0x2fc   : > { %1781 = vst [vmem:[#allocation2 + $0x1b0] sm:$0xcc] %v1749_v32  ;;  %v3718_v35 = vcombine.low %v930_v43, %v905_v13 }
 0x2fe   : > { %1010 = vst [vmem:[#allocation2 + $0x1a4] sm:$0x33] %v3718_v35 }
 0x305   : > { %v4215_v1 = vld [vmem:[#allocation2 + $0x1a4] ss:$12 sps:$4 sm:$0xff]   ;;  %v4217_v10 = vld [vmem:[#allocation2 + $0x1a8] ss:$12 sps:$4 sm:$0xff]  }
 0x306   : > { %3350 = vmatprep.subr.bf16.mxu0 %v4217_v10 }
 0x307   : > { %3351 = vmatpush1.bf16.msra.mxu0 %v4215_v1  ;;  %v5776_v29 = vpop.permute.xlu0 %3423 }
 0x30a   : > { %3951 = vmatmul.mubr.msk.bf16.vlgmr.msra.gmra.mxu0 %vm2392_vm9, %v5475_v19 }
 0x35a   : > { %v5774_v63 = vpop.f32.mrf.mxu1 }
 0x35c   : > { %v4043_v4 = vpop.f32.mrf.mxu1 }
 0x35d   : > { %v5778_v60 = vpop.f32.mrf.mxu0 }
 0x35e   : > { %v2485_v56 = vpop.f32.mrf.mxu1 }
 0x35f   : > { %v5780_v6 = vpop.f32.mrf.mxu0  ;;  %v3428_v15 = vadd.f32 %v5776_v29, %v2485_v56 }
 0x360   : > { %v4044_v36 = vpop.f32.mrf.mxu1 }
 0x361   : > { %v2443_v9 = vpop.f32.mrf.mxu0  ;;  %v3955_v7 = vmul.f32 -1.442695, %v3428_v15 }
 0x362   : > { %v3426_v53 = vadd.f32 %v5776_v29, %v2443_v9 }
 0x363   : > { %v2445_v57 = vpop.f32.mrf.mxu0  ;;  %4234 = vpow2.f32 %v3955_v7 }
 0x364   : > { %v3953_v19 = vmul.f32 -1.442695, %v3426_v53  ;;  %v3427_v41 = vadd.f32 %v5776_v29, %v2445_v57 }
 0x366   : > { %4236 = vpow2.f32 %v3953_v19  ;;  %v3954_v50 = vmul.f32 -1.442695, %v3427_v41 }
 0x367   : > { %v5785_v27 = vpop.f32.mrf.mxu1 }
 0x368   : > { %4238 = vpow2.f32 %v3954_v50 }
 0x369   : > { %v5787_v38 = vpop.f32.mrf.mxu0  ;;  %v4053_v14 = vpop.f32.mrf.mxu1 }
 0x36b   : > { %v5789_v62 = vpop.f32.mrf.mxu0  ;;  %v2618_v47 = vpop.f32.mrf.mxu1 }
 0x36c   : > { %v3431_v23 = vadd.f32 %v5776_v29, %v2618_v47 }
 0x36d   : > { %v2576_v12 = vpop.f32.mrf.mxu0  ;;  %v4054_v25 = vpop.f32.mrf.mxu1 }
 0x36e   : > { %v3958_v45 = vmul.f32 -1.442695, %v3431_v23  ;;  %v3429_v16 = vadd.f32 %v5776_v29, %v2576_v12 }
 0x36f   : > { %v2578_v24 = vpop.f32.mrf.mxu0 }
 0x370   : > { %4240 = vpow2.f32 %v3958_v45  ;;  %v3956_v20 = vmul.f32 -1.442695, %v3429_v16  ;;  %v3430_v0 = vadd.f32 %v5776_v29, %v2578_v24  ;;  %v4235_v31 = vpop.eup %4234 }
 0x371   : > { %v3524_v3 = vadd.f32 1.0, %v4235_v31 }
 0x372   : > { %4242 = vpow2.f32 %v3956_v20  ;;  %v3957_v30 = vmul.f32 -1.442695, %v3430_v0 }
 0x373   : > { %v4237_v18 = vpop.eup %4236  ;;  %v5794_v8 = vpop.f32.mrf.mxu1  ;;  %4244 = vrcp.f32 %v3524_v3 }
 0x374   : > { %v3522_v54 = vadd.f32 1.0, %v4237_v18  ;;  %4246 = vpow2.f32 %v3957_v30 }
 0x375   : > { %v4239_v5 = vpop.eup %4238  ;;  %v5796_v37 = vpop.f32.mrf.mxu0 }
 0x376   : > { %v4063_v55 = vpop.f32.mrf.mxu1  ;;  %4248 = vrcp.f32 %v3522_v54  ;;  %v3523_v39 = vadd.f32 1.0, %v4239_v5 }
 0x377   : > { %v5798_v59 = vpop.f32.mrf.mxu0 }
 0x378   : > { %v2751_v49 = vpop.f32.mrf.mxu1  ;;  %4250 = vrcp.f32 %v3523_v39 }
 0x379   : > { %v3434_v46 = vadd.f32 %v5776_v29, %v2751_v49  ;;  %v2709_v26 = vpop.f32.mrf.mxu0 }
 0x37a   : > { %v4064_v44 = vpop.f32.mrf.mxu1  ;;  %v3432_v11 = vadd.f32 %v5776_v29, %v2709_v26 }
 0x37b   : > { %v3961_v48 = vmul.f32 -1.442695, %v3434_v46  ;;  %v2711_v61 = vpop.f32.mrf.mxu0 }
 0x37c   : > { %v3959_v22 = vmul.f32 -1.442695, %v3432_v11  ;;  %v3433_v17 = vadd.f32 %v5776_v29, %v2711_v61 }
 0x37d   : > { %4252 = vpow2.f32 %v3961_v48  ;;  %v4241_v42 = vpop.eup %4240 }
 0x37e   : > { %v3527_v51 = vadd.f32 1.0, %v4241_v42  ;;  %4254 = vpow2.f32 %v3959_v22  ;;  %v3960_v40 = vmul.f32 -1.442695, %v3433_v17 }
 0x37f   : > { %v4243_v2 = vpop.eup %4242  ;;  %v5804_v33 = vpop.f32.mrf.mxu1 }
 0x380   : > { %4256 = vrcp.f32 %v3527_v51  ;;  %v3525_v52 = vadd.f32 1.0, %v4243_v2  ;;  %v4245_v28 = vpop.eup %4244 }
 0x381   : > { %4258 = vpow2.f32 %v3960_v40  ;;  %v4073_v34 = vpop.f32.mrf.mxu1  ;;  %v4247_v58 = vpop.eup %4246  ;;  %v3596_v32 = vmul.f32 %v4245_v28, %v5774_v63 }
 0x382   : > { %4260 = vrcp.f32 %v3525_v52  ;;  %v5812_v21 = vpop.f32.mrf.mxu0  ;;  %v3526_v43 = vadd.f32 1.0, %v4247_v58 }
 0x383   : > { %v4249_v13 = vpop.eup %4248  ;;  %v2884_v35 = vpop.f32.mrf.mxu1  ;;  %3620 = vst.msk [vmem:[%s5809_s20 + $0x10] sm:$0xff] %vm856_vm6, %v3596_v32 }
 0x384   : > { %v3594_v1 = vmul.f32 %v4249_v13, %v5778_v60  ;;  %v3437_v10 = vadd.f32 %v5776_v29, %v2884_v35  ;;  %v5818_v4 = vpop.f32.mrf.mxu0  ;;  %4262 = vrcp.f32 %v3526_v43 }
 0x385   : > { %v4251_v56 = vpop.eup %4250  ;;  %v4074_v15 = vpop.f32.mrf.mxu1 }
 0x386   : > { %3618 = vst [vmem:[%s5809_s20] sm:$0xff] %v3594_v1  ;;  %v3595_v63 = vmul.f32 %v4251_v56, %v5780_v6  ;;  %v3964_v9 = vmul.f32 -1.442695, %v3437_v10  ;;  %v2842_v36 = vpop.f32.mrf.mxu0 }
 0x387   : > { %v3435_v7 = vadd.f32 %v5776_v29, %v2842_v36 }
 0x388   : > { %3619 = vst [vmem:[%s5809_s20 + $0x8] sm:$0xff] %v3595_v63  ;;  %4264 = vpow2.f32 %v3964_v9  ;;  %v2844_v53 = vpop.f32.mrf.mxu0 }
 0x389   : > { %v3962_v19 = vmul.f32 -1.442695, %v3435_v7  ;;  %v3436_v60 = vadd.f32 %v5776_v29, %v2844_v53 }
 0x38a   : > { %v4253_v57 = vpop.eup %4252 }
 0x38b   : > { %v3530_v41 = vadd.f32 1.0, %v4253_v57  ;;  %v4255_v50 = vpop.eup %4254  ;;  %4266 = vpow2.f32 %v3962_v19  ;;  %v3963_v14 = vmul.f32 -1.442695, %v3436_v60 }
 0x38c   : > { %v3528_v47 = vadd.f32 1.0, %v4255_v50 }
 0x38d   : > { %4268 = vrcp.f32 %v3530_v41  ;;  %v4257_v6 = vpop.eup %4256  ;;  %v5826_v25 = vpop.f32.mrf.mxu1 }
 0x38e   : > { %4270 = vpow2.f32 %v3963_v14  ;;  %v4259_v23 = vpop.eup %4258  ;;  %v3599_v12 = vmul.f32 %v4257_v6, %v5785_v27 }
 0x38f   : > { %4272 = vrcp.f32 %v3528_v47  ;;  %v4261_v45 = vpop.eup %4260  ;;  %v3529_v16 = vadd.f32 1.0, %v4259_v23  ;;  %v4083_v20 = vpop.f32.mrf.mxu1 }
 0x390   : > { %3623 = vst.msk [vmem:[%s5809_s20 + $0x28] sm:$0xff] %vm856_vm6, %v3599_v12  ;;  %v3597_v24 = vmul.f32 %v4261_v45, %v5787_v38 }
 0x391   : > { %4274 = vrcp.f32 %v3529_v16  ;;  %v4263_v0 = vpop.eup %4262  ;;  %v3017_v31 = vpop.f32.mrf.mxu1 }
 0x392   : > { %3621 = vst [vmem:[%s5809_s20 + $0x18] sm:$0xff] %v3597_v24  ;;  %v5832_v3 = vpop.f32.mrf.mxu0  ;;  %v3598_v30 = vmul.f32 %v4263_v0, %v5789_v62  ;;  %v3440_v27 = vadd.f32 %v5776_v29, %v3017_v31 }
 0x393   : > { %v4084_v54 = vpop.f32.mrf.mxu1 }
 0x394   : > { %v5836_v18 = vpop.f32.mrf.mxu0  ;;  %3622 = vst [vmem:[%s5809_s20 + $0x20] sm:$0xff] %v3598_v30  ;;  %v3967_v55 = vmul.f32 -1.442695, %v3440_v27 }
 0x395   : > { %v4265_v5 = vpop.eup %4264 }
 0x396   : > { %v3533_v39 = vadd.f32 1.0, %v4265_v5  ;;  %v2975_v49 = vpop.f32.mrf.mxu0  ;;  %4276 = vpow2.f32 %v3967_v55 }
 0x397   : > { %v3438_v38 = vadd.f32 %v5776_v29, %v2975_v49 }
 0x398   : > { %v4267_v46 = vpop.eup %4266  ;;  %4278 = vrcp.f32 %v3533_v39  ;;  %v2977_v26 = vpop.f32.mrf.mxu0 }
 0x399   : > { %v3531_v48 = vadd.f32 1.0, %v4267_v46  ;;  %v3965_v62 = vmul.f32 -1.442695, %v3438_v38  ;;  %v3439_v11 = vadd.f32 %v5776_v29, %v2977_v26  ;;  %v5842_v17 = vpop.f32.mrf.mxu1 }
 0x39a   : > { %v4269_v44 = vpop.eup %4268 }
 0x39b   : > { %v4271_v61 = vpop.eup %4270  ;;  %v3602_v22 = vmul.f32 %v4269_v44, %v5794_v8  ;;  %4280 = vrcp.f32 %v3531_v48  ;;  %v3966_v40 = vmul.f32 -1.442695, %v3439_v11  ;;  %v4093_v52 = vpop.f32.mrf.mxu1 }
 0x39c   : > { %v4273_v42 = vpop.eup %4272  ;;  %v3532_v51 = vadd.f32 1.0, %v4271_v61  ;;  %4282 = vpow2.f32 %v3965_v62 }
 0x39d   : > { %3626 = vst.msk [vmem:[%s5809_s20 + $0x40] sm:$0xff] %vm856_vm6, %v3602_v22  ;;  %v3600_v2 = vmul.f32 %v4273_v42, %v5796_v37  ;;  %v3150_v34 = vpop.f32.mrf.mxu1 }
 0x39e   : > { %4284 = vrcp.f32 %v3532_v51  ;;  %v4275_v28 = vpop.eup %4274  ;;  %v3443_v58 = vadd.f32 %v5776_v29, %v3150_v34  ;;  %v5850_v32 = vpop.f32.mrf.mxu0 }
 0x39f   : > { %3624 = vst [vmem:[%s5809_s20 + $0x30] sm:$0xff] %v3600_v2  ;;  %4286 = vpow2.f32 %v3966_v40  ;;  %v3601_v8 = vmul.f32 %v4275_v28, %v5798_v59  ;;  %v4094_v13 = vpop.f32.mrf.mxu1 }
 0x3a0   : > { %v3970_v43 = vmul.f32 -1.442695, %v3443_v58  ;;  %v5853_v35 = vpop.f32.mrf.mxu0 }
 0x3a1   : > { %3625 = vst [vmem:[%s5809_s20 + $0x38] sm:$0xff] %v3601_v8 }
 0x3a2   : > { %4288 = vpow2.f32 %v3970_v43  ;;  %v3108_v37 = vpop.f32.mrf.mxu0 }
 0x3a3   : > { %v4277_v1 = vpop.eup %4276  ;;  %v3441_v10 = vadd.f32 %v5776_v29, %v3108_v37 }
 0x3a4   : > { %v3536_v15 = vadd.f32 1.0, %v4277_v1  ;;  %v3110_v63 = vpop.f32.mrf.mxu0 }
 0x3a5   : > { %v4279_v56 = vpop.eup %4278  ;;  %v3968_v9 = vmul.f32 -1.442695, %v3441_v10  ;;  %v3442_v36 = vadd.f32 %v5776_v29, %v3110_v63  ;;  %v5858_v7 = vpop.f32.mrf.mxu1 }
 0x3a6   : > { %v3605_v59 = vmul.f32 %v4279_v56, %v5804_v33  ;;  %4290 = vrcp.f32 %v3536_v15 }
 0x3a7   : > { %4292 = vpow2.f32 %v3968_v9  ;;  %v3969_v57 = vmul.f32 -1.442695, %v3442_v36  ;;  %v4103_v19 = vpop.f32.mrf.mxu1 }
 0x3a8   : > { %v4281_v53 = vpop.eup %4280  ;;  %3629 = vst.msk [vmem:[%s5809_s20 + $0x58] sm:$0xff] %vm856_vm6, %v3605_v59 }
 0x3a9   : > { %v4283_v60 = vpop.eup %4282  ;;  %v3603_v41 = vmul.f32 %v4281_v53, %v5812_v21  ;;  %4294 = vpow2.f32 %v3969_v57  ;;  %v3283_v33 = vpop.f32.mrf.mxu1 }
 0x3aa   : > { %v3534_v14 = vadd.f32 1.0, %v4283_v60  ;;  %v3446_v23 = vadd.f32 %v5776_v29, %v3283_v33  ;;  %v5866_v12 = vpop.f32.mrf.mxu0 }
 0x3ab   : > { %v4285_v50 = vpop.eup %4284  ;;  %3627 = vst [vmem:[%s5809_s20 + $0x48] sm:$0xff] %v3603_v41  ;;  %v4104_v16 = vpop.f32.mrf.mxu1 }
 0x3ac   : > { %v4287_v47 = vpop.eup %4286  ;;  %v3604_v6 = vmul.f32 %v4285_v50, %v5818_v4  ;;  %4296 = vrcp.f32 %v3534_v14  ;;  %v3973_v24 = vmul.f32 -1.442695, %v3446_v23  ;;  %v5869_v20 = vpop.f32.mrf.mxu0 }
 0x3ad   : > { %v3535_v45 = vadd.f32 1.0, %v4287_v47 }
 0x3ae   : > { %3628 = vst [vmem:[%s5809_s20 + $0x50] sm:$0xff] %v3604_v6  ;;  %v3241_v21 = vpop.f32.mrf.mxu0 }
 0x3af   : > { %4298 = vrcp.f32 %v3535_v45  ;;  %v4289_v0 = vpop.eup %4288  ;;  %v3444_v31 = vadd.f32 %v5776_v29, %v3241_v21 }
 0x3b0   : > { %4300 = vpow2.f32 %v3973_v24  ;;  %v3539_v30 = vadd.f32 1.0, %v4289_v0  ;;  %v3243_v4 = vpop.f32.mrf.mxu0 }
 0x3b1   : > { %v3971_v27 = vmul.f32 -1.442695, %v3444_v31  ;;  %v3445_v54 = vadd.f32 %v5776_v29, %v3243_v4  ;;  %v5873_v5 = vpop.f32.mrf.mxu1 }
 0x3b2   : > { %4302 = vrcp.f32 %v3539_v30 }
 0x3b3   : > { %v4291_v55 = vpop.eup %4290  ;;  %4304 = vpow2.f32 %v3971_v27  ;;  %v3972_v39 = vmul.f32 -1.442695, %v3445_v54  ;;  %v4113_v49 = vpop.f32.mrf.mxu1 }
 0x3b4   : > { %v4293_v38 = vpop.eup %4292  ;;  %v3608_v46 = vmul.f32 %v4291_v55, %v5826_v25 }
 0x3b5   : > { %v3537_v26 = vadd.f32 1.0, %v4293_v38  ;;  %4306 = vpow2.f32 %v3972_v39  ;;  %v3416_v44 = vpop.f32.mrf.mxu1 }
 0x3b6   : > { %v4295_v48 = vpop.eup %4294  ;;  %3632 = vst.msk [vmem:[%s5809_s20 + $0x70] sm:$0xff] %vm856_vm6, %v3608_v46  ;;  %v3449_v62 = vadd.f32 %v5776_v29, %v3416_v44 }
 0x3b7   : > { %4308 = vrcp.f32 %v3537_v26  ;;  %v3538_v11 = vadd.f32 1.0, %v4295_v48  ;;  %v4114_v61 = vpop.f32.mrf.mxu1 }
 0x3b8   : > { %v3976_v42 = vmul.f32 -1.442695, %v3449_v62 }
 0x3b9   : > { %v4297_v22 = vpop.eup %4296  ;;  %4310 = vrcp.f32 %v3538_v11 }
 0x3ba   : > { %v3606_v51 = vmul.f32 %v4297_v22, %v5832_v3  ;;  %4312 = vpow2.f32 %v3976_v42 }
 0x3bc   : > { %v4299_v25 = vpop.eup %4298  ;;  %3630 = vst [vmem:[%s5809_s20 + $0x60] sm:$0xff] %v3606_v51 }
 0x3bd   : > { %v4301_v40 = vpop.eup %4300  ;;  %v3607_v2 = vmul.f32 %v4299_v25, %v5836_v18 }
 0x3be   : > { %v3542_v52 = vadd.f32 1.0, %v4301_v40 }
 0x3bf   : > { %3631 = vst [vmem:[%s5809_s20 + $0x68] sm:$0xff] %v3607_v2  ;;  %v4303_v28 = vpop.eup %4302 }
 0x3c0   : > { %4314 = vrcp.f32 %v3542_v52  ;;  %v4305_v34 = vpop.eup %4304  ;;  %v3611_v8 = vmul.f32 %v4303_v28, %v5842_v17 }
 0x3c1   : > { %v3540_v58 = vadd.f32 1.0, %v4305_v34 }
 0x3c2   : > { %v4307_v13 = vpop.eup %4306  ;;  %3635 = vst.msk [vmem:[%s5809_s20 + $0x88] sm:$0xff] %vm856_vm6, %v3611_v8 }
 0x3c3   : > { %4316 = vrcp.f32 %v3540_v58  ;;  %v3541_v3 = vadd.f32 1.0, %v4307_v13 }
 0x3c4   : > { %v4309_v43 = vpop.eup %4308 }
 0x3c5   : > { %v3609_v37 = vmul.f32 %v4309_v43, %v5850_v32  ;;  %4318 = vrcp.f32 %v3541_v3 }
 0x3c6   : > { %v4311_v18 = vpop.eup %4310 }
 0x3c7   : > { %v4313_v1 = vpop.eup %4312  ;;  %3633 = vst [vmem:[%s5809_s20 + $0x78] sm:$0xff] %v3609_v37  ;;  %v3610_v10 = vmul.f32 %v4311_v18, %v5853_v35 }
 0x3c8   : > { %v3545_v56 = vadd.f32 1.0, %v4313_v1 }
 0x3c9   : > { %3634 = vst [vmem:[%s5809_s20 + $0x80] sm:$0xff] %v3610_v10 }
 0x3ca   : > { %4320 = vrcp.f32 %v3545_v56  ;;  %v3370_v17 = vpop.f32.mrf.mxu0 }
 0x3cc   : > { %v3372_v59 = vpop.f32.mrf.mxu0 }
 0x3cd   : > { %v4315_v15 = vpop.eup %4314 }
 0x3ce   : > { %v3614_v63 = vmul.f32 %v4315_v15, %v5858_v7  ;;  %v3374_v9 = vpop.f32.mrf.mxu0 }
 0x3cf   : > { %v3447_v32 = vadd.f32 %v5776_v29, %v3374_v9 }
 0x3d0   : > { %3638 = vst.msk [vmem:[%s5809_s20 + $0xa0] sm:$0xff] %vm856_vm6, %v3614_v63  ;;  %v4317_v36 = vpop.eup %4316  ;;  %v3376_v53 = vpop.f32.mrf.mxu0 }
 0x3d1   : > { %v3612_v35 = vmul.f32 %v4317_v36, %v5866_v12  ;;  %v3974_v57 = vmul.f32 -1.442695, %v3447_v32  ;;  %v3448_v19 = vadd.f32 %v5776_v29, %v3376_v53 }
 0x3d2   : > { %v4319_v60 = vpop.eup %4318 }
 0x3d3   : > { %3636 = vst [vmem:[%s5809_s20 + $0x90] sm:$0xff] %v3612_v35  ;;  %v3613_v41 = vmul.f32 %v4319_v60, %v5869_v20  ;;  %4322 = vpow2.f32 %v3974_v57  ;;  %v3975_v7 = vmul.f32 -1.442695, %v3448_v19 }
 0x3d5   : > { %3637 = vst [vmem:[%s5809_s20 + $0x98] sm:$0xff] %v3613_v41  ;;  %4324 = vpow2.f32 %v3975_v7 }
 0x3d7   : > { %v4321_v50 = vpop.eup %4320 }
 0x3d8   : > { %v3617_v14 = vmul.f32 %v4321_v50, %v5873_v5 }
 0x3da   : > { %3641 = vst.msk [vmem:[%s5809_s20 + $0xb8] sm:$0xff] %vm856_vm6, %v3617_v14 }
 0x3e0   : > { %v4323_v33 = vpop.eup %4322 }
 0x3e1   : > { %v3543_v47 = vadd.f32 1.0, %v4323_v33 }
 0x3e2   : > { %v4325_v6 = vpop.eup %4324 }
 0x3e3   : > { %4326 = vrcp.f32 %v3543_v47  ;;  %v3544_v29 = vadd.f32 1.0, %v4325_v6 }
 0x3e5   : > { %4328 = vrcp.f32 %v3544_v29 }
 0x3f0   : > { %v4327_v23 = vpop.eup %4326 }
 0x3f1   : > { %v3615_v12 = vmul.f32 %v4327_v23, %v3370_v17 }
 0x3f2   : > { %v4329_v45 = vpop.eup %4328 }
 0x3f3   : > { %3639 = vst [vmem:[%s5809_s20 + $0xa8] sm:$0xff] %v3615_v12  ;;  %v3616_v16 = vmul.f32 %v4329_v45, %v3372_v59 }
 0x3f5   : > { %3640 = vst [vmem:[%s5809_s20 + $0xb0] sm:$0xff] %v3616_v16 }
 0x3f6 PF: > { %s15_s18 = sadd.s32 1, %s4336_s18  }
 0x3f7   : > { %p12_p4 = scmp.ge.s32.totalorder %s15_s18, 4  }
 0x3f9   :  { %14 = sbr.rel (!%p12_p4) target bundleno = 1 (0x1), region = 70 }

</bundles_post_ra>
